<compile_context>
chip_gen: v7x
topology: tpu7x:2x2x1
jax: 0.10.0
libtpu: 0.0.40
codegen_flags: <defaults>
</compile_context>

<pallas_src>
import numpy as np
import jax
import jax.numpy as jnp
from jax import lax
from jax.experimental import pallas as pl
from jax.experimental.pallas import tpu as pltpu

NUM_AGENTS = 8                      # agents per environment step
NUM_ACTIONS = 5                     # stand-in for len(env.get_action_space())
OBS_C, OBS_H, OBS_W = 2, 20, 20     # -> conv stack output 32 x 2 x 2 = 128
OBS_FLAT = OBS_C * OBS_H * OBS_W    # 800
IN_PAD = 896                        # 7 * 128: lane-dense K for the first matmul
GAT_FEAT = 2 * 2 * 64               # 256 = cat(self embedding 128, GAT out 128)
HID = 500                           # PyTorch hidden width
HID_PAD = 512                       # lane-dense padding of the 500-wide hidden dim
OUT_PAD = 128                       # combined lane-dense output width
NEG_INF = -1e30                     # pad-lane logit bias (softmax mass -> 0)

_HIGH = jax.lax.Precision.HIGHEST   # only used by the pure-JAX reference


def _round_up(x, m):
    return (x + m - 1) // m * m


# -----------------------------------------------------------------------------
# Fused Pallas kernel.  grid=(batch_blocks,), "parallel".  Per step it sees one
# (TB, .) activation block; every weight/bias ref has a constant index_map so it
# is fetched once and stays resident in VMEM for all grid steps.
# -----------------------------------------------------------------------------
def _mm(a, w_ref):
    # Single-pass bf16 MXU matmul with f32 accumulation.  Weights are stored
    # bf16; activations stay f32 everywhere else (v5e VPU/EUP have no bf16 path)
    # and are cast only at the MXU input.
    return jnp.dot(a.astype(jnp.bfloat16), w_ref[...],
                   preferred_element_type=jnp.float32)


def _actor_critic_kernel(x_ref, g_ref,
                         t1, b1, t2, b2, t3, b3,
                         vw1, vc1, vw2, vc2, vw3, vc3,
                         pw1, pb1, pw2, pb2, pw3, pb3,
                         out_ref):
    """value_layer (feature2 convs as Toeplitz matmuls + reg2) and the reg1 tail
    of action_layer (MLP + Softmax), fused; one lane-dense (TB, 128) output with
    the state value in lane 0 and the action probabilities in lanes 1..A."""
    # ---- value head ---------------------------------------------------------
    h = jnp.maximum(_mm(x_ref[...], t1) + b1[...], 0.0)   # Conv2d(2,16,(8,8),4,1)+ReLU
    h = jnp.maximum(_mm(h, t2) + b2[...], 0.0)            # Conv2d(16,32,(4,4),2,1)+ReLU
    h = jnp.maximum(_mm(h, t3) + b3[...], 0.0)            # Conv2d(32,32,(3,3),1,1)+ReLU (+Flatten)
    h = jnp.maximum(_mm(h, vw1) + vc1[...], 0.0)          # Linear(128,500->512)+ReLU
    h = jnp.maximum(_mm(h, vw2) + vc2[...], 0.0)          # Linear(500->512,256)+ReLU
    # Linear(256,1): VPU broadcast-mul + lane reduce instead of a 1-column MXU matmul.
    value = jnp.sum(h * vw3[...], axis=-1, keepdims=True) + vc3[...]     # (TB, 1)

    # ---- policy head (reg1) -------------------------------------------------
    p = jnp.maximum(_mm(g_ref[...], pw1) + pb1[...], 0.0)  # Linear(256,500->512)+ReLU
    p = jnp.maximum(_mm(p, pw2) + pb2[...], 0.0)           # Linear(500->512,256)+ReLU
    # Linear(256,A) padded to 128 output lanes: actions live in lanes 1..A, every
    # other lane carries a -1e30 bias so exp() underflows to exactly 0.
    logits = _mm(p, pw3) + pb3[...]                        # (TB, 128)
    m = jnp.max(logits, axis=-1, keepdims=True)
    e = jnp.exp(logits - m)
    probs = e / jnp.sum(e, axis=-1, keepdims=True)         # exact: probs sum to 1

    # Single unmasked lane-dense store: lane 0 <- value, lanes 1..A <- probs.
    lane = lax.broadcasted_iota(jnp.int32, out_ref.shape, 1)
    value_b = jnp.broadcast_to(value, out_ref.shape)
    out_ref[...] = jnp.where(lane == 0, value_b, probs)


def actor_critic_forward(state_nchw, gat_feat, kp, *, block_rows=128):
    """Batched forward of both heads.  `block_rows`: 128 (default, v5e MXU rows
    and guarantees >=2 parallel grid steps at modest rollouts); use 256 on
    v6e/v7x when the batch is >= 512 rows."""
    n = state_nchw.shape[0]
    x_flat = state_nchw.reshape(n, -1)                       # PyTorch NCHW flatten order
    x_flat = jnp.pad(x_flat, ((0, 0), (0, IN_PAD - OBS_FLAT)))  # 800 -> 896 lane-dense K

    tb = _round_up(min(block_rows, _round_up(n, 8)), 8)
    n_pad = _round_up(n, tb)
    if n_pad != n:
        x_flat = jnp.pad(x_flat, ((0, n_pad - n), (0, 0)))
        gat_feat = jnp.pad(gat_feat, ((0, n_pad - n), (0, 0)))

    weight_keys = ("t1", "b1", "t2", "b2", "t3", "b3",
                   "vw1", "vc1", "vw2", "vc2", "vw3", "vc3",
                   "pw1", "pb1", "pw2", "pb2", "pw3", "pb3")
    w_args = tuple(kp[k] for k in weight_keys)

    def resident(a):
        # Constant block index -> the weight is DMA'd once and stays in VMEM
        # across all grid steps.
        return pl.BlockSpec(a.shape, lambda i: (0,) * a.ndim)

    out = pl.pallas_call(
        _actor_critic_kernel,
        out_shape=jax.ShapeDtypeStruct((n_pad, OUT_PAD), jnp.float32),
        grid_spec=pltpu.PrefetchScalarGridSpec(
            num_scalar_prefetch=0,
            grid=(n_pad // tb,),
            in_specs=[pl.BlockSpec((tb, IN_PAD), lambda i: (i, 0)),
                      pl.BlockSpec((tb, GAT_FEAT), lambda i: (i, 0))]
                     + [resident(a) for a in w_args],
            out_specs=pl.BlockSpec((tb, OUT_PAD), lambda i: (i, 0))),
        compiler_params=pltpu.CompilerParams(
            dimension_semantics=("parallel",)),
    )(x_flat, gat_feat, *w_args)

    state_value = out[:n, 0:1]
    action_probs = out[:n, 1:1 + NUM_ACTIONS]
    return state_value, action_probs


# -----------------------------------------------------------------------------
# Parameter setup (plain numpy / JAX glue): PyTorch-layout weights, their
# Toeplitz re-expression for the conv layers, bf16 storage, lane-dense padding.
# -----------------------------------------------------------------------------
def conv_toeplitz(w, b, in_chw, stride, pad):
    """Dense Toeplitz matrix for Conv2d, NCHW-flatten ordering on both sides."""
    w = np.asarray(w, np.float32)
    b = np.asarray(b, np.float32)
    cout, cin, kh, kw = w.shape
    c, h, wd = in_chw
    assert c == cin
    oh = (h + 2 * pad - kh) // stride + 1
    ow = (wd + 2 * pad - kw) // stride + 1
    t = np.zeros((c * h * wd, cout * oh * ow), np.float32)
    for co in range(cout):
        for i in range(oh):
            for j in range(ow):
                col = co * oh * ow + i * ow + j
                for ci in range(cin):
                    for u in range(kh):
                        ih = i * stride + u - pad
                        if ih < 0 or ih >= h:
                            continue
                        for v in range(kw):
                            iw = j * stride + v - pad
                            if iw < 0 or iw >= wd:
                                continue
                            t[ci * h * wd + ih * wd + iw, col] = w[co, ci, u, v]
    bias = np.repeat(b, oh * ow).astype(np.float32)
    return t, bias, (cout, oh, ow)


def _pad_cols(w, to):
    w = np.asarray(w, np.float32)
    return np.pad(w, ((0, 0), (0, to - w.shape[1])))


def _pad_rows(w, to):
    w = np.asarray(w, np.float32)
    return np.pad(w, ((0, to - w.shape[0]), (0, 0)))


def _pad_vec(v, to):
    v = np.asarray(v, np.float32)
    return np.pad(v, (0, to - v.shape[0]))


def _bf16(x):
    return jnp.asarray(np.asarray(x, np.float32), jnp.bfloat16)


def _frow(x):
    return jnp.asarray(np.asarray(x, np.float32))[None, :]


def init_params(key):
    def normal(k, shape, fan_in):
        return jax.random.normal(k, shape, jnp.float32) / np.sqrt(fan_in)

    ks = jax.random.split(key, 18)
    # feature2 convs (PyTorch OIHW layout)
    cw1 = normal(ks[0], (16, 2, 8, 8), 2 * 8 * 8);   cb1 = normal(ks[1], (16,), 128)
    cw2 = normal(ks[2], (32, 16, 4, 4), 16 * 4 * 4); cb2 = normal(ks[3], (32,), 256)
    cw3 = normal(ks[4], (32, 32, 3, 3), 32 * 3 * 3); cb3 = normal(ks[5], (32,), 288)
    # reg2 (PyTorch Linear layout: (out, in))
    vw1 = normal(ks[6], (HID, 128), 128);  vb1 = normal(ks[7], (HID,), 128)
    vw2 = normal(ks[8], (256, HID), HID);  vb2 = normal(ks[9], (256,), HID)
    vw3 = normal(ks[10], (1, 256), 256);   vb3 = normal(ks[11], (1,), 256)
    # reg1
    pw1 = normal(ks[12], (HID, GAT_FEAT), GAT_FEAT); pb1 = normal(ks[13], (HID,), GAT_FEAT)
    pw2 = normal(ks[14], (256, HID), HID);           pb2 = normal(ks[15], (256,), HID)
    pw3 = normal(ks[16], (NUM_ACTIONS, 256), 256);   pb3 = normal(ks[17], (NUM_ACTIONS,), 256)

    torch_params = dict(cw1=cw1, cb1=cb1, cw2=cw2, cb2=cb2, cw3=cw3, cb3=cb3,
                        vw1=vw1, vb1=vb1, vw2=vw2, vb2=vb2, vw3=vw3, vb3=vb3,
                        pw1=pw1, pb1=pb1, pw2=pw2, pb2=pb2, pw3=pw3, pb3=pb3)

    t1, tb1, s1 = conv_toeplitz(cw1, cb1, (OBS_C, OBS_H, OBS_W), 4, 1)
    t2, tb2, s2 = conv_toeplitz(cw2, cb2, s1, 2, 1)
    t3, tb3, s3 = conv_toeplitz(cw3, cb3, s2, 1, 1)
    assert s3 == (32, 2, 2), s3  # must match Linear(2*2*32, 500)

    # final policy Linear padded to 128 output lanes: actions in lanes 1..A,
    # pad lanes get a -1e30 bias so the in-kernel softmax gives them zero mass.
    pw3_pad = np.zeros((256, OUT_PAD), np.float32)
    pw3_pad[:, 1:1 + NUM_ACTIONS] = np.asarray(pw3, np.float32).T
    pb3_pad = np.full((OUT_PAD,), NEG_INF, np.float32)
    pb3_pad[1:1 + NUM_ACTIONS] = np.asarray(pb3, np.float32)

    kernel_params = dict(
        # feature2 convs as bf16 Toeplitz matmuls (biases kept f32);
        # t1 rows padded 800 -> 896 to match the lane-dense padded observation.
        t1=_bf16(_pad_rows(t1, IN_PAD)), b1=_frow(tb1),
        t2=_bf16(t2), b2=_frow(tb2),
        t3=_bf16(t3), b3=_frow(tb3),
        # reg2: transpose to (in, out), zero-pad hidden 500 -> 512 (lane-dense)
        vw1=_bf16(_pad_cols(np.asarray(vw1).T, HID_PAD)),
        vc1=_frow(_pad_vec(vb1, HID_PAD)),
        vw2=_bf16(_pad_rows(np.asarray(vw2).T, HID_PAD)),
        vc2=_frow(vb2),
        vw3=jnp.asarray(np.asarray(vw3, np.float32)),            # (1,256) f32 row, VPU reduce
        vc3=jnp.asarray(np.asarray(vb3, np.float32))[None, :],   # (1,1)
        # reg1 with the same 500 -> 512 padding
        pw1=_bf16(_pad_cols(np.asarray(pw1).T, HID_PAD)),
        pb1=_frow(_pad_vec(pb1, HID_PAD)),
        pw2=_bf16(_pad_rows(np.asarray(pw2).T, HID_PAD)),
        pb2=_frow(pb2),
        pw3=_bf16(pw3_pad),
        pb3=_frow(pb3_pad),
    )
    return torch_params, kernel_params


# -----------------------------------------------------------------------------
# Pure-JAX references of the PyTorch semantics (sanity checks only).
# -----------------------------------------------------------------------------
def _dot_ref(a, b):
    return jnp.dot(a, b, preferred_element_type=jnp.float32, precision=_HIGH)


def value_ref(x_nchw, tp):
    def conv(h, w, b, stride):
        y = lax.conv_general_dilated(h, w, (stride, stride), [(1, 1), (1, 1)],
                                     dimension_numbers=("NCHW", "OIHW", "NCHW"),
                                     precision=_HIGH)
        return jnp.maximum(y + b[None, :, None, None], 0.0)

    h = conv(x_nchw, tp["cw1"], tp["cb1"], 4)
    h = conv(h, tp["cw2"], tp["cb2"], 2)
    h = conv(h, tp["cw3"], tp["cb3"], 1)
    h = h.reshape(h.shape[0], -1)                                   # nn.Flatten (NCHW)
    h = jnp.maximum(_dot_ref(h, tp["vw1"].T) + tp["vb1"], 0.0)
    h = jnp.maximum(_dot_ref(h, tp["vw2"].T) + tp["vb2"], 0.0)
    return _dot_ref(h, tp["vw3"].T) + tp["vb3"]


def reg1_ref(feat, tp):
    h = jnp.maximum(_dot_ref(feat, tp["pw1"].T) + tp["pb1"], 0.0)
    h = jnp.maximum(_dot_ref(h, tp["pw2"].T) + tp["pb2"], 0.0)
    logits = _dot_ref(h, tp["pw3"].T) + tp["pb3"]
    return jax.nn.softmax(logits, axis=-1)


if __name__ == "__main__":
    key = jax.random.PRNGKey(0)
    k_state, k_feat, k_param = jax.random.split(key, 3)
    torch_params, kparams = init_params(k_param)

    # Whole-rollout evaluate() batch: (agents x timesteps) rows per launch so the
    # weight DMA / launch overhead is amortized and the MXU rows are filled.
    ROLLOUT_T = 32
    batch = NUM_AGENTS * ROLLOUT_T          # 256 rows -> grid of 2 parallel blocks
    state = jax.random.normal(k_state, (batch, OBS_C, OBS_H, OBS_W), jnp.float32)
    # TODO(synk): EMG.embedding_layer and the dgl-based EMG.GAT / FC_graph of
    # action_layer are undefined external modules with no clean Pallas
    # equivalent; the fused kernel consumes their concatenated 2*2*64-dim
    # per-agent feature directly.
    gat_feat = jax.random.normal(k_feat, (batch, GAT_FEAT), jnp.float32)

    fwd = jax.jit(actor_critic_forward, static_argnames=("block_rows",))
    state_value, action_probs = jax.block_until_ready(fwd(state, gat_feat, kparams))

    # Sanity checks against the pure-JAX references of the PyTorch semantics.
    np.testing.assert_allclose(np.asarray(state_value),
                               np.asarray(value_ref(state, torch_params)),
                               rtol=3e-2, atol=3e-2)
    np.testing.assert_allclose(np.asarray(action_probs),
                               np.asarray(reg1_ref(gat_feat, torch_params)),
                               rtol=3e-2, atol=3e-2)
    np.testing.assert_allclose(np.asarray(action_probs).sum(-1),
                               np.ones(batch), rtol=0.0, atol=1e-4)
    assert state_value.shape == (batch, 1)
    assert action_probs.shape == (batch, NUM_ACTIONS)

    # Small per-step act() path (N = 8 agents, single padded block) still works
    # and matches the batched result row-for-row.
    sv8, ap8 = jax.block_until_ready(
        fwd(state[:NUM_AGENTS], gat_feat[:NUM_AGENTS], kparams))
    np.testing.assert_allclose(np.asarray(sv8), np.asarray(state_value[:NUM_AGENTS]),
                               rtol=1e-5, atol=1e-5)
    np.testing.assert_allclose(np.asarray(ap8), np.asarray(action_probs[:NUM_AGENTS]),
                               rtol=1e-5, atol=1e-5)

    print("KERNEL_OK")
</pallas_src>

<mosaic_0001>
module attributes {stable_mosaic.version = 11 : i64} {
  func.func @_actor_critic_kernel(%arg0: i32, %arg1: memref<128x896xf32, #tpu.memory_space<vmem>>, %arg2: memref<128x256xf32, #tpu.memory_space<vmem>>, %arg3: memref<896x256xbf16, #tpu.memory_space<vmem>>, %arg4: memref<1x256xf32, #tpu.memory_space<vmem>>, %arg5: memref<256x128xbf16, #tpu.memory_space<vmem>>, %arg6: memref<1x128xf32, #tpu.memory_space<vmem>>, %arg7: memref<128x128xbf16, #tpu.memory_space<vmem>>, %arg8: memref<1x128xf32, #tpu.memory_space<vmem>>, %arg9: memref<128x512xbf16, #tpu.memory_space<vmem>>, %arg10: memref<1x512xf32, #tpu.memory_space<vmem>>, %arg11: memref<512x256xbf16, #tpu.memory_space<vmem>>, %arg12: memref<1x256xf32, #tpu.memory_space<vmem>>, %arg13: memref<1x256xf32, #tpu.memory_space<vmem>>, %arg14: memref<1x1xf32, #tpu.memory_space<vmem>>, %arg15: memref<256x512xbf16, #tpu.memory_space<vmem>>, %arg16: memref<1x512xf32, #tpu.memory_space<vmem>>, %arg17: memref<512x256xbf16, #tpu.memory_space<vmem>>, %arg18: memref<1x256xf32, #tpu.memory_space<vmem>>, %arg19: memref<256x128xbf16, #tpu.memory_space<vmem>>, %arg20: memref<1x128xf32, #tpu.memory_space<vmem>>, %arg21: memref<128x128xf32, #tpu.memory_space<vmem>>) attributes {dimension_semantics = [#tpu.dimension_semantics<parallel>], iteration_bounds = array<i64: 2>, scalar_prefetch = 0 : i64, scratch_operands = 0 : i64, tpu.core_type = #tpu.core_type<tc>, window_params = [{transform_indices = @transform_0, window_bounds = array<i64: 128, 896>}, {transform_indices = @transform_1, window_bounds = array<i64: 128, 256>}, {pipeline_mode = #tpu.pipeline_mode<synchronous>, transform_indices = @transform_2, window_bounds = array<i64: 896, 256>}, {pipeline_mode = #tpu.pipeline_mode<synchronous>, transform_indices = @transform_3, window_bounds = array<i64: 1, 256>}, {pipeline_mode = #tpu.pipeline_mode<synchronous>, transform_indices = @transform_4, window_bounds = array<i64: 256, 128>}, {pipeline_mode = #tpu.pipeline_mode<synchronous>, transform_indices = @transform_5, window_bounds = array<i64: 1, 128>}, {pipeline_mode = #tpu.pipeline_mode<synchronous>, transform_indices = @transform_6, window_bounds = array<i64: 128, 128>}, {pipeline_mode = #tpu.pipeline_mode<synchronous>, transform_indices = @transform_7, window_bounds = array<i64: 1, 128>}, {pipeline_mode = #tpu.pipeline_mode<synchronous>, transform_indices = @transform_8, window_bounds = array<i64: 128, 512>}, {pipeline_mode = #tpu.pipeline_mode<synchronous>, transform_indices = @transform_9, window_bounds = array<i64: 1, 512>}, {pipeline_mode = #tpu.pipeline_mode<synchronous>, transform_indices = @transform_10, window_bounds = array<i64: 512, 256>}, {pipeline_mode = #tpu.pipeline_mode<synchronous>, transform_indices = @transform_11, window_bounds = array<i64: 1, 256>}, {pipeline_mode = #tpu.pipeline_mode<synchronous>, transform_indices = @transform_12, window_bounds = array<i64: 1, 256>}, {pipeline_mode = #tpu.pipeline_mode<synchronous>, transform_indices = @transform_13, window_bounds = array<i64: 1, 1>}, {pipeline_mode = #tpu.pipeline_mode<synchronous>, transform_indices = @transform_14, window_bounds = array<i64: 256, 512>}, {pipeline_mode = #tpu.pipeline_mode<synchronous>, transform_indices = @transform_15, window_bounds = array<i64: 1, 512>}, {pipeline_mode = #tpu.pipeline_mode<synchronous>, transform_indices = @transform_16, window_bounds = array<i64: 512, 256>}, {pipeline_mode = #tpu.pipeline_mode<synchronous>, transform_indices = @transform_17, window_bounds = array<i64: 1, 256>}, {pipeline_mode = #tpu.pipeline_mode<synchronous>, transform_indices = @transform_18, window_bounds = array<i64: 256, 128>}, {pipeline_mode = #tpu.pipeline_mode<synchronous>, transform_indices = @transform_19, window_bounds = array<i64: 1, 128>}, {transform_indices = @transform_20, window_bounds = array<i64: 128, 128>}]} {
    %c0 = arith.constant 0 : index
    %c0_0 = arith.constant 0 : index
    %0 = vector.load %arg1[%c0, %c0_0] : memref<128x896xf32, #tpu.memory_space<vmem>>, vector<128x896xf32>
    %1 = arith.truncf %0 : vector<128x896xf32> to vector<128x896xbf16>
    %c0_1 = arith.constant 0 : index
    %c0_2 = arith.constant 0 : index
    %2 = vector.load %arg3[%c0_1, %c0_2] : memref<896x256xbf16, #tpu.memory_space<vmem>>, vector<896x256xbf16>
    %cst = arith.constant dense<0.000000e+00> : vector<128x256xf32>
    %3 = tpu.matmul %1, %2, %cst {dimension_numbers = #tpu.dot_dimension_numbers<[1], [0], [0], [1], [0, 0, 1, 1], [], []>} : vector<128x896xbf16>, vector<896x256xbf16>, vector<128x256xf32> -> vector<128x256xf32>
    %c0_3 = arith.constant 0 : index
    %c0_4 = arith.constant 0 : index
    %4 = vector.load %arg4[%c0_3, %c0_4] : memref<1x256xf32, #tpu.memory_space<vmem>>, vector<1x256xf32>
    %5 = vector.broadcast %4 : vector<1x256xf32> to vector<128x256xf32>
    %6 = arith.addf %3, %5 : vector<128x256xf32>
    %cst_5 = arith.constant 0.000000e+00 : f32
    %7 = vector.broadcast %cst_5 : f32 to vector<128x256xf32>
    %8 = arith.maximumf %6, %7 : vector<128x256xf32>
    %9 = arith.truncf %8 : vector<128x256xf32> to vector<128x256xbf16>
    %c0_6 = arith.constant 0 : index
    %c0_7 = arith.constant 0 : index
    %10 = vector.load %arg5[%c0_6, %c0_7] : memref<256x128xbf16, #tpu.memory_space<vmem>>, vector<256x128xbf16>
    %cst_8 = arith.constant dense<0.000000e+00> : vector<128x128xf32>
    %11 = tpu.matmul %9, %10, %cst_8 {dimension_numbers = #tpu.dot_dimension_numbers<[1], [0], [0], [1], [0, 0, 1, 1], [], []>} : vector<128x256xbf16>, vector<256x128xbf16>, vector<128x128xf32> -> vector<128x128xf32>
    %c0_9 = arith.constant 0 : index
    %c0_10 = arith.constant 0 : index
    %12 = vector.load %arg6[%c0_9, %c0_10] : memref<1x128xf32, #tpu.memory_space<vmem>>, vector<1x128xf32>
    %13 = vector.broadcast %12 : vector<1x128xf32> to vector<128x128xf32>
    %14 = arith.addf %11, %13 : vector<128x128xf32>
    %cst_11 = arith.constant 0.000000e+00 : f32
    %15 = vector.broadcast %cst_11 : f32 to vector<128x128xf32>
    %16 = arith.maximumf %14, %15 : vector<128x128xf32>
    %17 = arith.truncf %16 : vector<128x128xf32> to vector<128x128xbf16>
    %c0_12 = arith.constant 0 : index
    %c0_13 = arith.constant 0 : index
    %18 = vector.load %arg7[%c0_12, %c0_13] : memref<128x128xbf16, #tpu.memory_space<vmem>>, vector<128x128xbf16>
    %cst_14 = arith.constant dense<0.000000e+00> : vector<128x128xf32>
    %19 = tpu.matmul %17, %18, %cst_14 {dimension_numbers = #tpu.dot_dimension_numbers<[1], [0], [0], [1], [0, 0, 1, 1], [], []>} : vector<128x128xbf16>, vector<128x128xbf16>, vector<128x128xf32> -> vector<128x128xf32>
    %c0_15 = arith.constant 0 : index
    %c0_16 = arith.constant 0 : index
    %20 = vector.load %arg8[%c0_15, %c0_16] : memref<1x128xf32, #tpu.memory_space<vmem>>, vector<1x128xf32>
    %21 = vector.broadcast %20 : vector<1x128xf32> to vector<128x128xf32>
    %22 = arith.addf %19, %21 : vector<128x128xf32>
    %cst_17 = arith.constant 0.000000e+00 : f32
    %23 = vector.broadcast %cst_17 : f32 to vector<128x128xf32>
    %24 = arith.maximumf %22, %23 : vector<128x128xf32>
    %25 = arith.truncf %24 : vector<128x128xf32> to vector<128x128xbf16>
    %c0_18 = arith.constant 0 : index
    %c0_19 = arith.constant 0 : index
    %26 = vector.load %arg9[%c0_18, %c0_19] : memref<128x512xbf16, #tpu.memory_space<vmem>>, vector<128x512xbf16>
    %cst_20 = arith.constant dense<0.000000e+00> : vector<128x512xf32>
    %27 = tpu.matmul %25, %26, %cst_20 {dimension_numbers = #tpu.dot_dimension_numbers<[1], [0], [0], [1], [0, 0, 1, 1], [], []>} : vector<128x128xbf16>, vector<128x512xbf16>, vector<128x512xf32> -> vector<128x512xf32>
    %c0_21 = arith.constant 0 : index
    %c0_22 = arith.constant 0 : index
    %28 = vector.load %arg10[%c0_21, %c0_22] : memref<1x512xf32, #tpu.memory_space<vmem>>, vector<1x512xf32>
    %29 = vector.broadcast %28 : vector<1x512xf32> to vector<128x512xf32>
    %30 = arith.addf %27, %29 : vector<128x512xf32>
    %cst_23 = arith.constant 0.000000e+00 : f32
    %31 = vector.broadcast %cst_23 : f32 to vector<128x512xf32>
    %32 = arith.maximumf %30, %31 : vector<128x512xf32>
    %33 = arith.truncf %32 : vector<128x512xf32> to vector<128x512xbf16>
    %c0_24 = arith.constant 0 : index
    %c0_25 = arith.constant 0 : index
    %34 = vector.load %arg11[%c0_24, %c0_25] : memref<512x256xbf16, #tpu.memory_space<vmem>>, vector<512x256xbf16>
    %cst_26 = arith.constant dense<0.000000e+00> : vector<128x256xf32>
    %35 = tpu.matmul %33, %34, %cst_26 {dimension_numbers = #tpu.dot_dimension_numbers<[1], [0], [0], [1], [0, 0, 1, 1], [], []>} : vector<128x512xbf16>, vector<512x256xbf16>, vector<128x256xf32> -> vector<128x256xf32>
    %c0_27 = arith.constant 0 : index
    %c0_28 = arith.constant 0 : index
    %36 = vector.load %arg12[%c0_27, %c0_28] : memref<1x256xf32, #tpu.memory_space<vmem>>, vector<1x256xf32>
    %37 = vector.broadcast %36 : vector<1x256xf32> to vector<128x256xf32>
    %38 = arith.addf %35, %37 : vector<128x256xf32>
    %cst_29 = arith.constant 0.000000e+00 : f32
    %39 = vector.broadcast %cst_29 : f32 to vector<128x256xf32>
    %40 = arith.maximumf %38, %39 : vector<128x256xf32>
    %c0_30 = arith.constant 0 : index
    %c0_31 = arith.constant 0 : index
    %41 = vector.load %arg13[%c0_30, %c0_31] : memref<1x256xf32, #tpu.memory_space<vmem>>, vector<1x256xf32>
    %42 = vector.broadcast %41 : vector<1x256xf32> to vector<128x256xf32>
    %43 = arith.mulf %40, %42 : vector<128x256xf32>
    %cst_32 = arith.constant dense<0.000000e+00> : vector<128xf32>
    %44 = vector.multi_reduction <add>, %43, %cst_32 [1] : vector<128x256xf32> to vector<128xf32>
    %45 = vector.shape_cast %44 : vector<128xf32> to vector<128x1xf32>
    %c0_33 = arith.constant 0 : index
    %c0_34 = arith.constant 0 : index
    %46 = vector.load %arg14[%c0_33, %c0_34] : memref<1x1xf32, #tpu.memory_space<vmem>>, vector<1x1xf32>
    %47 = vector.broadcast %46 : vector<1x1xf32> to vector<128x1xf32>
    %48 = arith.addf %45, %47 : vector<128x1xf32>
    %c0_35 = arith.constant 0 : index
    %c0_36 = arith.constant 0 : index
    %49 = vector.load %arg2[%c0_35, %c0_36] : memref<128x256xf32, #tpu.memory_space<vmem>>, vector<128x256xf32>
    %50 = arith.truncf %49 : vector<128x256xf32> to vector<128x256xbf16>
    %c0_37 = arith.constant 0 : index
    %c0_38 = arith.constant 0 : index
    %51 = vector.load %arg15[%c0_37, %c0_38] : memref<256x512xbf16, #tpu.memory_space<vmem>>, vector<256x512xbf16>
    %cst_39 = arith.constant dense<0.000000e+00> : vector<128x512xf32>
    %52 = tpu.matmul %50, %51, %cst_39 {dimension_numbers = #tpu.dot_dimension_numbers<[1], [0], [0], [1], [0, 0, 1, 1], [], []>} : vector<128x256xbf16>, vector<256x512xbf16>, vector<128x512xf32> -> vector<128x512xf32>
    %c0_40 = arith.constant 0 : index
    %c0_41 = arith.constant 0 : index
    %53 = vector.load %arg16[%c0_40, %c0_41] : memref<1x512xf32, #tpu.memory_space<vmem>>, vector<1x512xf32>
    %54 = vector.broadcast %53 : vector<1x512xf32> to vector<128x512xf32>
    %55 = arith.addf %52, %54 : vector<128x512xf32>
    %cst_42 = arith.constant 0.000000e+00 : f32
    %56 = vector.broadcast %cst_42 : f32 to vector<128x512xf32>
    %57 = arith.maximumf %55, %56 : vector<128x512xf32>
    %58 = arith.truncf %57 : vector<128x512xf32> to vector<128x512xbf16>
    %c0_43 = arith.constant 0 : index
    %c0_44 = arith.constant 0 : index
    %59 = vector.load %arg17[%c0_43, %c0_44] : memref<512x256xbf16, #tpu.memory_space<vmem>>, vector<512x256xbf16>
    %cst_45 = arith.constant dense<0.000000e+00> : vector<128x256xf32>
    %60 = tpu.matmul %58, %59, %cst_45 {dimension_numbers = #tpu.dot_dimension_numbers<[1], [0], [0], [1], [0, 0, 1, 1], [], []>} : vector<128x512xbf16>, vector<512x256xbf16>, vector<128x256xf32> -> vector<128x256xf32>
    %c0_46 = arith.constant 0 : index
    %c0_47 = arith.constant 0 : index
    %61 = vector.load %arg18[%c0_46, %c0_47] : memref<1x256xf32, #tpu.memory_space<vmem>>, vector<1x256xf32>
    %62 = vector.broadcast %61 : vector<1x256xf32> to vector<128x256xf32>
    %63 = arith.addf %60, %62 : vector<128x256xf32>
    %cst_48 = arith.constant 0.000000e+00 : f32
    %64 = vector.broadcast %cst_48 : f32 to vector<128x256xf32>
    %65 = arith.maximumf %63, %64 : vector<128x256xf32>
    %66 = arith.truncf %65 : vector<128x256xf32> to vector<128x256xbf16>
    %c0_49 = arith.constant 0 : index
    %c0_50 = arith.constant 0 : index
    %67 = vector.load %arg19[%c0_49, %c0_50] : memref<256x128xbf16, #tpu.memory_space<vmem>>, vector<256x128xbf16>
    %cst_51 = arith.constant dense<0.000000e+00> : vector<128x128xf32>
    %68 = tpu.matmul %66, %67, %cst_51 {dimension_numbers = #tpu.dot_dimension_numbers<[1], [0], [0], [1], [0, 0, 1, 1], [], []>} : vector<128x256xbf16>, vector<256x128xbf16>, vector<128x128xf32> -> vector<128x128xf32>
    %c0_52 = arith.constant 0 : index
    %c0_53 = arith.constant 0 : index
    %69 = vector.load %arg20[%c0_52, %c0_53] : memref<1x128xf32, #tpu.memory_space<vmem>>, vector<1x128xf32>
    %70 = vector.broadcast %69 : vector<1x128xf32> to vector<128x128xf32>
    %71 = arith.addf %68, %70 : vector<128x128xf32>
    %cst_54 = arith.constant dense<0xFF800000> : vector<128xf32>
    %72 = vector.multi_reduction <maximumf>, %71, %cst_54 [1] : vector<128x128xf32> to vector<128xf32>
    %73 = vector.shape_cast %72 : vector<128xf32> to vector<128x1xf32>
    %74 = vector.broadcast %73 : vector<128x1xf32> to vector<128x128xf32>
    %75 = arith.subf %71, %74 : vector<128x128xf32>
    %76 = math.exp %75 : vector<128x128xf32>
    %cst_55 = arith.constant dense<0.000000e+00> : vector<128xf32>
    %77 = vector.multi_reduction <add>, %76, %cst_55 [1] : vector<128x128xf32> to vector<128xf32>
    %78 = vector.shape_cast %77 : vector<128xf32> to vector<128x1xf32>
    %79 = vector.broadcast %78 : vector<128x1xf32> to vector<128x128xf32>
    %80 = arith.divf %76, %79 : vector<128x128xf32>
    %81 = tpu.iota {dimensions = array<i32: 1>} : vector<128x128xi32>
    %82 = vector.shape_cast %48 : vector<128x1xf32> to vector<128x1xf32>
    %83 = vector.broadcast %82 : vector<128x1xf32> to vector<128x128xf32>
    %c0_i32 = arith.constant 0 : i32
    %84 = vector.broadcast %c0_i32 : i32 to vector<128x128xi32>
    %85 = arith.cmpi eq, %81, %84 : vector<128x128xi32>
    %86 = arith.select %85, %83, %80 : vector<128x128xi1>, vector<128x128xf32>
    %c0_56 = arith.constant 0 : index
    %c0_57 = arith.constant 0 : index
    %87 = vector.load %arg21[%c0_56, %c0_57] : memref<128x128xf32, #tpu.memory_space<vmem>>, vector<128x128xf32>
    tpu.vector_store %arg21[%c0_56, %c0_57], %86 {strides = array<i32>} : memref<128x128xf32, #tpu.memory_space<vmem>>, vector<128x128xf32>,
    return
  }
  func.func @transform_0(%arg0: i32) -> (i32, i32) {
    %c0_i32 = arith.constant 0 : i32
    %c0_i32_0 = arith.constant 0 : i32
    return %arg0, %c0_i32 : i32, i32
  }
  func.func @transform_1(%arg0: i32) -> (i32, i32) {
    %c0_i32 = arith.constant 0 : i32
    %c0_i32_0 = arith.constant 0 : i32
    return %arg0, %c0_i32 : i32, i32
  }
  func.func @transform_2(%arg0: i32) -> (i32, i32) {
    %c0_i32 = arith.constant 0 : i32
    %c0_i32_0 = arith.constant 0 : i32
    %c0_i32_1 = arith.constant 0 : i32
    return %c0_i32, %c0_i32_0 : i32, i32
  }
  func.func @transform_3(%arg0: i32) -> (i32, i32) {
    %c0_i32 = arith.constant 0 : i32
    %c0_i32_0 = arith.constant 0 : i32
    %c0_i32_1 = arith.constant 0 : i32
    return %c0_i32, %c0_i32_0 : i32, i32
  }
  func.func @transform_4(%arg0: i32) -> (i32, i32) {
    %c0_i32 = arith.constant 0 : i32
    %c0_i32_0 = arith.constant 0 : i32
    %c0_i32_1 = arith.constant 0 : i32
    return %c0_i32, %c0_i32_0 : i32, i32
  }
  func.func @transform_5(%arg0: i32) -> (i32, i32) {
    %c0_i32 = arith.constant 0 : i32
    %c0_i32_0 = arith.constant 0 : i32
    %c0_i32_1 = arith.constant 0 : i32
    return %c0_i32, %c0_i32_0 : i32, i32
  }
  func.func @transform_6(%arg0: i32) -> (i32, i32) {
    %c0_i32 = arith.constant 0 : i32
    %c0_i32_0 = arith.constant 0 : i32
    %c0_i32_1 = arith.constant 0 : i32
    return %c0_i32, %c0_i32_0 : i32, i32
  }
  func.func @transform_7(%arg0: i32) -> (i32, i32) {
    %c0_i32 = arith.constant 0 : i32
    %c0_i32_0 = arith.constant 0 : i32
    %c0_i32_1 = arith.constant 0 : i32
    return %c0_i32, %c0_i32_0 : i32, i32
  }
  func.func @transform_8(%arg0: i32) -> (i32, i32) {
    %c0_i32 = arith.constant 0 : i32
    %c0_i32_0 = arith.constant 0 : i32
    %c0_i32_1 = arith.constant 0 : i32
    return %c0_i32, %c0_i32_0 : i32, i32
  }
  func.func @transform_9(%arg0: i32) -> (i32, i32) {
    %c0_i32 = arith.constant 0 : i32
    %c0_i32_0 = arith.constant 0 : i32
    %c0_i32_1 = arith.constant 0 : i32
    return %c0_i32, %c0_i32_0 : i32, i32
  }
  func.func @transform_10(%arg0: i32) -> (i32, i32) {
    %c0_i32 = arith.constant 0 : i32
    %c0_i32_0 = arith.constant 0 : i32
    %c0_i32_1 = arith.constant 0 : i32
    return %c0_i32, %c0_i32_0 : i32, i32
  }
  func.func @transform_11(%arg0: i32) -> (i32, i32) {
    %c0_i32 = arith.constant 0 : i32
    %c0_i32_0 = arith.constant 0 : i32
    %c0_i32_1 = arith.constant 0 : i32
    return %c0_i32, %c0_i32_0 : i32, i32
  }
  func.func @transform_12(%arg0: i32) -> (i32, i32) {
    %c0_i32 = arith.constant 0 : i32
    %c0_i32_0 = arith.constant 0 : i32
    %c0_i32_1 = arith.constant 0 : i32
    return %c0_i32, %c0_i32_0 : i32, i32
  }
  func.func @transform_13(%arg0: i32) -> (i32, i32) {
    %c0_i32 = arith.constant 0 : i32
    %c0_i32_0 = arith.constant 0 : i32
    %c0_i32_1 = arith.constant 0 : i32
    return %c0_i32, %c0_i32_0 : i32, i32
  }
  func.func @transform_14(%arg0: i32) -> (i32, i32) {
    %c0_i32 = arith.constant 0 : i32
    %c0_i32_0 = arith.constant 0 : i32
    %c0_i32_1 = arith.constant 0 : i32
    return %c0_i32, %c0_i32_0 : i32, i32
  }
  func.func @transform_15(%arg0: i32) -> (i32, i32) {
    %c0_i32 = arith.constant 0 : i32
    %c0_i32_0 = arith.constant 0 : i32
    %c0_i32_1 = arith.constant 0 : i32
    return %c0_i32, %c0_i32_0 : i32, i32
  }
  func.func @transform_16(%arg0: i32) -> (i32, i32) {
    %c0_i32 = arith.constant 0 : i32
    %c0_i32_0 = arith.constant 0 : i32
    %c0_i32_1 = arith.constant 0 : i32
    return %c0_i32, %c0_i32_0 : i32, i32
  }
  func.func @transform_17(%arg0: i32) -> (i32, i32) {
    %c0_i32 = arith.constant 0 : i32
    %c0_i32_0 = arith.constant 0 : i32
    %c0_i32_1 = arith.constant 0 : i32
    return %c0_i32, %c0_i32_0 : i32, i32
  }
  func.func @transform_18(%arg0: i32) -> (i32, i32) {
    %c0_i32 = arith.constant 0 : i32
    %c0_i32_0 = arith.constant 0 : i32
    %c0_i32_1 = arith.constant 0 : i32
    return %c0_i32, %c0_i32_0 : i32, i32
  }
  func.func @transform_19(%arg0: i32) -> (i32, i32) {
    %c0_i32 = arith.constant 0 : i32
    %c0_i32_0 = arith.constant 0 : i32
    %c0_i32_1 = arith.constant 0 : i32
    return %c0_i32, %c0_i32_0 : i32, i32
  }
  func.func @transform_20(%arg0: i32) -> (i32, i32) {
    %c0_i32 = arith.constant 0 : i32
    %c0_i32_0 = arith.constant 0 : i32
    return %arg0, %c0_i32 : i32, i32
  }
}

</mosaic_0001>

<bundles_post_ra>
// kernel: actor_critic_forward.1
= control target key start
LH: loop header
LB: loop body
LE: loop exit
PB: predicated region body
PF: predicated region fallthrough
CT: control target
= control target key end

     0   :  { %s7338_s23 = smov 0   ;;  %s9509_s0 = inlined_call_operand.vmem [shape: f32[256,896], index: 0, kind: input, shape index: {}]   ;;  %s9510_s1 = inlined_call_operand.vmem [shape: f32[256,256], index: 1, kind: input, shape index: {}]   ;;  %s9511_s2 = inlined_call_operand.vmem [shape: bf16[896,256], index: 2, kind: input, shape index: {}]   ;;  %s9512_s3 = inlined_call_operand.vmem [shape: f32[1,256], index: 3, kind: input, shape index: {}]   ;;  %s9513_s4 = inlined_call_operand.vmem [shape: bf16[256,128], index: 4, kind: input, shape index: {}]   ;;  %s9514_s5 = inlined_call_operand.vmem [shape: f32[1,128], index: 5, kind: input, shape index: {}]   ;;  %s9515_s6 = inlined_call_operand.vmem [shape: bf16[128,128], index: 6, kind: input, shape index: {}]   ;;  %s9516_s7 = inlined_call_operand.vmem [shape: f32[1,128], index: 7, kind: input, shape index: {}]   ;;  %s9517_s8 = inlined_call_operand.vmem [shape: bf16[128,512], index: 8, kind: input, shape index: {}]   ;;  %s9518_s9 = inlined_call_operand.vmem [shape: f32[1,512], index: 9, kind: input, shape index: {}]   ;;  %s9519_s10 = inlined_call_operand.vmem [shape: bf16[512,256], index: 10, kind: input, shape index: {}]   ;;  %s9520_s11 = inlined_call_operand.vmem [shape: f32[1,256], index: 11, kind: input, shape index: {}]   ;;  %s9521_s12 = inlined_call_operand.vmem [shape: f32[1,256], index: 12, kind: input, shape index: {}]   ;;  %s9522_s13 = inlined_call_operand.<no memory space> [shape: f32[1,1], index: 13, kind: input, shape index: {}]   ;;  %s9523_s14 = inlined_call_operand.vmem [shape: bf16[256,512], index: 14, kind: input, shape index: {}]   ;;  %s9524_s15 = inlined_call_operand.vmem [shape: f32[1,512], index: 15, kind: input, shape index: {}]   ;;  %s9525_s16 = inlined_call_operand.vmem [shape: bf16[512,256], index: 16, kind: input, shape index: {}]   ;;  %s9526_s17 = inlined_call_operand.vmem [shape: f32[1,256], index: 17, kind: input, shape index: {}]   ;;  %s9527_s18 = inlined_call_operand.vmem [shape: bf16[256,128], index: 18, kind: input, shape index: {}]   ;;  %s9528_s19 = inlined_call_operand.vmem [shape: f32[1,128], index: 19, kind: input, shape index: {}]   ;;  %s9529_s20 = inlined_call_operand.vmem [shape: f32[256,128], index: 20, kind: output, shape index: {}]  }
   0x1   :  { %9532 = sst [smem:[#allocation3_spill]] %s9509_s0  ;;  %v25_v0 = vstv %s9522_s13 }
   0x2   :  { %9533 = sst [smem:[#allocation4_spill]] %s9510_s1  ;;  %26 = vst [vmem:[#allocation2] sm:$0x1] %v25_v0 }
   0x3   :  { %9534 = sst [smem:[#allocation5_spill]] %s9511_s2 }
   0x4   :  { %9535 = sst [smem:[#allocation6_spill]] %s9512_s3 }
   0x5   :  { %9536 = sst [smem:[#allocation7_spill]] %s9513_s4 }
   0x6 LB: > { %s5774_s24 = sadd.s32 4294967295, %s7227_s23   ;;  %p5778_p0 = scmp.ge.s32.totalorder %s7227_s23, 1  ;;  %s7227_s23 = sphi %s7338_s23, %s32_s23  }
   0x7   : > { %p578_p1 = scmp.lt.s32.totalorder %s7227_s23, 3 }
   0x9   : > { %p579_p2 = pnand %p5778_p0, %p578_p1 }
   0xa   : > { %s9537_s3 = sld [smem:[#allocation5_spill]] (!%p579_p2)  ;;  %s5779_s30 = sshll.u32 (!%p579_p2), %s5774_s24, 4 }
   0xb   : > { %582 = sbr.rel (%p579_p2) target bundleno = 2172 (0x87c), region = 100  ;;  %p644_p3 = scmp.lt.s32.totalorder (!%p579_p2), %s5779_s30, 31 }
   0xc   : > { %s9538_s2 = sld [smem:[#allocation3_spill]] (!%p579_p2)  ;;  %s9539_s26 = sld [smem:[#allocation7_spill]] (!%p579_p2) }
   0xd   : > { %s9540_s4 = sld [smem:[#allocation6_spill]] (!%p579_p2) }
  0x10   : > { %v6613_v1 = vld [vmem:[%s9537_s3 + $0x4] ss:$8 sps:$4 sm:$0xff] (!%p579_p2)   ;;  %v6615_v2 = vld [vmem:[%s9537_s3] ss:$8 sps:$4 sm:$0xff] (!%p579_p2)   ;;  %v6616_v3 = vld [vmem:[%s9537_s3 + $0x14] ss:$8 sps:$4 sm:$0xff] (!%p579_p2)  }
  0x11   : > { %1516 = vmatprep.subr.bf16.mxu0 (!%p579_p2), %v6613_v1  ;;  %v6618_v4 = vld [vmem:[%s9537_s3 + $0x10] ss:$8 sps:$4 sm:$0xff] (!%p579_p2)   ;;  %v6619_v5 = vld [vmem:[%s9537_s3 + $0x24] ss:$8 sps:$4 sm:$0xff] (!%p579_p2)   ;;  %v6621_v6 = vld [vmem:[%s9537_s3 + $0x20] ss:$8 sps:$4 sm:$0xff] (!%p579_p2)  }
  0x12   : > { %1517 = vmatpush1.bf16.msra.mxu0 %v6615_v2  ;;  %v6622_v7 = vld [vmem:[%s9537_s3 + $0x34] ss:$8 sps:$4 sm:$0xff]   ;;  %s9543_s30 = smov (!%p644_p3, %s5779_s30), 31  ;;  %v6624_v8 = vld [vmem:[%s9537_s3 + $0x30] ss:$8 sps:$4 sm:$0xff]  }
  0x13   : > { %1518 = vmatprep.subr.bf16.mxu0 %v6616_v3  ;;  %v6625_v9 = vld [vmem:[%s9537_s3 + $0x44] ss:$8 sps:$4 sm:$0xff]   ;;  %s6601_s28 = smul.u32 56, %s9543_s30  ;;  %v6627_v10 = vld [vmem:[%s9537_s3 + $0x40] ss:$8 sps:$4 sm:$0xff]   ;;  %s6168_s22 = sshll.u32 %s9543_s30, 4 }
  0x14   : > { %v6628_v11 = vld [vmem:[%s9537_s3 + $0x54] ss:$8 sps:$4 sm:$0xff]   ;;  %v6630_v12 = vld [vmem:[%s9537_s3 + $0x50] ss:$8 sps:$4 sm:$0xff]   ;;  %v6631_v13 = vld [vmem:[%s9537_s3 + $0x64] ss:$8 sps:$4 sm:$0xff]  }
  0x15   : > { %s7385_s25 = scalar_lea.vmem %s9538_s2, %s6601_s28  ;;  %v6633_v17 = vld [vmem:[%s9537_s3 + $0x60] ss:$8 sps:$4 sm:$0xff]   ;;  %v6634_v18 = vld [vmem:[%s9537_s3 + $0x74] ss:$8 sps:$4 sm:$0xff]   ;;  %v6636_v19 = vld [vmem:[%s9537_s3 + $0x70] ss:$8 sps:$4 sm:$0xff]  }
  0x16   : > { %1519 = vmatpush1.bf16.msra.mxu0 %v6618_v4  ;;  %v665_v14 = vld [vmem:[%s7385_s25 + $0x8] sm:$0xff]  ;;  %v672_v15 = vld [vmem:[%s7385_s25 + $0x40] sm:$0xff]  ;;  %v6640_v22 = vld [vmem:[%s9537_s3 + $0x94] ss:$8 sps:$4 sm:$0xff]  }
  0x17   : > { %1520 = vmatprep.subr.bf16.mxu0 %v6619_v5  ;;  %v777_v16 = vpack.c.bf16 %v672_v15, %v665_v14  ;;  %v6637_v20 = vld [vmem:[%s9537_s3 + $0x84] ss:$8 sps:$4 sm:$0xff]   ;;  %v6639_v21 = vld [vmem:[%s9537_s3 + $0x80] ss:$8 sps:$4 sm:$0xff]   ;;  %v6642_v23 = vld [vmem:[%s9537_s3 + $0x90] ss:$8 sps:$4 sm:$0xff]  }
  0x18   : > { %v6643_v24 = vld [vmem:[%s9537_s3 + $0xa4] ss:$8 sps:$4 sm:$0xff]   ;;  %v6645_v25 = vld [vmem:[%s9537_s3 + $0xa0] ss:$8 sps:$4 sm:$0xff]   ;;  %v6646_v26 = vld [vmem:[%s9537_s3 + $0xb4] ss:$8 sps:$4 sm:$0xff]  }
  0x19   : > { %1548 = vmatprep.mubr.bf16.mxu0 %v777_v16  ;;  %v6648_v27 = vld [vmem:[%s9537_s3 + $0xb0] ss:$8 sps:$4 sm:$0xff]   ;;  %v6649_v28 = vld [vmem:[%s9537_s3 + $0xc4] ss:$8 sps:$4 sm:$0xff]   ;;  %v6651_v29 = vld [vmem:[%s9537_s3 + $0xc0] ss:$8 sps:$4 sm:$0xff]  }
  0x1a   : > { %1521 = vmatpush1.bf16.msra.mxu0 %v6621_v6  ;;  %v6652_v30 = vld [vmem:[%s9537_s3 + $0xd4] ss:$8 sps:$4 sm:$0xff]   ;;  %v6654_v31 = vld [vmem:[%s9537_s3 + $0xd0] ss:$8 sps:$4 sm:$0xff]   ;;  %v6655_v32 = vld [vmem:[%s9537_s3 + $0xe4] ss:$8 sps:$4 sm:$0xff]  }
  0x1b   : > { %1522 = vmatprep.subr.bf16.mxu0 %v6622_v7  ;;  %v6657_v33 = vld [vmem:[%s9537_s3 + $0xe0] ss:$8 sps:$4 sm:$0xff]   ;;  %v6658_v34 = vld [vmem:[%s9537_s3 + $0xf4] ss:$8 sps:$4 sm:$0xff]   ;;  %v6660_v35 = vld [vmem:[%s9537_s3 + $0xf0] ss:$8 sps:$4 sm:$0xff]  }
  0x1c   : > { %v664_v36 = vld [vmem:[%s7385_s25] sm:$0xff]  ;;  %v671_v37 = vld [vmem:[%s7385_s25 + $0x38] sm:$0xff]  ;;  %v686_v40 = vld [vmem:[%s7385_s25 + $0xb0] sm:$0xff] }
  0x1d   : > { %v6663_v38 = vld [vmem:[%s9537_s3 + $0x104] ss:$8 sps:$4 sm:$0xff]   ;;  %v679_v39 = vld [vmem:[%s7385_s25 + $0x78] sm:$0xff]  ;;  %v776_v41 = vpack.c.bf16 %v671_v37, %v664_v36  ;;  %v6661_v42 = vld [vmem:[%s9537_s3 + $0x100] ss:$8 sps:$4 sm:$0xff]  }
  0x1e   : > { %1523 = vmatpush1.bf16.msra.mxu0 %v6624_v8  ;;  %v784_v43 = vpack.c.bf16 %v686_v40, %v679_v39  ;;  %v6666_v44 = vld [vmem:[%s9537_s3 + $0x114] ss:$8 sps:$4 sm:$0xff]   ;;  %v6664_v45 = vld [vmem:[%s9537_s3 + $0x110] ss:$8 sps:$4 sm:$0xff]   ;;  %v685_v47 = vld [vmem:[%s7385_s25 + $0xa8] sm:$0xff] }
  0x1f   : > { %1524 = vmatprep.subr.bf16.mxu0 %v6625_v9  ;;  %v678_v46 = vld [vmem:[%s7385_s25 + $0x70] sm:$0xff]  ;;  %v6669_v48 = vld [vmem:[%s9537_s3 + $0x124] ss:$8 sps:$4 sm:$0xff]   ;;  %v6667_v52 = vld [vmem:[%s9537_s3 + $0x120] ss:$8 sps:$4 sm:$0xff]  }
  0x20   : > { %v693_v49 = vld [vmem:[%s7385_s25 + $0xe8] sm:$0xff]  ;;  %v700_v50 = vld [vmem:[%s7385_s25 + $0x120] sm:$0xff]  ;;  %v783_v51 = vpack.c.bf16 %v685_v47, %v678_v46  ;;  %v6672_v54 = vld [vmem:[%s9537_s3 + $0x134] ss:$8 sps:$4 sm:$0xff]  }
  0x21   : > { %v791_v53 = vpack.c.bf16 %v700_v50, %v693_v49  ;;  %v6670_v55 = vld [vmem:[%s9537_s3 + $0x130] ss:$8 sps:$4 sm:$0xff]   ;;  %v692_v56 = vld [vmem:[%s7385_s25 + $0xe0] sm:$0xff]  ;;  %v6678_v0 = vld [vmem:[%s9537_s3 + $0x154] ss:$8 sps:$4 sm:$0xff]  }
  0x22   : > { %1525 = vmatpush1.bf16.msra.mxu0 %v6627_v10  ;;  %v699_v57 = vld [vmem:[%s7385_s25 + $0x118] sm:$0xff]  ;;  %v6675_v58 = vld [vmem:[%s9537_s3 + $0x144] ss:$8 sps:$4 sm:$0xff]   ;;  %v714_v60 = vld [vmem:[%s7385_s25 + $0x190] sm:$0xff] }
  0x23   : > { %1526 = vmatprep.subr.bf16.mxu0 %v6628_v11  ;;  %v707_v59 = vld [vmem:[%s7385_s25 + $0x158] sm:$0xff]  ;;  %v790_v61 = vpack.c.bf16 %v699_v57, %v692_v56  ;;  %v6673_v62 = vld [vmem:[%s9537_s3 + $0x140] ss:$8 sps:$4 sm:$0xff]   ;;  %v706_v2 = vld [vmem:[%s7385_s25 + $0x150] sm:$0xff]  ;;  %v7229_v57 = vmov 0  }
  0x24   : > { %v798_v63 = vpack.c.bf16 %v714_v60, %v707_v59  ;;  %v6676_v1 = vld [vmem:[%s9537_s3 + $0x150] ss:$8 sps:$4 sm:$0xff]   ;;  %v713_v3 = vld [vmem:[%s7385_s25 + $0x188] sm:$0xff]  ;;  %v728_v6 = vld [vmem:[%s7385_s25 + $0x200] sm:$0xff]  ;;  %6611 = vset.pattern.permute.xlu0 %v7229_v57  ;;  %6612 = vset.pattern.permute.xlu1 %v7229_v57 }
  0x25   : > { %v6681_v4 = vld [vmem:[%s9537_s3 + $0x164] ss:$8 sps:$4 sm:$0xff]   ;;  %v797_v7 = vpack.c.bf16 %v713_v3, %v706_v2  ;;  %v6679_v8 = vld [vmem:[%s9537_s3 + $0x160] ss:$8 sps:$4 sm:$0xff]   ;;  %v6684_v10 = vld [vmem:[%s9537_s3 + $0x174] ss:$8 sps:$4 sm:$0xff]  }
  0x26   : > { %1527 = vmatpush1.bf16.msra.mxu0 %v6630_v12  ;;  %v721_v5 = vld [vmem:[%s7385_s25 + $0x1c8] sm:$0xff]  ;;  %v6682_v11 = vld [vmem:[%s9537_s3 + $0x170] ss:$8 sps:$4 sm:$0xff]   ;;  %v720_v12 = vld [vmem:[%s7385_s25 + $0x1c0] sm:$0xff] }
  0x27   : > { %1528 = vmatprep.subr.bf16.mxu0 %v6631_v13  ;;  %v805_v9 = vpack.c.bf16 %v728_v6, %v721_v5  ;;  %v727_v13 = vld [vmem:[%s7385_s25 + $0x1f8] sm:$0xff]  ;;  %v6687_v14 = vld [vmem:[%s9537_s3 + $0x184] ss:$8 sps:$4 sm:$0xff]   ;;  %v742_v16 = vld [vmem:[%s7385_s25 + $0x270] sm:$0xff] }
  0x28   : > { %v735_v15 = vld [vmem:[%s7385_s25 + $0x238] sm:$0xff]  ;;  %v770_v36 = vld [vmem:[%s7385_s25 + $0x350] sm:$0xff]  ;;  %v6697_v37 = vld [vmem:[%s9537_s3 + $0x1c0] ss:$8 sps:$4 sm:$0xff]  }
  0x29   : > { %v6702_v39 = vld [vmem:[%s9537_s3 + $0x1d4] ss:$8 sps:$4 sm:$0xff]   ;;  %v6703_v47 = vld [vmem:[%s9537_s3 + $0x1e0] ss:$8 sps:$4 sm:$0xff]  }
  0x2a   : > { %1529 = vmatpush1.bf16.msra.mxu0 %v6633_v17  ;;  %v804_v17 = vpack.c.bf16 %v727_v13, %v720_v12  ;;  %v674_v46 = vld [vmem:[%s7385_s25 + $0x50] sm:$0xff]  ;;  %v688_v56 = vld [vmem:[%s7385_s25 + $0xc0] sm:$0xff]  ;;  %v695_v2 = vld [vmem:[%s7385_s25 + $0xf8] sm:$0xff] }
  0x2b   : > { %1530 = vmatprep.subr.bf16.mxu0 %v6634_v18  ;;  %v6685_v18 = vld [vmem:[%s9537_s3 + $0x180] ss:$8 sps:$4 sm:$0xff]   ;;  %v6708_v49 = vld [vmem:[%s9537_s3 + $0x1f4] ss:$8 sps:$4 sm:$0xff]  }
  0x2c   : > { %v6714_v60 = vld [vmem:[%s9537_s3 + $0x214] ss:$8 sps:$4 sm:$0xff]   ;;  %v709_v12 = vld [vmem:[%s7385_s25 + $0x168] sm:$0xff]  ;;  %v716_v13 = vld [vmem:[%s7385_s25 + $0x1a0] sm:$0xff] }
  0x2d   : > { %v702_v3 = vld [vmem:[%s7385_s25 + $0x130] sm:$0xff] }
  0x2e   : > { %1531 = vmatpush1.bf16.msra.mxu0 %v6636_v19  ;;  %v812_v19 = vpack.c.bf16 %v742_v16, %v735_v15  ;;  %v6720_v6 = vld [vmem:[%s9537_s3 + $0x234] ss:$8 sps:$4 sm:$0xff]  }
  0x2f   : > { %1532 = vmatprep.subr.bf16.mxu0 %v6637_v20  ;;  %v6690_v20 = vld [vmem:[%s9537_s3 + $0x194] ss:$8 sps:$4 sm:$0xff]  }
  0x30   : > { %v6726_v16 = vld [vmem:[%s9537_s3 + $0x254] ss:$8 sps:$4 sm:$0xff]  }
  0x32   : > { %1533 = vmatpush1.bf16.msra.mxu0 %v6639_v21  ;;  %v6688_v21 = vld [vmem:[%s9537_s3 + $0x190] ss:$8 sps:$4 sm:$0xff]  }
  0x33   : > { %1534 = vmatprep.subr.bf16.mxu0 %v6640_v22  ;;  %v734_v22 = vld [vmem:[%s7385_s25 + $0x230] sm:$0xff] }
  0x36   : > { %1535 = vmatpush1.bf16.msra.mxu0 %v6642_v23  ;;  %v741_v23 = vld [vmem:[%s7385_s25 + $0x268] sm:$0xff] }
  0x37   : > { %1536 = vmatprep.subr.bf16.mxu0 %v6643_v24  ;;  %v6693_v24 = vld [vmem:[%s9537_s3 + $0x1a4] ss:$8 sps:$4 sm:$0xff]  }
  0x3a   : > { %1537 = vmatpush1.bf16.msra.mxu0 %v6645_v25  ;;  %v749_v25 = vld [vmem:[%s7385_s25 + $0x2a8] sm:$0xff] }
  0x3b   : > { %1538 = vmatprep.subr.bf16.mxu0 %v6646_v26  ;;  %v756_v26 = vld [vmem:[%s7385_s25 + $0x2e0] sm:$0xff] }
  0x3e   : > { %1539 = vmatpush1.bf16.msra.mxu0 %v6648_v27  ;;  %v6691_v27 = vld [vmem:[%s9537_s3 + $0x1a0] ss:$8 sps:$4 sm:$0xff]  }
  0x3f   : > { %1540 = vmatprep.subr.bf16.mxu0 %v6649_v28  ;;  %v811_v28 = vpack.c.bf16 %v741_v23, %v734_v22  ;;  %v723_v22 = vld [vmem:[%s7385_s25 + $0x1d8] sm:$0xff]  ;;  %v730_v23 = vld [vmem:[%s7385_s25 + $0x210] sm:$0xff] }
  0x42   : > { %1541 = vmatpush1.bf16.msra.mxu0 %v6651_v29  ;;  %v6696_v29 = vld [vmem:[%s9537_s3 + $0x1b4] ss:$8 sps:$4 sm:$0xff]  }
  0x43   : > { %1542 = vmatprep.subr.bf16.mxu0 %v6652_v30  ;;  %v819_v30 = vpack.c.bf16 %v756_v26, %v749_v25  ;;  %v6732_v26 = vld [vmem:[%s9537_s3 + $0x274] ss:$8 sps:$4 sm:$0xff]  }
  0x46   : > { %1543 = vmatpush1.bf16.msra.mxu0 %v6654_v31  ;;  %v6694_v31 = vld [vmem:[%s9537_s3 + $0x1b0] ss:$8 sps:$4 sm:$0xff]  }
  0x47   : > { %1544 = vmatprep.subr.bf16.mxu0 %v6655_v32  ;;  %v748_v32 = vld [vmem:[%s7385_s25 + $0x2a0] sm:$0xff] }
  0x4a   : > { %1545 = vmatpush1.bf16.msra.mxu0 %v6657_v33  ;;  %v755_v33 = vld [vmem:[%s7385_s25 + $0x2d8] sm:$0xff] }
  0x4b   : > { %1546 = vmatprep.subr.bf16.mxu0 %v6658_v34  ;;  %v6699_v34 = vld [vmem:[%s9537_s3 + $0x1c4] ss:$8 sps:$4 sm:$0xff]  }
  0x4e   : > { %1547 = vmatpush1.bf16.msra.mxu0 %v6660_v35  ;;  %v763_v35 = vld [vmem:[%s7385_s25 + $0x318] sm:$0xff] }
  0x4f   : > { %1629 = vmatprep.subr.bf16.mxu0 %v6663_v38  ;;  %v818_v38 = vpack.c.bf16 %v755_v33, %v748_v32  ;;  %v826_v40 = vpack.c.bf16 %v770_v36, %v763_v35  ;;  %v737_v32 = vld [vmem:[%s7385_s25 + $0x248] sm:$0xff]  ;;  %v744_v33 = vld [vmem:[%s7385_s25 + $0x280] sm:$0xff]  ;;  %v6738_v36 = vld [vmem:[%s9537_s3 + $0x294] ss:$8 sps:$4 sm:$0xff]  }
  0x51   : > { %1549 = vmatmul.mubr.bf16.vlgmr.msra.gmra.mrb[0].mxu0 %v776_v41  ;;  %v6700_v41 = vld [vmem:[%s9537_s3 + $0x1d0] ss:$8 sps:$4 sm:$0xff]  }
  0x52   : > { %1630 = vmatpush1.bf16.msra.mxu0 %v6661_v42  ;;  %1558 = vmatprep.mubr.bf16.mxu0 %v784_v43  ;;  %v762_v42 = vld [vmem:[%s7385_s25 + $0x310] sm:$0xff]  ;;  %v769_v43 = vld [vmem:[%s7385_s25 + $0x348] sm:$0xff] }
  0x53   : > { %1631 = vmatprep.subr.bf16.mxu0 %v6666_v44  ;;  %v6705_v44 = vld [vmem:[%s9537_s3 + $0x1e4] ss:$8 sps:$4 sm:$0xff]  }
  0x56   : > { %1632 = vmatpush1.bf16.msra.mxu0 %v6664_v45  ;;  %v667_v45 = vld [vmem:[%s7385_s25 + $0x18] sm:$0xff] }
  0x57   : > { %1633 = vmatprep.subr.bf16.mxu0 %v6669_v48  ;;  %v825_v48 = vpack.c.bf16 %v769_v43, %v762_v42  ;;  %v779_v50 = vpack.c.bf16 %v674_v46, %v667_v45  ;;  %v751_v42 = vld [vmem:[%s7385_s25 + $0x2b8] sm:$0xff]  ;;  %v758_v43 = vld [vmem:[%s7385_s25 + $0x2f0] sm:$0xff] }
  0x58   : > { %v6744_v46 = vld [vmem:[%s9537_s3 + $0x2b4] ss:$8 sps:$4 sm:$0xff]  }
  0x59   : > { %1559 = vmatmul.mubr.bf16.gmra.mrb[4].mxu0 %v783_v51  ;;  %v6706_v51 = vld [vmem:[%s9537_s3 + $0x1f0] ss:$8 sps:$4 sm:$0xff]  }
  0x5a   : > { %1634 = vmatpush1.bf16.msra.mxu0 %v6667_v52  ;;  %1568 = vmatprep.mubr.bf16.mxu0 %v791_v53  ;;  %v666_v52 = vld [vmem:[%s7385_s25 + $0x10] sm:$0xff]  ;;  %v673_v53 = vld [vmem:[%s7385_s25 + $0x48] sm:$0xff] }
  0x5b   : > { %1635 = vmatprep.subr.bf16.mxu0 %v6672_v54  ;;  %v6711_v54 = vld [vmem:[%s9537_s3 + $0x204] ss:$8 sps:$4 sm:$0xff]   ;;  %v778_v59 = vpack.c.bf16 %v673_v53, %v666_v52 }
  0x5c   : > { %v765_v52 = vld [vmem:[%s7385_s25 + $0x328] sm:$0xff]  ;;  %v772_v53 = vld [vmem:[%s7385_s25 + $0x360] sm:$0xff] }
  0x5e   : > { %1636 = vmatpush1.bf16.msra.mxu0 %v6670_v55  ;;  %v681_v55 = vld [vmem:[%s7385_s25 + $0x88] sm:$0xff] }
  0x5f   : > { %1637 = vmatprep.subr.bf16.mxu0 %v6675_v58  ;;  %v6709_v58 = vld [vmem:[%s9537_s3 + $0x200] ss:$8 sps:$4 sm:$0xff]  }
  0x61   : > { %1569 = vmatmul.mubr.bf16.gmra.mrb[8].mxu0 %v790_v61  ;;  %v786_v61 = vpack.c.bf16 %v688_v56, %v681_v55  ;;  %v6750_v56 = vld [vmem:[%s9537_s3 + $0x2d4] ss:$8 sps:$4 sm:$0xff]  }
  0x62   : > { %1638 = vmatpush1.bf16.msra.mxu0 %v6673_v62  ;;  %1578 = vmatprep.mubr.bf16.mxu0 %v798_v63  ;;  %v6712_v62 = vld [vmem:[%s9537_s3 + $0x210] ss:$8 sps:$4 sm:$0xff]   ;;  %v680_v63 = vld [vmem:[%s7385_s25 + $0x80] sm:$0xff] }
  0x63   : > { %1639 = vmatprep.subr.bf16.mxu0 %v6678_v0  ;;  %v687_v0 = vld [vmem:[%s7385_s25 + $0xb8] sm:$0xff] }
  0x64   : > { %v785_v5 = vpack.c.bf16 %v687_v0, %v680_v63  ;;  %v669_v63 = vld [vmem:[%s7385_s25 + $0x28] sm:$0xff]  ;;  %v676_v0 = vld [vmem:[%s7385_s25 + $0x60] sm:$0xff] }
  0x66   : > { %1640 = vmatpush1.bf16.msra.mxu0 %v6676_v1  ;;  %v6717_v1 = vld [vmem:[%s9537_s3 + $0x224] ss:$8 sps:$4 sm:$0xff]  }
  0x67   : > { %1641 = vmatprep.subr.bf16.mxu0 %v6681_v4  ;;  %v6715_v4 = vld [vmem:[%s9537_s3 + $0x220] ss:$8 sps:$4 sm:$0xff]  }
  0x69   : > { %1579 = vmatmul.mubr.bf16.gmra.mrb[12].mxu0 %v797_v7  ;;  %v793_v7 = vpack.c.bf16 %v702_v3, %v695_v2  ;;  %v6756_v3 = vld [vmem:[%s9537_s3 + $0x2f4] ss:$8 sps:$4 sm:$0xff]  }
  0x6a   : > { %1642 = vmatpush1.bf16.msra.mxu0 %v6679_v8  ;;  %1588 = vmatprep.mubr.bf16.mxu0 %v805_v9  ;;  %v6718_v8 = vld [vmem:[%s9537_s3 + $0x230] ss:$8 sps:$4 sm:$0xff]  }
  0x6b   : > { %1643 = vmatprep.subr.bf16.mxu0 %v6684_v10  ;;  %v694_v9 = vld [vmem:[%s7385_s25 + $0xf0] sm:$0xff]  ;;  %v701_v10 = vld [vmem:[%s7385_s25 + $0x128] sm:$0xff] }
  0x6c   : > { %v792_v15 = vpack.c.bf16 %v701_v10, %v694_v9  ;;  %v668_v9 = vld [vmem:[%s7385_s25 + $0x20] sm:$0xff]  ;;  %v675_v10 = vld [vmem:[%s7385_s25 + $0x58] sm:$0xff] }
  0x6e   : > { %1644 = vmatpush1.bf16.msra.mxu0 %v6682_v11  ;;  %v6723_v11 = vld [vmem:[%s9537_s3 + $0x244] ss:$8 sps:$4 sm:$0xff]  }
  0x6f   : > { %1645 = vmatprep.subr.bf16.mxu0 %v6687_v14  ;;  %v6721_v14 = vld [vmem:[%s9537_s3 + $0x240] ss:$8 sps:$4 sm:$0xff]  }
  0x71   : > { %1589 = vmatmul.mubr.bf16.gmra.mrb[16].mxu0 %v804_v17  ;;  %v800_v17 = vpack.c.bf16 %v716_v13, %v709_v12  ;;  %v683_v12 = vld [vmem:[%s7385_s25 + $0x98] sm:$0xff]  ;;  %v690_v13 = vld [vmem:[%s7385_s25 + $0xd0] sm:$0xff] }
  0x72   : > { %1646 = vmatpush1.bf16.msra.mxu0 %v6685_v18  ;;  %1598 = vmatprep.mubr.bf16.mxu0 %v812_v19  ;;  %v6724_v18 = vld [vmem:[%s9537_s3 + $0x250] ss:$8 sps:$4 sm:$0xff]   ;;  %v708_v19 = vld [vmem:[%s7385_s25 + $0x160] sm:$0xff] }
  0x73   : > { %1647 = vmatprep.subr.bf16.mxu0 %v6690_v20  ;;  %v715_v20 = vld [vmem:[%s7385_s25 + $0x198] sm:$0xff] }
  0x74   : > { %v799_v25 = vpack.c.bf16 %v715_v20, %v708_v19  ;;  %v788_v19 = vpack.c.bf16 %v690_v13, %v683_v12  ;;  %v6786_v20 = vld [vmem:[%s9539_s26 + $0x10] sm:$0xff]   ;;  %v773_v13 = vld [vmem:[%s7385_s25 + $0x368] sm:$0xff] }
  0x75   : > { %v766_v12 = vld [vmem:[%s7385_s25 + $0x330] sm:$0xff] }
  0x76   : > { %1648 = vmatpush1.bf16.msra.mxu0 %v6688_v21  ;;  %v6729_v21 = vld [vmem:[%s9537_s3 + $0x264] ss:$8 sps:$4 sm:$0xff]  }
  0x77   : > { %1649 = vmatprep.subr.bf16.mxu0 %v6693_v24  ;;  %v6727_v24 = vld [vmem:[%s9537_s3 + $0x260] ss:$8 sps:$4 sm:$0xff]  }
  0x79   : > { %1599 = vmatmul.mubr.bf16.gmra.mrb[20].mxu0 %v811_v28  ;;  %v6730_v28 = vld [vmem:[%s9537_s3 + $0x270] ss:$8 sps:$4 sm:$0xff]  }
  0x7a   : > { %1650 = vmatpush1.bf16.msra.mxu0 %v6691_v27  ;;  %1608 = vmatprep.mubr.bf16.mxu0 %v819_v30  ;;  %v807_v27 = vpack.c.bf16 %v730_v23, %v723_v22  ;;  %v729_v30 = vld [vmem:[%s7385_s25 + $0x208] sm:$0xff]  ;;  %v682_v22 = vld [vmem:[%s7385_s25 + $0x90] sm:$0xff] }
  0x7b   : > { %1651 = vmatprep.subr.bf16.mxu0 %v6696_v29  ;;  %v722_v29 = vld [vmem:[%s7385_s25 + $0x1d0] sm:$0xff]  ;;  %v689_v23 = vld [vmem:[%s7385_s25 + $0xc8] sm:$0xff] }
  0x7c   : > { %v806_v35 = vpack.c.bf16 %v729_v30, %v722_v29  ;;  %v6789_v29 = vld [vmem:[%s9539_s26 + $0x60] sm:$0xff]  }
  0x7d   : > { %v6763_v30 = vld [vmem:[%s9537_s3 + $0x320] ss:$8 sps:$4 sm:$0xff]  }
  0x7e   : > { %1652 = vmatpush1.bf16.msra.mxu0 %v6694_v31  ;;  %v6735_v31 = vld [vmem:[%s9537_s3 + $0x284] ss:$8 sps:$4 sm:$0xff]  }
  0x7f   : > { %1653 = vmatprep.subr.bf16.mxu0 %v6699_v34  ;;  %v6733_v34 = vld [vmem:[%s9537_s3 + $0x280] ss:$8 sps:$4 sm:$0xff]  }
  0x81   : > { %1609 = vmatmul.mubr.bf16.gmra.mrb[24].mxu0 %v818_v38  ;;  %v6736_v38 = vld [vmem:[%s9537_s3 + $0x290] ss:$8 sps:$4 sm:$0xff]  }
  0x82   : > { %1654 = vmatpush1.bf16.msra.mxu0 %v6697_v37  ;;  %1618 = vmatprep.mubr.bf16.mxu0 %v826_v40  ;;  %v814_v37 = vpack.c.bf16 %v744_v33, %v737_v32  ;;  %v743_v40 = vld [vmem:[%s7385_s25 + $0x278] sm:$0xff] }
  0x83   : > { %1655 = vmatprep.subr.bf16.mxu0 %v6702_v39  ;;  %v736_v39 = vld [vmem:[%s7385_s25 + $0x240] sm:$0xff]  ;;  %v6768_v32 = vld [vmem:[%s9537_s3 + $0x334] ss:$8 sps:$4 sm:$0xff]  }
  0x84   : > { %v813_v45 = vpack.c.bf16 %v743_v40, %v736_v39  ;;  %v711_v39 = vld [vmem:[%s7385_s25 + $0x178] sm:$0xff]  ;;  %v718_v40 = vld [vmem:[%s7385_s25 + $0x1b0] sm:$0xff] }
  0x86   : > { %1656 = vmatpush1.bf16.msra.mxu0 %v6700_v41  ;;  %v6741_v41 = vld [vmem:[%s9537_s3 + $0x2a4] ss:$8 sps:$4 sm:$0xff]  }
  0x87   : > { %1657 = vmatprep.subr.bf16.mxu0 %v6705_v44  ;;  %v6739_v44 = vld [vmem:[%s9537_s3 + $0x2a0] ss:$8 sps:$4 sm:$0xff]  }
  0x89   : > { %1619 = vmatmul.mubr.bf16.gmra.mrb[28].mxu0 %v825_v48  ;;  %v6742_v48 = vld [vmem:[%s9537_s3 + $0x2b0] ss:$8 sps:$4 sm:$0xff]  }
  0x8a   : > { %1658 = vmatpush1.bf16.msra.mxu0 %v6703_v47  ;;  %1661 = vmatprep.mubr.bf16.mxu0 %v779_v50  ;;  %v821_v47 = vpack.c.bf16 %v758_v43, %v751_v42  ;;  %v757_v50 = vld [vmem:[%s7385_s25 + $0x2e8] sm:$0xff] }
  0x8b   : > { %1659 = vmatprep.subr.bf16.mxu0 %v6708_v49  ;;  %v750_v49 = vld [vmem:[%s7385_s25 + $0x2b0] sm:$0xff]  ;;  %v6769_v42 = vld [vmem:[%s9537_s3 + $0x340] ss:$8 sps:$4 sm:$0xff]  }
  0x8c   : > { %v820_v55 = vpack.c.bf16 %v757_v50, %v750_v49  ;;  %v725_v49 = vld [vmem:[%s7385_s25 + $0x1e8] sm:$0xff]  ;;  %v732_v50 = vld [vmem:[%s7385_s25 + $0x220] sm:$0xff] }
  0x8e   : > { %1660 = vmatpush1.bf16.msra.mxu0 %v6706_v51  ;;  %v6747_v51 = vld [vmem:[%s9537_s3 + $0x2c4] ss:$8 sps:$4 sm:$0xff]  }
  0x8f   : > { %1742 = vmatprep.subr.bf16.mxu0 %v6711_v54  ;;  %v6745_v54 = vld [vmem:[%s9537_s3 + $0x2c0] ss:$8 sps:$4 sm:$0xff]  }
  0x91   : > { %1662 = vmatmul.mubr.bf16.vlgmr.msra.gmra.mrb[0].mxu0 %v778_v59  ;;  %v6748_v59 = vld [vmem:[%s9537_s3 + $0x2d0] ss:$8 sps:$4 sm:$0xff]  }
  0x92   : > { %1743 = vmatpush1.bf16.msra.mxu0 %v6709_v58  ;;  %1671 = vmatprep.mubr.bf16.mxu0 %v786_v61  ;;  %v828_v58 = vpack.c.bf16 %v772_v53, %v765_v52  ;;  %v771_v61 = vld [vmem:[%s7385_s25 + $0x358] sm:$0xff]  ;;  %v6775_v52 = vld [vmem:[%s9537_s3 + $0x360] ss:$8 sps:$4 sm:$0xff]  }
  0x93   : > { %1744 = vmatprep.subr.bf16.mxu0 %v6714_v60  ;;  %v764_v60 = vld [vmem:[%s7385_s25 + $0x320] sm:$0xff] }
  0x94   : > { %v827_v2 = vpack.c.bf16 %v771_v61, %v764_v60  ;;  %v739_v60 = vld [vmem:[%s7385_s25 + $0x258] sm:$0xff]  ;;  %v746_v61 = vld [vmem:[%s7385_s25 + $0x290] sm:$0xff] }
  0x96   : > { %1745 = vmatpush1.bf16.msra.mxu0 %v6712_v62  ;;  %v6753_v62 = vld [vmem:[%s9537_s3 + $0x2e4] ss:$8 sps:$4 sm:$0xff]  }
  0x97   : > { %1746 = vmatprep.subr.bf16.mxu0 %v6717_v1  ;;  %v6751_v1 = vld [vmem:[%s9537_s3 + $0x2e0] ss:$8 sps:$4 sm:$0xff]  }
  0x99   : > { %1672 = vmatmul.mubr.bf16.gmra.mrb[4].mxu0 %v785_v5  ;;  %v6781_v5 = vld [vmem:[%s9539_s26 + $0x40] sm:$0xff]  }
  0x9a   : > { %1747 = vmatpush1.bf16.msra.mxu0 %v6715_v4  ;;  %1681 = vmatprep.mubr.bf16.mxu0 %v793_v7  ;;  %v781_v4 = vpack.c.bf16 %v676_v0, %v669_v63  ;;  %v6783_v7 = vld [vmem:[%s9539_s26 + $0x48] sm:$0xff]   ;;  %v816_v63 = vpack.c.bf16 %v746_v61, %v739_v60  ;;  %v738_v0 = vld [vmem:[%s7385_s25 + $0x250] sm:$0xff] }
  0x9b   : > { %1748 = vmatprep.subr.bf16.mxu0 %v6720_v6  ;;  %v6782_v6 = vld [vmem:[%s9539_s26] sm:$0xff]   ;;  %6169 = vmatprep.subr.bf16.mxu1 %v6781_v5 }
  0x9c   : > { %6170 = vmatpush3.bf16.msra.mxu1 %v6782_v6  ;;  %v752_v6 = vld [vmem:[%s7385_s25 + $0x2c0] sm:$0xff] }
  0x9d   : > { %6171 = vmatprep.subr.bf16.mxu1 %v6783_v7  ;;  %v759_v7 = vld [vmem:[%s7385_s25 + $0x2f8] sm:$0xff] }
  0x9e   : > { %1749 = vmatpush1.bf16.msra.mxu0 %v6718_v8  ;;  %v6754_v8 = vld [vmem:[%s9537_s3 + $0x2f0] ss:$8 sps:$4 sm:$0xff]  }
  0x9f   : > { %1750 = vmatprep.subr.bf16.mxu0 %v6723_v11  ;;  %v6759_v11 = vld [vmem:[%s9537_s3 + $0x304] ss:$8 sps:$4 sm:$0xff]  }
  0xa1   : > { %1682 = vmatmul.mubr.bf16.gmra.mrb[8].mxu0 %v792_v15  ;;  %v6784_v15 = vld [vmem:[%s9539_s26 + $0x8] sm:$0xff]  }
  0xa2   : > { %1751 = vmatpush1.bf16.msra.mxu0 %v6721_v14  ;;  %1691 = vmatprep.mubr.bf16.mxu0 %v800_v17  ;;  %v6757_v14 = vld [vmem:[%s9537_s3 + $0x300] ss:$8 sps:$4 sm:$0xff]   ;;  %v780_v17 = vpack.c.bf16 %v675_v10, %v668_v9  ;;  %v774_v9 = vld [vmem:[%s7385_s25 + $0x370] sm:$0xff]  ;;  %v822_v10 = vpack.c.bf16 %v759_v7, %v752_v6 }
  0xa3   : > { %1752 = vmatprep.subr.bf16.mxu0 %v6726_v16  ;;  %v6785_v16 = vld [vmem:[%s9539_s26 + $0x50] sm:$0xff]   ;;  %6172 = vmatpush3.bf16.msra.mxu1 %v6784_v15  ;;  %v6798_v6 = vld [vmem:[%s9515_s6 + $0x8] sm:$0xff]  }
  0xa4   : > { %6173 = vmatprep.subr.bf16.mxu1 %v6785_v16  ;;  %v670_v15 = vld [vmem:[%s7385_s25 + $0x30] sm:$0xff]  ;;  %v677_v16 = vld [vmem:[%s7385_s25 + $0x68] sm:$0xff] }
  0xa6   : > { %1753 = vmatpush1.bf16.msra.mxu0 %v6724_v18  ;;  %v6762_v18 = vld [vmem:[%s9537_s3 + $0x314] ss:$8 sps:$4 sm:$0xff]  }
  0xa7   : > { %1754 = vmatprep.subr.bf16.mxu0 %v6729_v21  ;;  %v6787_v21 = vld [vmem:[%s9539_s26 + $0x58] sm:$0xff]   ;;  %6174 = vmatpush3.bf16.msra.mxu1 %v6786_v20 }
  0xa8   : > { %6175 = vmatprep.subr.bf16.mxu1 %v6787_v21  ;;  %v698_v21 = vld [vmem:[%s7385_s25 + $0x110] sm:$0xff] }
  0xa9   : > { %1692 = vmatmul.mubr.bf16.gmra.mrb[12].mxu0 %v799_v25  ;;  %v697_v25 = vld [vmem:[%s7385_s25 + $0x108] sm:$0xff] }
  0xaa   : > { %1755 = vmatpush1.bf16.msra.mxu0 %v6727_v24  ;;  %1701 = vmatprep.mubr.bf16.mxu0 %v807_v27  ;;  %v6760_v24 = vld [vmem:[%s9537_s3 + $0x310] ss:$8 sps:$4 sm:$0xff]   ;;  %v6765_v27 = vld [vmem:[%s9537_s3 + $0x324] ss:$8 sps:$4 sm:$0xff]  }
  0xab   : > { %1756 = vmatprep.subr.bf16.mxu0 %v6732_v26  ;;  %v704_v26 = vld [vmem:[%s7385_s25 + $0x140] sm:$0xff] }
  0xac   : > { %v795_v33 = vpack.c.bf16 %v704_v26, %v697_v25  ;;  %v719_v25 = vld [vmem:[%s7385_s25 + $0x1b8] sm:$0xff] }
  0xae   : > { %1757 = vmatpush1.bf16.msra.mxu0 %v6730_v28  ;;  %v6788_v28 = vld [vmem:[%s9539_s26 + $0x18] sm:$0xff]  }
  0xaf   : > { %1758 = vmatprep.subr.bf16.mxu0 %v6735_v31  ;;  %v787_v31 = vpack.c.bf16 %v689_v23, %v682_v22  ;;  %6176 = vmatpush3.bf16.msra.mxu1 %v6788_v28  ;;  %v705_v22 = vld [vmem:[%s7385_s25 + $0x148] sm:$0xff] }
  0xb0   : > { %6177 = vmatprep.subr.bf16.mxu1 %v6789_v29  ;;  %v796_v23 = vpack.c.bf16 %v705_v22, %v698_v21  ;;  %v733_v28 = vld [vmem:[%s7385_s25 + $0x228] sm:$0xff]  ;;  %v6800_v22 = vld [vmem:[%s9515_s6 + $0x18] sm:$0xff]  }
  0xb1   : > { %1702 = vmatmul.mubr.bf16.gmra.mrb[16].mxu0 %v806_v35  ;;  %v6791_v35 = vld [vmem:[%s9539_s26 + $0x68] sm:$0xff]  }
  0xb2   : > { %1759 = vmatpush1.bf16.msra.mxu0 %v6733_v34  ;;  %1711 = vmatprep.mubr.bf16.mxu0 %v814_v37  ;;  %v6790_v34 = vld [vmem:[%s9539_s26 + $0x20] sm:$0xff]   ;;  %v703_v37 = vld [vmem:[%s7385_s25 + $0x138] sm:$0xff] }
  0xb3   : > { %1760 = vmatprep.subr.bf16.mxu0 %v6738_v36  ;;  %v696_v36 = vld [vmem:[%s7385_s25 + $0x100] sm:$0xff]  ;;  %6178 = vmatpush3.bf16.msra.mxu1 %v6790_v34  ;;  %v761_v34 = vld [vmem:[%s7385_s25 + $0x308] sm:$0xff] }
  0xb4   : > { %v794_v43 = vpack.c.bf16 %v703_v37, %v696_v36  ;;  %6179 = vmatprep.subr.bf16.mxu1 %v6791_v35  ;;  %v768_v36 = vld [vmem:[%s7385_s25 + $0x340] sm:$0xff]  ;;  %v775_v37 = vld [vmem:[%s7385_s25 + $0x378] sm:$0xff] }
  0xb6   : > { %1761 = vmatpush1.bf16.msra.mxu0 %v6736_v38  ;;  %v6766_v38 = vld [vmem:[%s9537_s3 + $0x330] ss:$8 sps:$4 sm:$0xff]  }
  0xb7   : > { %1762 = vmatprep.subr.bf16.mxu0 %v6741_v41  ;;  %v6771_v41 = vld [vmem:[%s9537_s3 + $0x344] ss:$8 sps:$4 sm:$0xff]  }
  0xb9   : > { %1712 = vmatmul.mubr.bf16.gmra.mrb[20].mxu0 %v813_v45  ;;  %v802_v45 = vpack.c.bf16 %v718_v40, %v711_v39  ;;  %v6792_v39 = vld [vmem:[%s9539_s26 + $0x28] sm:$0xff]   ;;  %v6793_v40 = vld [vmem:[%s9539_s26 + $0x70] sm:$0xff]  }
  0xba   : > { %1763 = vmatpush1.bf16.msra.mxu0 %v6739_v44  ;;  %1721 = vmatprep.mubr.bf16.mxu0 %v821_v47  ;;  %v6774_v44 = vld [vmem:[%s9537_s3 + $0x354] ss:$8 sps:$4 sm:$0xff]   ;;  %v717_v47 = vld [vmem:[%s7385_s25 + $0x1a8] sm:$0xff] }
  0xbb   : > { %1764 = vmatprep.subr.bf16.mxu0 %v6744_v46  ;;  %v710_v46 = vld [vmem:[%s7385_s25 + $0x170] sm:$0xff]  ;;  %6180 = vmatpush3.bf16.msra.mxu1 %v6792_v39 }
  0xbc   : > { %v801_v53 = vpack.c.bf16 %v717_v47, %v710_v46  ;;  %6181 = vmatprep.subr.bf16.mxu1 %v6793_v40 }
  0xbe   : > { %1765 = vmatpush1.bf16.msra.mxu0 %v6742_v48  ;;  %v6772_v48 = vld [vmem:[%s9537_s3 + $0x350] ss:$8 sps:$4 sm:$0xff]  }
  0xbf   : > { %1766 = vmatprep.subr.bf16.mxu0 %v6747_v51  ;;  %v6777_v51 = vld [vmem:[%s9537_s3 + $0x364] ss:$8 sps:$4 sm:$0xff]  }
  0xc1   : > { %1722 = vmatmul.mubr.bf16.gmra.mrb[24].mxu0 %v820_v55  ;;  %v809_v55 = vpack.c.bf16 %v732_v50, %v725_v49 }
  0xc2   : > { %1767 = vmatpush1.bf16.msra.mxu0 %v6745_v54  ;;  %1731 = vmatprep.mubr.bf16.mxu0 %v828_v58  ;;  %v6780_v54 = vld [vmem:[%s9537_s3 + $0x374] ss:$8 sps:$4 sm:$0xff]  }
  0xc3   : > { %1768 = vmatprep.subr.bf16.mxu0 %v6750_v56  ;;  %v724_v56 = vld [vmem:[%s7385_s25 + $0x1e0] sm:$0xff]  ;;  %v731_v58 = vld [vmem:[%s7385_s25 + $0x218] sm:$0xff] }
  0xc6   : > { %1769 = vmatpush1.bf16.msra.mxu0 %v6748_v59  ;;  %v6778_v59 = vld [vmem:[%s9537_s3 + $0x370] ss:$8 sps:$4 sm:$0xff]  }
  0xc7   : > { %1770 = vmatprep.subr.bf16.mxu0 %v6753_v62  ;;  %v808_v62 = vpack.c.bf16 %v731_v58, %v724_v56 }
  0xc9   : > { %1732 = vmatmul.mubr.bf16.gmra.mrb[28].mxu0 %v827_v2  ;;  %v753_v2 = vld [vmem:[%s7385_s25 + $0x2c8] sm:$0xff] }
  0xca   : > { %1771 = vmatpush1.bf16.msra.mxu0 %v6751_v1  ;;  %1774 = vmatprep.mubr.bf16.mxu0 %v781_v4  ;;  %v745_v1 = vld [vmem:[%s7385_s25 + $0x288] sm:$0xff] }
  0xcb   : > { %1772 = vmatprep.subr.bf16.mxu0 %v6756_v3  ;;  %v760_v3 = vld [vmem:[%s7385_s25 + $0x300] sm:$0xff]  ;;  %v815_v4 = vpack.c.bf16 %v745_v1, %v738_v0 }
  0xcc   : > { %v823_v5 = vpack.c.bf16 %v760_v3, %v753_v2 }
  0xce   : > { %1773 = vmatpush1.bf16.msra.mxu0 %v6754_v8  ;;  %v767_v8 = vld [vmem:[%s7385_s25 + $0x338] sm:$0xff] }
  0xcf   : > { %1855 = vmatprep.subr.bf16.mxu0 %v6759_v11  ;;  %v830_v11 = vpack.c.bf16 %v774_v9, %v767_v8 }
  0xd1   : > { %1775 = vmatmul.mubr.bf16.vlgmr.msra.gmra.mrb[0].mxu0 %v780_v17  ;;  %v782_v17 = vpack.c.bf16 %v677_v16, %v670_v15 }
  0xd2   : > { %1856 = vmatpush1.bf16.msra.mxu0 %v6757_v14  ;;  %1784 = vmatprep.mubr.bf16.mxu0 %v788_v19  ;;  %v829_v14 = vpack.c.bf16 %v773_v13, %v766_v12  ;;  %v691_v19 = vld [vmem:[%s7385_s25 + $0xd8] sm:$0xff] }
  0xd3   : > { %1857 = vmatprep.subr.bf16.mxu0 %v6762_v18  ;;  %v684_v18 = vld [vmem:[%s7385_s25 + $0xa0] sm:$0xff] }
  0xd4   : > { %v789_v20 = vpack.c.bf16 %v691_v19, %v684_v18 }
  0xd6   : > { %1858 = vmatpush1.bf16.msra.mxu0 %v6760_v24  ;;  %v712_v24 = vld [vmem:[%s7385_s25 + $0x180] sm:$0xff] }
  0xd7   : > { %1859 = vmatprep.subr.bf16.mxu0 %v6765_v27  ;;  %v803_v26 = vpack.c.bf16 %v719_v25, %v712_v24  ;;  %v726_v27 = vld [vmem:[%s7385_s25 + $0x1f0] sm:$0xff] }
  0xd8   : > { %v810_v29 = vpack.c.bf16 %v733_v28, %v726_v27 }
  0xd9   : > { %1785 = vmatmul.mubr.bf16.gmra.mrb[4].mxu0 %v787_v31  ;;  %v747_v31 = vld [vmem:[%s7385_s25 + $0x298] sm:$0xff] }
  0xda   : > { %1794 = vmatprep.mubr.bf16.mxu0 %v795_v33  ;;  %1860 = vmatpush1.bf16.msra.mxu0 %v6763_v30  ;;  %v740_v30 = vld [vmem:[%s7385_s25 + $0x260] sm:$0xff]  ;;  %v754_v33 = vld [vmem:[%s7385_s25 + $0x2d0] sm:$0xff] }
  0xdb   : > { %1861 = vmatprep.subr.bf16.mxu0 %v6768_v32  ;;  %v817_v32 = vpack.c.bf16 %v747_v31, %v740_v30  ;;  %v824_v35 = vpack.c.bf16 %v761_v34, %v754_v33  ;;  %v6801_v30 = vld [vmem:[%s9515_s6 + $0x20] sm:$0xff]  }
  0xde   : > { %1862 = vmatpush1.bf16.msra.mxu0 %v6766_v38  ;;  %v831_v38 = vpack.c.bf16 %v775_v37, %v768_v36 }
  0xdf   : > { %1863 = vmatprep.subr.bf16.mxu0 %v6771_v41  ;;  %v6794_v41 = vld [vmem:[%s9539_s26 + $0x30] sm:$0xff]  }
  0xe0   : > { %6182 = vmatpush3.bf16.msra.mxu1 %v6794_v41 }
  0xe1   : > { %1795 = vmatmul.mubr.bf16.gmra.mrb[8].mxu0 %v794_v43  ;;  %v6796_v43 = vld [vmem:[%s9539_s26 + $0x38] sm:$0xff]  }
  0xe2   : > { %1804 = vmatprep.mubr.bf16.mxu0 %v802_v45  ;;  %1864 = vmatpush1.bf16.msra.mxu0 %v6769_v42  ;;  %v6795_v42 = vld [vmem:[%s9539_s26 + $0x78] sm:$0xff]   ;;  %v946_v45 = vlaneseq }
  0xe3   : > { %1865 = vmatprep.subr.bf16.mxu0 %v6774_v44  ;;  %6183 = vmatprep.subr.bf16.mxu1 %v6795_v42  ;;  %v6797_v44 = vld [vmem:[%s9515_s6] sm:$0xff]  }
  0xe4   : > { %6184 = vmatpush3.bf16.msra.mxu1 %v6796_v43  ;;  %v7864_v46 = vshrl.u32 %v946_v45, 7 }
  0xe5   : > { %6313 = vmatprep.subr.bf16.mxu1 %v6797_v44 }
  0xe6   : > { %1866 = vmatpush1.bf16.msra.mxu0 %v6772_v48  ;;  %v7867_v47 = vsub.s32 0, %v7864_v46  ;;  %v944_v48 = vld [vmem:[%s9540_s4] sm:$0x3]  ;;  %v7873_v49 = vsub.s32 1, %v7864_v46  ;;  %s9541_s4 = sld [smem:[#allocation4_spill]] }
  0xe7   : > { %1867 = vmatprep.subr.bf16.mxu0 %v6777_v51 }
  0xe8   : > { %v7876_v50 = vrot.slane %v944_v48, %v7867_v47  ;;  %v7879_v51 = vrot.slane %v944_v48, %v7873_v49 }
  0xe9   : > { %1805 = vmatmul.mubr.bf16.gmra.mrb[12].mxu0 %v801_v53 }
  0xea   : > { %1814 = vmatprep.mubr.bf16.mxu0 %v809_v55  ;;  %1868 = vmatpush1.bf16.msra.mxu0 %v6775_v52 }
  0xeb   : > { %1869 = vmatprep.subr.bf16.mxu0 %v6780_v54 }
  0xec   : > { %s8114_s29 = scalar_lea.vmem %s9541_s4, %s6168_s22 }
  0xee   : > { %1870 = vmatpush1.bf16.msra.mxu0 %v6778_v59 }
  0xf1   : > { %1815 = vmatmul.mubr.bf16.gmra.mrb[16].mxu0 %v808_v62 }
  0xf2   : > { %1824 = vmatprep.mubr.bf16.mxu0 %v816_v63 }
  0xf9   : > { %1825 = vmatmul.mubr.bf16.gmra.mrb[20].mxu0 %v815_v4 }
  0xfa   : > { %1834 = vmatprep.mubr.bf16.mxu0 %v823_v5 }
 0x101   : > { %1835 = vmatmul.mubr.bf16.gmra.mrb[24].mxu0 %v822_v10 }
 0x102   : > { %1844 = vmatprep.mubr.bf16.mxu0 %v830_v11 }
 0x109   : > { %1845 = vmatmul.mubr.bf16.gmra.mrb[28].mxu0 %v829_v14  ;;  %v6799_v14 = vld [vmem:[%s9515_s6 + $0x10] sm:$0xff]  }
 0x10a   : > { %1887 = vmatprep.mubr.bf16.mxu0 %v7229_v57 }
 0x111   : > { %1888 = vmatmul.mubr.bf16.vlgmr.msra.gmra.mrb[0].mxu0 %v782_v17 }
 0x112   : > { %1897 = vmatprep.mubr.bf16.mxu0 %v7229_v57 }
 0x119   : > { %1898 = vmatmul.mubr.bf16.gmra.mrb[4].mxu0 %v789_v20 }
 0x11a   : > { %1907 = vmatprep.mubr.bf16.mxu0 %v7229_v57 }
 0x121   : > { %1908 = vmatmul.mubr.bf16.gmra.mrb[8].mxu0 %v796_v23 }
 0x122   : > { %1917 = vmatprep.mubr.bf16.mxu0 %v7229_v57 }
 0x129   : > { %1918 = vmatmul.mubr.bf16.gmra.mrb[12].mxu0 %v803_v26 }
 0x12a   : > { %1927 = vmatprep.mubr.bf16.mxu0 %v7229_v57 }
 0x131   : > { %1928 = vmatmul.mubr.bf16.gmra.mrb[16].mxu0 %v810_v29 }
 0x132   : > { %1937 = vmatprep.mubr.bf16.mxu0 %v7229_v57 }
 0x139   : > { %1938 = vmatmul.mubr.bf16.gmra.mrb[20].mxu0 %v817_v32 }
 0x13a   : > { %1947 = vmatprep.mubr.bf16.mxu0 %v7229_v57 }
 0x141   : > { %1948 = vmatmul.mubr.bf16.gmra.mrb[24].mxu0 %v824_v35 }
 0x142   : > { %1957 = vmatprep.mubr.bf16.mxu0 %v7229_v57 }
 0x149   : > { %1958 = vmatmul.mubr.bf16.gmra.mrb[28].mxu0 %v831_v38  ;;  %v6802_v38 = vld [vmem:[%s9515_s6 + $0x28] sm:$0xff]  }
 0x1e4   : > { %v1889_v52 = vpop.f32.mrb[0].mxu0 }
 0x1e5   : > { %v6345_v53 = vadd.f32 %v1889_v52, %v7876_v50  ;;  %v1891_v54 = vpop.f32.mrb[1].mxu0 }
 0x1e6   : > { %v6346_v55 = vadd.f32 %v1891_v54, %v7879_v51  ;;  %v1893_v56 = vpop.f32.mrb[2].mxu0 }
 0x1e7   : > { %v6347_v58 = vadd.f32 %v1893_v56, %v7876_v50  ;;  %v1895_v59 = vpop.f32.mrb[3].mxu0  ;;  %v1968_v61 = vmax.f32 %v6345_v53, 0.0 }
 0x1e8   : > { %v6348_v60 = vadd.f32 %v1895_v59, %v7879_v51  ;;  %v1969_v63 = vmax.f32 %v6346_v55, 0.0 }
 0x1e9   : > { %v1970_v62 = vmax.f32 %v6347_v58, 0.0 }
 0x1ea   : > { %v1971_v0 = vmax.f32 %v6348_v60, 0.0 }
 0x1eb   : > { %v2000_v1 = vpack.c.bf16 %v1970_v62, %v1968_v61 }
 0x1ec   : > { %v1899_v2 = vpop.f32.mrb[4].mxu0  ;;  %v2001_v3 = vpack.c.bf16 %v1971_v0, %v1969_v63 }
 0x1ed   : > { %v6349_v4 = vadd.f32 %v1899_v2, %v7876_v50  ;;  %v1901_v5 = vpop.f32.mrb[5].mxu0 }
 0x1ee   : > { %v6350_v7 = vadd.f32 %v1901_v5, %v7879_v51  ;;  %v1903_v8 = vpop.f32.mrb[6].mxu0  ;;  %2183 = vmatprep.mubr.bf16.mxu1 %v2001_v3 }
 0x1ef   : > { %v6351_v9 = vadd.f32 %v1903_v8, %v7876_v50  ;;  %v1905_v10 = vpop.f32.mrb[7].mxu0  ;;  %2184 = vmatmul.mubr.bf16.vlgmr.msra.gmra.mrb[0].mxu1 %v2000_v1  ;;  %v1972_v12 = vmax.f32 %v6349_v4, 0.0 }
 0x1f0   : > { %v6352_v11 = vadd.f32 %v1905_v10, %v7879_v51  ;;  %6314 = vmatpush3.bf16.msra.mxu1 %v6797_v44  ;;  %v1973_v15 = vmax.f32 %v6350_v7, 0.0 }
 0x1f1   : > { %v1974_v13 = vmax.f32 %v6351_v9, 0.0  ;;  %6315 = vmatprep.subr.bf16.mxu1 %v6798_v6 }
 0x1f2   : > { %v1975_v16 = vmax.f32 %v6352_v11, 0.0 }
 0x1f3   : > { %v2002_v17 = vpack.c.bf16 %v1974_v13, %v1972_v12 }
 0x1f4   : > { %v2003_v18 = vpack.c.bf16 %v1975_v16, %v1973_v15  ;;  %v1909_v19 = vpop.f32.mrb[8].mxu0  ;;  %6316 = vmatpush3.bf16.msra.mxu1 %v6798_v6 }
 0x1f5   : > { %v6353_v20 = vadd.f32 %v1909_v19, %v7876_v50  ;;  %v1911_v21 = vpop.f32.mrb[9].mxu0  ;;  %6317 = vmatprep.subr.bf16.mxu1 %v6799_v14 }
 0x1f6   : > { %v6354_v23 = vadd.f32 %v1911_v21, %v7879_v51  ;;  %v1913_v24 = vpop.f32.mrb[10].mxu0  ;;  %2191 = vmatprep.mubr.bf16.mxu1 %v2003_v18 }
 0x1f7   : > { %v6355_v25 = vadd.f32 %v1913_v24, %v7876_v50  ;;  %v1915_v26 = vpop.f32.mrb[11].mxu0  ;;  %2192 = vmatmul.mubr.bf16.gmra.mrb[4].mxu1 %v2002_v17  ;;  %v1976_v28 = vmax.f32 %v6353_v20, 0.0 }
 0x1f8   : > { %v6356_v27 = vadd.f32 %v1915_v26, %v7879_v51  ;;  %6318 = vmatpush3.bf16.msra.mxu1 %v6799_v14  ;;  %v1977_v31 = vmax.f32 %v6354_v23, 0.0 }
 0x1f9   : > { %v1978_v29 = vmax.f32 %v6355_v25, 0.0  ;;  %6319 = vmatprep.subr.bf16.mxu1 %v6800_v22 }
 0x1fa   : > { %v1979_v32 = vmax.f32 %v6356_v27, 0.0 }
 0x1fb   : > { %v2004_v33 = vpack.c.bf16 %v1978_v29, %v1976_v28 }
 0x1fc   : > { %v2005_v34 = vpack.c.bf16 %v1979_v32, %v1977_v31  ;;  %v1919_v35 = vpop.f32.mrb[12].mxu0  ;;  %6320 = vmatpush3.bf16.msra.mxu1 %v6800_v22 }
 0x1fd   : > { %v6357_v36 = vadd.f32 %v1919_v35, %v7876_v50  ;;  %v1921_v37 = vpop.f32.mrb[13].mxu0  ;;  %6321 = vmatprep.subr.bf16.mxu1 %v6801_v30 }
 0x1fe   : > { %v6358_v39 = vadd.f32 %v1921_v37, %v7879_v51  ;;  %v1923_v40 = vpop.f32.mrb[14].mxu0  ;;  %2199 = vmatprep.mubr.bf16.mxu1 %v2005_v34 }
 0x1ff   : > { %v6359_v41 = vadd.f32 %v1923_v40, %v7876_v50  ;;  %v1925_v42 = vpop.f32.mrb[15].mxu0  ;;  %2200 = vmatmul.mubr.bf16.gmra.mrb[8].mxu1 %v2004_v33  ;;  %v1980_v44 = vmax.f32 %v6357_v36, 0.0 }
 0x200   : > { %v6360_v43 = vadd.f32 %v1925_v42, %v7879_v51  ;;  %6322 = vmatpush3.bf16.msra.mxu1 %v6801_v30  ;;  %v1981_v52 = vmax.f32 %v6358_v39, 0.0 }
 0x201   : > { %v1982_v48 = vmax.f32 %v6359_v41, 0.0  ;;  %6323 = vmatprep.subr.bf16.mxu1 %v6802_v38 }
 0x202   : > { %v1983_v53 = vmax.f32 %v6360_v43, 0.0 }
 0x203   : > { %v2006_v54 = vpack.c.bf16 %v1982_v48, %v1980_v44 }
 0x204   : > { %v2007_v55 = vpack.c.bf16 %v1983_v53, %v1981_v52  ;;  %v1929_v56 = vpop.f32.mrb[16].mxu0  ;;  %6324 = vmatpush3.bf16.msra.mxu1 %v6802_v38 }
 0x205   : > { %v6361_v58 = vadd.f32 %v1929_v56, %v7876_v50  ;;  %v1931_v59 = vpop.f32.mrb[17].mxu0 }
 0x206   : > { %v6362_v60 = vadd.f32 %v1931_v59, %v7879_v51  ;;  %v1933_v61 = vpop.f32.mrb[18].mxu0  ;;  %2207 = vmatprep.mubr.bf16.mxu1 %v2007_v55  ;;  %v6803_v55 = vld [vmem:[%s9515_s6 + $0x30] sm:$0xff]  }
 0x207   : > { %v6363_v62 = vadd.f32 %v1933_v61, %v7876_v50  ;;  %v1935_v63 = vpop.f32.mrb[19].mxu0  ;;  %2208 = vmatmul.mubr.bf16.gmra.mrb[12].mxu1 %v2006_v54  ;;  %v1984_v1 = vmax.f32 %v6361_v58, 0.0  ;;  %6325 = vmatprep.subr.bf16.mxu1 %v6803_v55  ;;  %v7940_v58 = vld [vmem:[%s9514_s5] ss:$0 sm:$0xff] }
 0x208   : > { %v6364_v0 = vadd.f32 %v1935_v63, %v7879_v51  ;;  %v1985_v3 = vmax.f32 %v6362_v60, 0.0  ;;  %6326 = vmatpush3.bf16.msra.mxu1 %v6803_v55 }
 0x209   : > { %v1986_v2 = vmax.f32 %v6363_v62, 0.0 }
 0x20a   : > { %v1987_v4 = vmax.f32 %v6364_v0, 0.0 }
 0x20b   : > { %v2008_v5 = vpack.c.bf16 %v1986_v2, %v1984_v1 }
 0x20c   : > { %v2009_v6 = vpack.c.bf16 %v1987_v4, %v1985_v3  ;;  %v1939_v7 = vpop.f32.mrb[20].mxu0 }
 0x20d   : > { %v6365_v8 = vadd.f32 %v1939_v7, %v7876_v50  ;;  %v1941_v9 = vpop.f32.mrb[21].mxu0 }
 0x20e   : > { %v6366_v10 = vadd.f32 %v1941_v9, %v7879_v51  ;;  %v1943_v11 = vpop.f32.mrb[22].mxu0  ;;  %2215 = vmatprep.mubr.bf16.mxu1 %v2009_v6 }
 0x20f   : > { %v6367_v12 = vadd.f32 %v1943_v11, %v7876_v50  ;;  %v1945_v13 = vpop.f32.mrb[23].mxu0  ;;  %2216 = vmatmul.mubr.bf16.gmra.mrb[16].mxu1 %v2008_v5  ;;  %v1988_v15 = vmax.f32 %v6365_v8, 0.0 }
 0x210   : > { %v6368_v14 = vadd.f32 %v1945_v13, %v7879_v51  ;;  %v1989_v17 = vmax.f32 %v6366_v10, 0.0 }
 0x211   : > { %v1990_v16 = vmax.f32 %v6367_v12, 0.0 }
 0x212   : > { %v1991_v18 = vmax.f32 %v6368_v14, 0.0 }
 0x213   : > { %v2010_v19 = vpack.c.bf16 %v1990_v16, %v1988_v15 }
 0x214   : > { %v2011_v20 = vpack.c.bf16 %v1991_v18, %v1989_v17  ;;  %v1949_v21 = vpop.f32.mrb[24].mxu0  ;;  %v6805_v17 = vld [vmem:[%s9517_s8] ss:$16 sps:$4 sm:$0xff]  }
 0x215   : > { %v6369_v22 = vadd.f32 %v1949_v21, %v7876_v50  ;;  %v1951_v23 = vpop.f32.mrb[25].mxu0  ;;  %v6810_v21 = vld [vmem:[%s9517_s8 + $0x24] ss:$16 sps:$4 sm:$0xff]  }
 0x216   : > { %v6370_v24 = vadd.f32 %v1951_v23, %v7879_v51  ;;  %v1953_v25 = vpop.f32.mrb[26].mxu0  ;;  %2223 = vmatprep.mubr.bf16.mxu1 %v2011_v20 }
 0x217   : > { %v6371_v26 = vadd.f32 %v1953_v25, %v7876_v50  ;;  %v1955_v27 = vpop.f32.mrb[27].mxu0  ;;  %2224 = vmatmul.mubr.bf16.gmra.mrb[20].mxu1 %v2010_v19  ;;  %v1992_v29 = vmax.f32 %v6369_v22, 0.0  ;;  %v6808_v25 = vld [vmem:[%s9517_s8 + $0x20] ss:$16 sps:$4 sm:$0xff]  }
 0x218   : > { %v6372_v28 = vadd.f32 %v1955_v27, %v7879_v51  ;;  %v1993_v31 = vmax.f32 %v6370_v24, 0.0  ;;  %v6813_v27 = vld [vmem:[%s9517_s8 + $0x44] ss:$16 sps:$4 sm:$0xff]  }
 0x219   : > { %v1994_v30 = vmax.f32 %v6371_v26, 0.0 }
 0x21a   : > { %v1995_v32 = vmax.f32 %v6372_v28, 0.0 }
 0x21b   : > { %v2012_v33 = vpack.c.bf16 %v1994_v30, %v1992_v29 }
 0x21c   : > { %v2013_v34 = vpack.c.bf16 %v1995_v32, %v1993_v31  ;;  %v1959_v35 = vpop.f32.mrb[28].mxu0  ;;  %v6811_v32 = vld [vmem:[%s9517_s8 + $0x40] ss:$16 sps:$4 sm:$0xff]  }
 0x21d   : > { %v6373_v36 = vadd.f32 %v1959_v35, %v7876_v50  ;;  %v1961_v37 = vpop.f32.mrb[29].mxu0 }
 0x21e   : > { %v6374_v38 = vadd.f32 %v1961_v37, %v7879_v51  ;;  %v1963_v39 = vpop.f32.mrb[30].mxu0  ;;  %2231 = vmatprep.mubr.bf16.mxu1 %v2013_v34 }
 0x21f   : > { %v6375_v40 = vadd.f32 %v1963_v39, %v7876_v50  ;;  %v1965_v41 = vpop.f32.mrb[31].mxu0  ;;  %2232 = vmatmul.mubr.bf16.gmra.mrb[24].mxu1 %v2012_v33  ;;  %v1996_v43 = vmax.f32 %v6373_v36, 0.0  ;;  %v6804_v50 = vld [vmem:[%s9515_s6 + $0x38] sm:$0xff]   ;;  %v6816_v36 = vld [vmem:[%s9517_s8 + $0x64] ss:$16 sps:$4 sm:$0xff]  }
 0x220   : > { %v6376_v42 = vadd.f32 %v1965_v41, %v7879_v51  ;;  %v1997_v48 = vmax.f32 %v6374_v38, 0.0  ;;  %6327 = vmatprep.subr.bf16.mxu1 %v6804_v50  ;;  %v6807_v51 = vld [vmem:[%s9517_s8 + $0x4] ss:$16 sps:$4 sm:$0xff]  }
 0x221   : > { %v1998_v44 = vmax.f32 %v6375_v40, 0.0  ;;  %6328 = vmatpush3.bf16.msra.mxu1 %v6804_v50  ;;  %v6814_v40 = vld [vmem:[%s9517_s8 + $0x60] ss:$16 sps:$4 sm:$0xff]  }
 0x222   : > { %v1999_v52 = vmax.f32 %v6376_v42, 0.0  ;;  %2678 = vmatprep.subr.bf16.mxu1 %v6807_v51  ;;  %v6819_v42 = vld [vmem:[%s9517_s8 + $0x84] ss:$16 sps:$4 sm:$0xff]  }
 0x223   : > { %v2014_v53 = vpack.c.bf16 %v1998_v44, %v1996_v43  ;;  %v6822_v51 = vld [vmem:[%s9517_s8 + $0xa4] ss:$16 sps:$4 sm:$0xff]  }
 0x224   : > { %v2015_v54 = vpack.c.bf16 %v1999_v52, %v1997_v48 }
 0x226   : > { %2239 = vmatprep.mubr.bf16.mxu1 %v2015_v54 }
 0x227   : > { %2240 = vmatmul.mubr.bf16.gmra.mrb[28].mxu1 %v2014_v53  ;;  %v6817_v53 = vld [vmem:[%s9517_s8 + $0x80] ss:$16 sps:$4 sm:$0xff]  }
 0x2c2   : > { %v6185_v56 = vpop.f32.mrb[0].mxu1 }
 0x2c3   : > { %v6186_v59 = vpop.f32.mrb[1].mxu1 }
 0x2c4   : > { %v6187_v60 = vadd.f32 %v6186_v59, %v6185_v56  ;;  %v6188_v61 = vpop.f32.mrb[2].mxu1 }
 0x2c5   : > { %v6189_v62 = vpop.f32.mrb[3].mxu1 }
 0x2c6   : > { %v2186_v63 = vadd.f32 %v6187_v60, %v7940_v58  ;;  %v6190_v0 = vadd.f32 %v6189_v62, %v6188_v61  ;;  %v6820_v61 = vld [vmem:[%s9517_s8 + $0xa0] ss:$16 sps:$4 sm:$0xff]  }
 0x2c8   : > { %v2189_v1 = vadd.f32 %v6190_v0, %v7940_v58  ;;  %v2248_v2 = vmax.f32 %v2186_v63, 0.0 }
 0x2ca   : > { %v2249_v3 = vmax.f32 %v2189_v1, 0.0  ;;  %v6191_v4 = vpop.f32.mrb[4].mxu1 }
 0x2cb   : > { %v6192_v5 = vpop.f32.mrb[5].mxu1 }
 0x2cc   : > { %v6193_v6 = vadd.f32 %v6192_v5, %v6191_v4  ;;  %v6194_v7 = vpop.f32.mrb[6].mxu1  ;;  %v2264_v8 = vpack.c.bf16 %v2249_v3, %v2248_v2 }
 0x2cd   : > { %v6195_v9 = vpop.f32.mrb[7].mxu1 }
 0x2ce   : > { %v2194_v10 = vadd.f32 %v6193_v6, %v7940_v58  ;;  %v6196_v11 = vadd.f32 %v6195_v9, %v6194_v7  ;;  %6329 = vmatprep.mubr.bf16.mxu1 %v2264_v8 }
 0x2d0   : > { %v2197_v12 = vadd.f32 %v6196_v11, %v7940_v58  ;;  %v2250_v13 = vmax.f32 %v2194_v10, 0.0 }
 0x2d2   : > { %v2251_v14 = vmax.f32 %v2197_v12, 0.0  ;;  %v6197_v15 = vpop.f32.mrb[8].mxu1 }
 0x2d3   : > { %v6198_v16 = vpop.f32.mrb[9].mxu1 }
 0x2d4   : > { %v2265_v18 = vpack.c.bf16 %v2251_v14, %v2250_v13  ;;  %v6199_v19 = vadd.f32 %v6198_v16, %v6197_v15  ;;  %v6200_v20 = vpop.f32.mrb[10].mxu1 }
 0x2d5   : > { %v6201_v22 = vpop.f32.mrb[11].mxu1 }
 0x2d6   : > { %v2202_v23 = vadd.f32 %v6199_v19, %v7940_v58  ;;  %v6202_v24 = vadd.f32 %v6201_v22, %v6200_v20  ;;  %6330 = vmatmul.mubr.bf16.vlgmr.msra.gmra.mrb[32].mxu1 %v2265_v18 }
 0x2d7   : > { %2679 = vmatpush1.bf16.msra.mxu1 %v6805_v17 }
 0x2d8   : > { %v2205_v26 = vadd.f32 %v6202_v24, %v7940_v58  ;;  %2680 = vmatprep.subr.bf16.mxu1 %v6810_v21  ;;  %v2252_v28 = vmax.f32 %v2202_v23, 0.0 }
 0x2da   : > { %v2253_v29 = vmax.f32 %v2205_v26, 0.0  ;;  %v6203_v30 = vpop.f32.mrb[12].mxu1 }
 0x2db   : > { %v6204_v31 = vpop.f32.mrb[13].mxu1  ;;  %2681 = vmatpush1.bf16.msra.mxu1 %v6808_v25 }
 0x2dc   : > { %v6205_v33 = vadd.f32 %v6204_v31, %v6203_v30  ;;  %v6206_v34 = vpop.f32.mrb[14].mxu1  ;;  %v2266_v35 = vpack.c.bf16 %v2253_v29, %v2252_v28  ;;  %2682 = vmatprep.subr.bf16.mxu1 %v6813_v27 }
 0x2dd   : > { %v6207_v37 = vpop.f32.mrb[15].mxu1 }
 0x2de   : > { %v2210_v38 = vadd.f32 %v6205_v33, %v7940_v58  ;;  %v6208_v39 = vadd.f32 %v6207_v37, %v6206_v34  ;;  %6333 = vmatprep.mubr.bf16.mxu1 %v2266_v35  ;;  %v6825_v35 = vld [vmem:[%s9517_s8 + $0xc4] ss:$16 sps:$4 sm:$0xff]   ;;  %v6826_v37 = vld [vmem:[%s9517_s8 + $0xe0] ss:$16 sps:$4 sm:$0xff]  }
 0x2df   : > { %2683 = vmatpush1.bf16.msra.mxu1 %v6811_v32 }
 0x2e0   : > { %v2213_v41 = vadd.f32 %v6208_v39, %v7940_v58  ;;  %2684 = vmatprep.subr.bf16.mxu1 %v6816_v36  ;;  %v2254_v43 = vmax.f32 %v2210_v38, 0.0  ;;  %v6823_v36 = vld [vmem:[%s9517_s8 + $0xc0] ss:$16 sps:$4 sm:$0xff]   ;;  %v6831_v38 = vld [vmem:[%s9517_s8 + $0xc] ss:$16 sps:$4 sm:$0xff]  }
 0x2e1   : > { %v6853_v39 = vld [vmem:[%s9523_s14] ss:$16 sps:$4 sm:$0xff]  }
 0x2e2   : > { %v2255_v44 = vmax.f32 %v2213_v41, 0.0  ;;  %v6209_v48 = vpop.f32.mrb[16].mxu1  ;;  %v6858_v41 = vld [vmem:[%s9523_s14 + $0x24] ss:$16 sps:$4 sm:$0xff]  }
 0x2e3   : > { %v6210_v52 = vpop.f32.mrb[17].mxu1  ;;  %2685 = vmatpush1.bf16.msra.mxu1 %v6814_v40  ;;  %v6855_v40 = vld [vmem:[%s9523_s14 + $0x4] ss:$16 sps:$4 sm:$0xff]  }
 0x2e4   : > { %v6211_v54 = vadd.f32 %v6210_v52, %v6209_v48  ;;  %v6212_v55 = vpop.f32.mrb[18].mxu1  ;;  %v2267_v50 = vpack.c.bf16 %v2255_v44, %v2254_v43  ;;  %2686 = vmatprep.subr.bf16.mxu1 %v6819_v42  ;;  %4223 = vmatprep.subr.bf16.mxu0 %v6855_v40  ;;  %v6856_v42 = vld [vmem:[%s9523_s14 + $0x20] ss:$16 sps:$4 sm:$0xff]   ;;  %v6861_v43 = vld [vmem:[%s9523_s14 + $0x44] ss:$16 sps:$4 sm:$0xff]  }
 0x2e5   : > { %v6213_v56 = vpop.f32.mrb[19].mxu1  ;;  %4224 = vmatpush1.bf16.msra.mxu0 %v6853_v39  ;;  %v6859_v44 = vld [vmem:[%s9523_s14 + $0x40] ss:$16 sps:$4 sm:$0xff]   ;;  %v6864_v48 = vld [vmem:[%s9523_s14 + $0x64] ss:$16 sps:$4 sm:$0xff]  }
 0x2e6   : > { %v2218_v59 = vadd.f32 %v6211_v54, %v7940_v58  ;;  %v6214_v60 = vadd.f32 %v6213_v56, %v6212_v55  ;;  %6334 = vmatmul.mubr.bf16.gmra.mrb[36].mxu1 %v2267_v50  ;;  %4225 = vmatprep.subr.bf16.mxu0 %v6858_v41  ;;  %v6862_v52 = vld [vmem:[%s9523_s14 + $0x60] ss:$16 sps:$4 sm:$0xff]   ;;  %v6870_v55 = vld [vmem:[%s9523_s14 + $0xa4] ss:$16 sps:$4 sm:$0xff]   ;;  %v6834_v39 = vld [vmem:[%s9517_s8 + $0x2c] ss:$16 sps:$4 sm:$0xff]  }
 0x2e7   : > { %2687 = vmatpush1.bf16.msra.mxu1 %v6817_v53  ;;  %v6867_v53 = vld [vmem:[%s9523_s14 + $0x84] ss:$16 sps:$4 sm:$0xff]   ;;  %v6865_v54 = vld [vmem:[%s9523_s14 + $0x80] ss:$16 sps:$4 sm:$0xff]   ;;  %v6904_v41 = vld [vmem:[%s9523_s14 + $0x28] ss:$16 sps:$4 sm:$0xff]  }
 0x2e8   : > { %v2221_v62 = vadd.f32 %v6214_v60, %v7940_v58  ;;  %2688 = vmatprep.subr.bf16.mxu1 %v6822_v51  ;;  %v2256_v63 = vmax.f32 %v2218_v59, 0.0  ;;  %v6868_v50 = vld [vmem:[%s9523_s14 + $0xa0] ss:$16 sps:$4 sm:$0xff]   ;;  %v6873_v51 = vld [vmem:[%s9523_s14 + $0xc4] ss:$16 sps:$4 sm:$0xff]  }
 0x2e9   : > { %4226 = vmatpush1.bf16.msra.mxu0 %v6856_v42  ;;  %v6871_v56 = vld [vmem:[%s9523_s14 + $0xc0] ss:$16 sps:$4 sm:$0xff]   ;;  %v6876_v59 = vld [vmem:[%s9523_s14 + $0xe4] ss:$16 sps:$4 sm:$0xff]  }
 0x2ea   : > { %v2257_v0 = vmax.f32 %v2221_v62, 0.0  ;;  %v6215_v1 = vpop.f32.mrb[20].mxu1  ;;  %4227 = vmatprep.subr.bf16.mxu0 %v6861_v43  ;;  %v6874_v60 = vld [vmem:[%s9523_s14 + $0xe0] ss:$16 sps:$4 sm:$0xff]  }
 0x2eb   : > { %v6216_v2 = vpop.f32.mrb[21].mxu1  ;;  %2689 = vmatpush1.bf16.msra.mxu1 %v6820_v61  ;;  %v6879_v61 = vld [vmem:[%s9523_s14 + $0x104] ss:$16 sps:$4 sm:$0xff]   ;;  %v6877_v62 = vld [vmem:[%s9523_s14 + $0x100] ss:$16 sps:$4 sm:$0xff]  }
 0x2ec   : > { %v6217_v3 = vadd.f32 %v6216_v2, %v6215_v1  ;;  %v6218_v4 = vpop.f32.mrb[22].mxu1  ;;  %v2268_v5 = vpack.c.bf16 %v2257_v0, %v2256_v63  ;;  %2690 = vmatprep.subr.bf16.mxu1 %v6825_v35  ;;  %v6882_v63 = vld [vmem:[%s9523_s14 + $0x124] ss:$16 sps:$4 sm:$0xff]   ;;  %v6880_v0 = vld [vmem:[%s9523_s14 + $0x120] ss:$16 sps:$4 sm:$0xff]  }
 0x2ed   : > { %v6219_v6 = vpop.f32.mrb[23].mxu1  ;;  %4228 = vmatpush1.bf16.msra.mxu0 %v6859_v44  ;;  %v6885_v1 = vld [vmem:[%s9523_s14 + $0x144] ss:$16 sps:$4 sm:$0xff]   ;;  %v6883_v2 = vld [vmem:[%s9523_s14 + $0x140] ss:$16 sps:$4 sm:$0xff]  }
 0x2ee   : > { %v2226_v7 = vadd.f32 %v6217_v3, %v7940_v58  ;;  %v6220_v8 = vadd.f32 %v6219_v6, %v6218_v4  ;;  %6337 = vmatprep.mubr.bf16.mxu1 %v2268_v5  ;;  %4229 = vmatprep.subr.bf16.mxu0 %v6864_v48  ;;  %v6888_v3 = vld [vmem:[%s9523_s14 + $0x164] ss:$16 sps:$4 sm:$0xff]   ;;  %v6886_v4 = vld [vmem:[%s9523_s14 + $0x160] ss:$16 sps:$4 sm:$0xff]   ;;  %v6909_v44 = vld [vmem:[%s9523_s14 + $0x4c] ss:$16 sps:$4 sm:$0xff]  }
 0x2ef   : > { %2691 = vmatpush1.bf16.msra.mxu1 %v6823_v36  ;;  %v6891_v5 = vld [vmem:[%s9523_s14 + $0x184] ss:$16 sps:$4 sm:$0xff]   ;;  %v6889_v6 = vld [vmem:[%s9523_s14 + $0x180] ss:$16 sps:$4 sm:$0xff]   ;;  %v3778_v48 = vld [vmem:[%s8114_s29 + $0x48] sm:$0xff] }
 0x2f0   : > { %v2229_v9 = vadd.f32 %v6220_v8, %v7940_v58  ;;  %v2258_v10 = vmax.f32 %v2226_v7, 0.0  ;;  %v6894_v7 = vld [vmem:[%s9523_s14 + $0x1a4] ss:$16 sps:$4 sm:$0xff]   ;;  %v6892_v8 = vld [vmem:[%s9523_s14 + $0x1a0] ss:$16 sps:$4 sm:$0xff]  }
 0x2f1   : > { %4230 = vmatpush1.bf16.msra.mxu0 %v6862_v52  ;;  %v3773_v42 = vld [vmem:[%s8114_s29 + $0x20] sm:$0xff]  ;;  %v3775_v43 = vld [vmem:[%s8114_s29 + $0x30] sm:$0xff]  ;;  %v3780_v52 = vld [vmem:[%s8114_s29 + $0x58] sm:$0xff] }
 0x2f2   : > { %v2259_v11 = vmax.f32 %v2229_v9, 0.0  ;;  %v6221_v12 = vpop.f32.mrb[24].mxu1  ;;  %4231 = vmatprep.subr.bf16.mxu0 %v6867_v53  ;;  %v6897_v9 = vld [vmem:[%s9523_s14 + $0x1c4] ss:$16 sps:$4 sm:$0xff]   ;;  %v6832_v53 = vld [vmem:[%s9517_s8 + $0x28] ss:$16 sps:$4 sm:$0xff]  }
 0x2f3   : > { %v6222_v13 = vpop.f32.mrb[25].mxu1 }
 0x2f4   : > { %v6223_v14 = vadd.f32 %v6222_v13, %v6221_v12  ;;  %v6224_v15 = vpop.f32.mrb[26].mxu1  ;;  %v2269_v16 = vpack.c.bf16 %v2259_v11, %v2258_v10  ;;  %v6895_v10 = vld [vmem:[%s9523_s14 + $0x1c0] ss:$16 sps:$4 sm:$0xff]  }
 0x2f5   : > { %v6225_v17 = vpop.f32.mrb[27].mxu1  ;;  %4232 = vmatpush1.bf16.msra.mxu0 %v6865_v54  ;;  %v8100_v11 = vld [vmem:[%s9516_s7] ss:$0 sm:$0xff]  ;;  %v8167_v54 = vpack.c.bf16 %v3775_v43, %v3773_v42  ;;  %v6847_v42 = vld [vmem:[%s9517_s8 + $0xc8] ss:$16 sps:$4 sm:$0xff]  }
 0x2f6   : > { %v2234_v18 = vadd.f32 %v6223_v14, %v7940_v58  ;;  %v6226_v19 = vadd.f32 %v6225_v17, %v6224_v15  ;;  %6338 = vmatmul.mubr.bf16.gmra.mrb[40].mxu1 %v2269_v16  ;;  %4233 = vmatprep.subr.bf16.mxu0 %v6870_v55  ;;  %v6900_v15 = vld [vmem:[%s9523_s14 + $0x1e4] ss:$16 sps:$4 sm:$0xff]   ;;  %v6837_v55 = vld [vmem:[%s9517_s8 + $0x4c] ss:$16 sps:$4 sm:$0xff]  }
 0x2f7   : > { %v6852_v43 = vld [vmem:[%s9517_s8 + $0xec] ss:$16 sps:$4 sm:$0xff]  }
 0x2f8   : > { %v2237_v20 = vadd.f32 %v6226_v19, %v7940_v58  ;;  %v2260_v21 = vmax.f32 %v2234_v18, 0.0  ;;  %v6898_v18 = vld [vmem:[%s9523_s14 + $0x1e0] ss:$16 sps:$4 sm:$0xff]  }
 0x2f9   : > { %4234 = vmatpush1.bf16.msra.mxu0 %v6868_v50  ;;  %v6907_v50 = vld [vmem:[%s9523_s14 + $0x48] ss:$16 sps:$4 sm:$0xff]  }
 0x2fa   : > { %v2261_v22 = vmax.f32 %v2237_v20, 0.0  ;;  %v6227_v23 = vpop.f32.mrb[28].mxu1  ;;  %4235 = vmatprep.subr.bf16.mxu0 %v6873_v51  ;;  %v6912_v51 = vld [vmem:[%s9523_s14 + $0x6c] ss:$16 sps:$4 sm:$0xff]  }
 0x2fb   : > { %v6228_v24 = vpop.f32.mrb[29].mxu1 }
 0x2fc   : > { %v6229_v25 = vadd.f32 %v6228_v24, %v6227_v23  ;;  %v6230_v26 = vpop.f32.mrb[30].mxu1  ;;  %v2270_v27 = vpack.c.bf16 %v2261_v22, %v2260_v21  ;;  %v3770_v21 = vld [vmem:[%s8114_s29 + $0x8] sm:$0xff]  ;;  %v3772_v22 = vld [vmem:[%s8114_s29 + $0x18] sm:$0xff]  ;;  %v3769_v23 = vld [vmem:[%s8114_s29] sm:$0xff] }
 0x2fd   : > { %v6231_v28 = vpop.f32.mrb[31].mxu1  ;;  %4236 = vmatpush1.bf16.msra.mxu0 %v6871_v56  ;;  %v8178_v56 = vpack.c.bf16 %v3780_v52, %v3778_v48  ;;  %v6922_v48 = vld [vmem:[%s9523_s14 + $0xe8] ss:$16 sps:$4 sm:$0xff]   ;;  %v3785_v52 = vld [vmem:[%s8114_s29 + $0x80] sm:$0xff] }
 0x2fe   : > { %v2242_v29 = vadd.f32 %v6229_v25, %v7940_v58  ;;  %v6232_v30 = vadd.f32 %v6231_v28, %v6230_v26  ;;  %6341 = vmatprep.mubr.bf16.mxu1 %v2270_v27  ;;  %4237 = vmatprep.subr.bf16.mxu0 %v6876_v59  ;;  %v8121_v25 = vpack.c.bf16 %v3772_v22, %v3770_v21  ;;  %v3771_v26 = vld [vmem:[%s8114_s29 + $0x10] sm:$0xff]  ;;  %v6901_v27 = vld [vmem:[%s9523_s14 + $0x8] ss:$16 sps:$4 sm:$0xff]   ;;  %v6903_v28 = vld [vmem:[%s9523_s14 + $0xc] ss:$16 sps:$4 sm:$0xff]  }
 0x2ff   : > { %v6835_v59 = vld [vmem:[%s9517_s8 + $0x48] ss:$16 sps:$4 sm:$0xff]  }
 0x300   : > { %v2245_v31 = vadd.f32 %v6232_v30, %v7940_v58  ;;  %v2262_v32 = vmax.f32 %v2242_v29, 0.0  ;;  %v6828_v58 = vld [vmem:[%s9517_s8 + $0xe4] ss:$16 sps:$4 sm:$0xff]   ;;  %4255 = vmatprep.mubr.bf16.mxu0 %v8121_v25 }
 0x301   : > { %2692 = vmatprep.subr.bf16.mxu1 %v6828_v58  ;;  %4238 = vmatpush1.bf16.msra.mxu0 %v6874_v60  ;;  %v6840_v60 = vld [vmem:[%s9517_s8 + $0x6c] ss:$16 sps:$4 sm:$0xff]  }
 0x302   : > { %v2263_v33 = vmax.f32 %v2245_v31, 0.0  ;;  %2693 = vmatpush1.bf16.msra.mxu1 %v6826_v37  ;;  %4239 = vmatprep.subr.bf16.mxu0 %v6879_v61  ;;  %v8130_v31 = vpack.c.bf16 %v3771_v26, %v3769_v23  ;;  %v6841_v23 = vld [vmem:[%s9517_s8 + $0x88] ss:$16 sps:$4 sm:$0xff]  }
 0x303   : > { %2791 = vmatprep.subr.bf16.mxu1 %v6831_v38  ;;  %v6829_v38 = vld [vmem:[%s9517_s8 + $0x8] ss:$16 sps:$4 sm:$0xff]  }
 0x304   : > { %v2271_v34 = vpack.c.bf16 %v2263_v33, %v2262_v32  ;;  %v6906_v32 = vld [vmem:[%s9523_s14 + $0x2c] ss:$16 sps:$4 sm:$0xff]  }
 0x305   : > { %4240 = vmatpush1.bf16.msra.mxu0 %v6877_v62  ;;  %v3774_v33 = vld [vmem:[%s8114_s29 + $0x28] sm:$0xff] }
 0x306   : > { %6342 = vmatmul.mubr.bf16.gmra.mrb[44].mxu1 %v2271_v34  ;;  %4241 = vmatprep.subr.bf16.mxu0 %v6882_v63  ;;  %v3776_v34 = vld [vmem:[%s8114_s29 + $0x38] sm:$0xff]  ;;  %v3777_v63 = vld [vmem:[%s8114_s29 + $0x40] sm:$0xff] }
 0x307   : > { %2710 = vmatprep.mubr.bf16.mxu1 %v7229_v57  ;;  %v8138_v58 = vpack.c.bf16 %v3776_v34, %v3774_v33  ;;  %v6910_v62 = vld [vmem:[%s9523_s14 + $0x68] ss:$16 sps:$4 sm:$0xff]  }
 0x308   : > { %v3788_v33 = vld [vmem:[%s8114_s29 + $0x98] sm:$0xff] }
 0x309   : > { %4242 = vmatpush1.bf16.msra.mxu0 %v6880_v0  ;;  %v3779_v0 = vld [vmem:[%s8114_s29 + $0x50] sm:$0xff]  ;;  %v6844_v34 = vld [vmem:[%s9517_s8 + $0xa8] ss:$16 sps:$4 sm:$0xff]  }
 0x30a   : > { %4243 = vmatprep.subr.bf16.mxu0 %v6885_v1 }
 0x30d   : > { %4244 = vmatpush1.bf16.msra.mxu0 %v6883_v2 }
 0x30e   : > { %4245 = vmatprep.subr.bf16.mxu0 %v6888_v3  ;;  %v6915_v3 = vld [vmem:[%s9523_s14 + $0x8c] ss:$16 sps:$4 sm:$0xff]  }
 0x311   : > { %4246 = vmatpush1.bf16.msra.mxu0 %v6886_v4 }
 0x312   : > { %4247 = vmatprep.subr.bf16.mxu0 %v6891_v5 }
 0x315   : > { %4248 = vmatpush1.bf16.msra.mxu0 %v6889_v6  ;;  %v3782_v6 = vld [vmem:[%s8114_s29 + $0x68] sm:$0xff] }
 0x316   : > { %4249 = vmatprep.subr.bf16.mxu0 %v6894_v7  ;;  %v3784_v7 = vld [vmem:[%s8114_s29 + $0x78] sm:$0xff] }
 0x319   : > { %4250 = vmatpush1.bf16.msra.mxu0 %v6892_v8 }
 0x31a   : > { %4251 = vmatprep.subr.bf16.mxu0 %v6897_v9 }
 0x31d   : > { %4252 = vmatpush1.bf16.msra.mxu0 %v6895_v10  ;;  %v6838_v10 = vld [vmem:[%s9517_s8 + $0x68] ss:$16 sps:$4 sm:$0xff]  }
 0x31e   : > { %4253 = vmatprep.subr.bf16.mxu0 %v6900_v15  ;;  %v6913_v15 = vld [vmem:[%s9523_s14 + $0x88] ss:$16 sps:$4 sm:$0xff]  }
 0x321   : > { %4254 = vmatpush1.bf16.msra.mxu0 %v6898_v18  ;;  %v6918_v18 = vld [vmem:[%s9523_s14 + $0xac] ss:$16 sps:$4 sm:$0xff]  }
 0x322   : > { %4336 = vmatprep.subr.bf16.mxu0 %v6903_v28  ;;  %v3781_v28 = vld [vmem:[%s8114_s29 + $0x60] sm:$0xff] }
 0x324   : > { %4256 = vmatmul.mubr.bf16.vlgmr.msra.gmra.mrb[32].mxu0 %v8130_v31 }
 0x325   : > { %4337 = vmatpush1.bf16.msra.mxu0 %v6901_v27  ;;  %4265 = vmatprep.mubr.bf16.mxu0 %v8138_v58  ;;  %v6916_v27 = vld [vmem:[%s9523_s14 + $0xa8] ss:$16 sps:$4 sm:$0xff]  }
 0x326   : > { %4338 = vmatprep.subr.bf16.mxu0 %v6906_v32  ;;  %v3786_v32 = vld [vmem:[%s8114_s29 + $0x88] sm:$0xff] }
 0x329   : > { %4339 = vmatpush1.bf16.msra.mxu0 %v6904_v41  ;;  %v8258_v41 = vpack.c.bf16 %v3788_v33, %v3786_v32  ;;  %v6946_v32 = vld [vmem:[%s9523_s14 + $0x168] ss:$16 sps:$4 sm:$0xff]   ;;  %v3793_v33 = vld [vmem:[%s8114_s29 + $0xc0] sm:$0xff] }
 0x32a   : > { %4340 = vmatprep.subr.bf16.mxu0 %v6909_v44 }
 0x32c   : > { %4266 = vmatmul.mubr.bf16.gmra.mrb[36].mxu0 %v8167_v54 }
 0x32d   : > { %4341 = vmatpush1.bf16.msra.mxu0 %v6907_v50  ;;  %4275 = vmatprep.mubr.bf16.mxu0 %v8178_v56 }
 0x32e   : > { %4342 = vmatprep.subr.bf16.mxu0 %v6912_v51  ;;  %v6930_v51 = vld [vmem:[%s9523_s14 + $0x10c] ss:$16 sps:$4 sm:$0xff]  }
 0x331   : > { %4343 = vmatpush1.bf16.msra.mxu0 %v6910_v62  ;;  %v3792_v62 = vld [vmem:[%s8114_s29 + $0xb8] sm:$0xff] }
 0x332   : > { %4344 = vmatprep.subr.bf16.mxu0 %v6915_v3 }
 0x335   : > { %4345 = vmatpush1.bf16.msra.mxu0 %v6913_v15 }
 0x336   : > { %4346 = vmatprep.subr.bf16.mxu0 %v6918_v18  ;;  %v3791_v18 = vld [vmem:[%s8114_s29 + $0xb0] sm:$0xff] }
 0x339   : > { %4347 = vmatpush1.bf16.msra.mxu0 %v6916_v27  ;;  %v6940_v27 = vld [vmem:[%s9523_s14 + $0x148] ss:$16 sps:$4 sm:$0xff]  }
 0x3a9   : > { %v6331_v12 = vpop.f32.mrb[32].mxu1 }
 0x3aa   : > { %v2386_v13 = vadd.f32 %v6331_v12, %v8100_v11  ;;  %v2377_v14 = vpop.f32.mrb[33].mxu1  ;;  %v8206_v12 = vpack.c.bf16 %v3779_v0, %v3777_v63 }
 0x3ab   : > { %v2378_v16 = vadd.f32 %v8100_v11, %v2377_v14  ;;  %v6332_v17 = vpop.f32.mrb[34].mxu1  ;;  %v6843_v14 = vld [vmem:[%s9517_s8 + $0x8c] ss:$16 sps:$4 sm:$0xff]  }
 0x3ac   : > { %v2389_v19 = vadd.f32 %v6332_v17, %v8100_v11  ;;  %v2380_v20 = vpop.f32.mrb[35].mxu1  ;;  %v2442_v29 = vmax.f32 %v2386_v13, 0.0  ;;  %4276 = vmatmul.mubr.bf16.gmra.mrb[40].mxu0 %v8206_v12 }
 0x3ad   : > { %v2381_v24 = vadd.f32 %v8100_v11, %v2380_v20  ;;  %v2440_v35 = vmax.f32 %v2378_v16, 0.0 }
 0x3ae   : > { %v2443_v30 = vmax.f32 %v2389_v19, 0.0  ;;  %v8218_v19 = vpack.c.bf16 %v3784_v7, %v3782_v6 }
 0x3af   : > { %v2441_v36 = vmax.f32 %v2381_v24, 0.0  ;;  %v6846_v24 = vld [vmem:[%s9517_s8 + $0xac] ss:$16 sps:$4 sm:$0xff]  }
 0x3b0   : > { %v8140_v37 = vpack.c.bf16 %v2443_v30, %v2442_v29  ;;  %v3783_v29 = vld [vmem:[%s8114_s29 + $0x70] sm:$0xff]  ;;  %4285 = vmatprep.mubr.bf16.mxu0 %v8218_v19  ;;  %v6921_v30 = vld [vmem:[%s9523_s14 + $0xcc] ss:$16 sps:$4 sm:$0xff]  }
 0x3b1   : > { %v8149_v40 = vpack.c.bf16 %v2441_v36, %v2440_v35  ;;  %v8247_v35 = vpack.c.bf16 %v3783_v29, %v3781_v28  ;;  %v6849_v36 = vld [vmem:[%s9517_s8 + $0xcc] ss:$16 sps:$4 sm:$0xff]   ;;  %4348 = vmatprep.subr.bf16.mxu0 %v6921_v30 }
 0x3b2   : > { %v6948_v29 = vld [vmem:[%s9523_s14 + $0x16c] ss:$16 sps:$4 sm:$0xff]  }
 0x3b3   : > { %2711 = vmatmul.mubr.bf16.vlgmr.msra.gmra.mrb[48].mxu1 %v8149_v40 }
 0x3b4   : > { %2792 = vmatpush1.bf16.msra.mxu1 %v6829_v38  ;;  %2720 = vmatprep.mubr.bf16.mxu1 %v7229_v57  ;;  %v6919_v38 = vld [vmem:[%s9523_s14 + $0xc8] ss:$16 sps:$4 sm:$0xff]  }
 0x3b5   : > { %2793 = vmatprep.subr.bf16.mxu1 %v6834_v39  ;;  %v6924_v39 = vld [vmem:[%s9523_s14 + $0xec] ss:$16 sps:$4 sm:$0xff]   ;;  %4286 = vmatmul.mubr.bf16.gmra.mrb[44].mxu0 %v8247_v35 }
 0x3b6   : > { %4349 = vmatpush1.bf16.msra.mxu0 %v6919_v38  ;;  %4295 = vmatprep.mubr.bf16.mxu0 %v8258_v41 }
 0x3b7   : > { %4350 = vmatprep.subr.bf16.mxu0 %v6924_v39  ;;  %v6954_v39 = vld [vmem:[%s9523_s14 + $0x18c] ss:$16 sps:$4 sm:$0xff]  }
 0x3b8   : > { %2794 = vmatpush1.bf16.msra.mxu1 %v6832_v53  ;;  %v3787_v53 = vld [vmem:[%s8114_s29 + $0x90] sm:$0xff] }
 0x3b9   : > { %v6335_v61 = vpop.f32.mrb[36].mxu1  ;;  %2795 = vmatprep.subr.bf16.mxu1 %v6837_v55 }
 0x3ba   : > { %v2402_v1 = vadd.f32 %v6335_v61, %v8100_v11  ;;  %v2393_v2 = vpop.f32.mrb[37].mxu1  ;;  %v3790_v61 = vld [vmem:[%s8114_s29 + $0xa8] sm:$0xff]  ;;  %4351 = vmatpush1.bf16.msra.mxu0 %v6922_v48 }
 0x3bb   : > { %v2394_v4 = vadd.f32 %v8100_v11, %v2393_v2  ;;  %v6336_v5 = vpop.f32.mrb[38].mxu1  ;;  %2721 = vmatmul.mubr.bf16.gmra.mrb[52].mxu1 %v8140_v37  ;;  %v8286_v2 = vpack.c.bf16 %v3787_v53, %v3785_v52  ;;  %4352 = vmatprep.subr.bf16.mxu0 %v6930_v51  ;;  %v6952_v51 = vld [vmem:[%s9523_s14 + $0x188] ss:$16 sps:$4 sm:$0xff]  }
 0x3bc   : > { %v2405_v8 = vadd.f32 %v6336_v5, %v8100_v11  ;;  %v2396_v9 = vpop.f32.mrb[39].mxu1  ;;  %2730 = vmatprep.mubr.bf16.mxu1 %v7229_v57  ;;  %2796 = vmatpush1.bf16.msra.mxu1 %v6835_v59  ;;  %v2446_v16 = vmax.f32 %v2402_v1, 0.0  ;;  %v6850_v1 = vld [vmem:[%s9517_s8 + $0xe8] ss:$16 sps:$4 sm:$0xff]  }
 0x3bd   : > { %v2397_v13 = vadd.f32 %v8100_v11, %v2396_v9  ;;  %2797 = vmatprep.subr.bf16.mxu1 %v6840_v60  ;;  %v2444_v20 = vmax.f32 %v2394_v4, 0.0  ;;  %v6927_v4 = vld [vmem:[%s9519_s10 + $0x4] ss:$8 sps:$4 sm:$0xff]   ;;  %v6928_v5 = vld [vmem:[%s9523_s14 + $0x108] ss:$16 sps:$4 sm:$0xff]   ;;  %v8298_v9 = vpack.c.bf16 %v3792_v62, %v3790_v61  ;;  %4296 = vmatmul.mubr.bf16.gmra.mrb[48].mxu0 %v8286_v2 }
 0x3be   : > { %v2447_v17 = vmax.f32 %v2405_v8, 0.0  ;;  %v6936_v8 = vld [vmem:[%s9523_s14 + $0x12c] ss:$16 sps:$4 sm:$0xff]   ;;  %4353 = vmatpush1.bf16.msra.mxu0 %v6928_v5  ;;  %v3799_v5 = vld [vmem:[%s8114_s29 + $0xf0] sm:$0xff] }
 0x3bf   : > { %v2445_v21 = vmax.f32 %v2397_v13, 0.0  ;;  %4354 = vmatprep.subr.bf16.mxu0 %v6936_v8  ;;  %4305 = vmatprep.mubr.bf16.mxu0 %v8298_v9  ;;  %v6960_v62 = vld [vmem:[%s9523_s14 + $0x1ac] ss:$16 sps:$4 sm:$0xff]   ;;  %v6964_v8 = vld [vmem:[%s9523_s14 + $0x1c8] ss:$16 sps:$4 sm:$0xff]  }
 0x3c0   : > { %v8220_v22 = vpack.c.bf16 %v2447_v17, %v2446_v16  ;;  %2798 = vmatpush1.bf16.msra.mxu1 %v6838_v10  ;;  %v6934_v16 = vld [vmem:[%s9523_s14 + $0x128] ss:$16 sps:$4 sm:$0xff]   ;;  %v3789_v17 = vld [vmem:[%s8114_s29 + $0xa0] sm:$0xff] }
 0x3c1   : > { %v8229_v26 = vpack.c.bf16 %v2445_v21, %v2444_v20  ;;  %2799 = vmatprep.subr.bf16.mxu1 %v6843_v14  ;;  %v6942_v20 = vld [vmem:[%s9523_s14 + $0x14c] ss:$16 sps:$4 sm:$0xff]  }
 0x3c2   : > { %v3794_v21 = vld [vmem:[%s8114_s29 + $0xc8] sm:$0xff]  ;;  %4355 = vmatpush1.bf16.msra.mxu0 %v6934_v16 }
 0x3c3   : > { %2731 = vmatmul.mubr.bf16.gmra.mrb[56].mxu1 %v8229_v26  ;;  %4356 = vmatprep.subr.bf16.mxu0 %v6942_v20  ;;  %v6925_v16 = vld [vmem:[%s9519_s10] ss:$8 sps:$4 sm:$0xff]  }
 0x3c4   : > { %2740 = vmatprep.mubr.bf16.mxu1 %v7229_v57  ;;  %2800 = vmatpush1.bf16.msra.mxu1 %v6841_v23  ;;  %v3796_v23 = vld [vmem:[%s8114_s29 + $0xd8] sm:$0xff]  ;;  %v6949_v20 = vld [vmem:[%s9519_s10 + $0x40] ss:$8 sps:$4 sm:$0xff]  }
 0x3c5   : > { %2801 = vmatprep.subr.bf16.mxu1 %v6846_v24  ;;  %v8318_v24 = vpack.c.bf16 %v3791_v18, %v3789_v17  ;;  %v8323_v28 = vpack.c.bf16 %v3796_v23, %v3794_v21  ;;  %v6933_v17 = vld [vmem:[%s9519_s10 + $0x14] ss:$8 sps:$4 sm:$0xff]   ;;  %v6937_v18 = vld [vmem:[%s9519_s10 + $0x20] ss:$8 sps:$4 sm:$0xff]  }
 0x3c6   : > { %4357 = vmatpush1.bf16.msra.mxu0 %v6940_v27  ;;  %v6961_v21 = vld [vmem:[%s9519_s10 + $0x60] ss:$8 sps:$4 sm:$0xff]  }
 0x3c7   : > { %4306 = vmatmul.mubr.bf16.gmra.mrb[52].mxu0 %v8318_v24  ;;  %4358 = vmatprep.subr.bf16.mxu0 %v6948_v29  ;;  %v6973_v23 = vld [vmem:[%s9519_s10 + $0x80] ss:$8 sps:$4 sm:$0xff]  }
 0x3c8   : > { %2802 = vmatpush1.bf16.msra.mxu1 %v6844_v34  ;;  %4315 = vmatprep.mubr.bf16.mxu0 %v8323_v28  ;;  %v3795_v34 = vld [vmem:[%s8114_s29 + $0xd0] sm:$0xff]  ;;  %v6979_v27 = vld [vmem:[%s9519_s10 + $0xa0] ss:$8 sps:$4 sm:$0xff]  }
 0x3c9   : > { %v6339_v44 = vpop.f32.mrb[40].mxu1  ;;  %2803 = vmatprep.subr.bf16.mxu1 %v6849_v36  ;;  %v6985_v29 = vld [vmem:[%s9519_s10 + $0xc0] ss:$8 sps:$4 sm:$0xff]  }
 0x3ca   : > { %v2418_v55 = vadd.f32 %v6339_v44, %v8100_v11  ;;  %v2409_v50 = vpop.f32.mrb[41].mxu1  ;;  %4359 = vmatpush1.bf16.msra.mxu0 %v6946_v32  ;;  %v6991_v32 = vld [vmem:[%s9519_s10 + $0xe0] ss:$8 sps:$4 sm:$0xff]  }
 0x3cb   : > { %v2410_v59 = vadd.f32 %v8100_v11, %v2409_v50  ;;  %v6340_v60 = vpop.f32.mrb[42].mxu1  ;;  %2741 = vmatmul.mubr.bf16.gmra.mrb[60].mxu1 %v8220_v22  ;;  %4360 = vmatprep.subr.bf16.mxu0 %v6954_v39 }
 0x3cc   : > { %v2421_v63 = vadd.f32 %v6340_v60, %v8100_v11  ;;  %v2412_v0 = vpop.f32.mrb[43].mxu1  ;;  %2750 = vmatprep.mubr.bf16.mxu1 %v7229_v57  ;;  %2804 = vmatpush1.bf16.msra.mxu1 %v6847_v42  ;;  %v2450_v6 = vmax.f32 %v2418_v55, 0.0  ;;  %v3798_v42 = vld [vmem:[%s8114_s29 + $0xe8] sm:$0xff]  ;;  %v8345_v55 = vpack.c.bf16 %v3795_v34, %v3793_v33  ;;  %v6994_v33 = vld [vmem:[%s9519_s10 + $0xf0] ss:$8 sps:$4 sm:$0xff]  }
 0x3cd   : > { %v2413_v3 = vadd.f32 %v8100_v11, %v2412_v0  ;;  %2805 = vmatprep.subr.bf16.mxu1 %v6852_v43  ;;  %v2448_v10 = vmax.f32 %v2410_v59, 0.0  ;;  %v3800_v43 = vld [vmem:[%s8114_s29 + $0xf8] sm:$0xff]  ;;  %v6999_v34 = vld [vmem:[%s9519_s10 + $0x104] ss:$8 sps:$4 sm:$0xff]  }
 0x3ce   : > { %v2451_v7 = vmax.f32 %v2421_v63, 0.0  ;;  %v8351_v59 = vpack.c.bf16 %v3800_v43, %v3798_v42  ;;  %4361 = vmatpush1.bf16.msra.mxu0 %v6952_v51  ;;  %v8529_v43 = vld [vmem:[%s9524_s15] sm:$0xf] }
 0x3cf   : > { %v2449_v13 = vmax.f32 %v2413_v3, 0.0  ;;  %4316 = vmatmul.mubr.bf16.gmra.mrb[56].mxu0 %v8345_v55  ;;  %v6958_v3 = vld [vmem:[%s9523_s14 + $0x1a8] ss:$16 sps:$4 sm:$0xff]   ;;  %4362 = vmatprep.subr.bf16.mxu0 %v6960_v62 }
 0x3d0   : > { %v8300_v14 = vpack.c.bf16 %v2451_v7, %v2450_v6  ;;  %2806 = vmatpush1.bf16.msra.mxu1 %v6850_v1  ;;  %4325 = vmatprep.mubr.bf16.mxu0 %v8351_v59  ;;  %v6966_v6 = vld [vmem:[%s9523_s14 + $0x1cc] ss:$16 sps:$4 sm:$0xff]  }
 0x3d1   : > { %v8303_v15 = vpack.c.bf16 %v2449_v13, %v2448_v10  ;;  %3396 = vmatprep.subr.bf16.mxu1 %v6927_v4  ;;  %v3797_v4 = vld [vmem:[%s8114_s29 + $0xe0] sm:$0xff]  ;;  %v6972_v10 = vld [vmem:[%s9523_s14 + $0x1ec] ss:$16 sps:$4 sm:$0xff]   ;;  %v6970_v13 = vld [vmem:[%s9523_s14 + $0x1e8] ss:$16 sps:$4 sm:$0xff]   ;;  %s5785_s29 = sshll.u32 %s9543_s30, 3 }
 0x3d2   : > { %v8372_v7 = vpack.c.bf16 %v3799_v5, %v3797_v4  ;;  %4363 = vmatpush1.bf16.msra.mxu0 %v6958_v3  ;;  %s9426_s13 = scalar_lea.vmem %s9529_s20, %s5785_s29 }
 0x3d3   : > { %2751 = vmatmul.mubr.bf16.gmra.mrb[64].mxu1 %v8303_v15  ;;  %4364 = vmatprep.subr.bf16.mxu0 %v6966_v6 }
 0x3d4   : > { %2760 = vmatprep.mubr.bf16.mxu1 %v7229_v57 }
 0x3d6   : > { %4365 = vmatpush1.bf16.msra.mxu0 %v6964_v8 }
 0x3d7   : > { %4326 = vmatmul.mubr.bf16.gmra.mrb[60].mxu0 %v8372_v7  ;;  %4366 = vmatprep.subr.bf16.mxu0 %v6972_v10 }
 0x3d8   : > { %4368 = vmatprep.mubr.bf16.mxu0 %v8121_v25  ;;  %v6931_v25 = vld [vmem:[%s9519_s10 + $0x10] ss:$8 sps:$4 sm:$0xff]  }
 0x3d9   : > { %v6343_v30 = vpop.f32.mrb[44].mxu1 }
 0x3da   : > { %v2434_v36 = vadd.f32 %v6343_v30, %v8100_v11  ;;  %v2425_v38 = vpop.f32.mrb[45].mxu1  ;;  %4367 = vmatpush1.bf16.msra.mxu0 %v6970_v13  ;;  %v6993_v30 = vld [vmem:[%s9519_s10 + $0xe4] ss:$8 sps:$4 sm:$0xff]  }
 0x3db   : > { %v2426_v44 = vadd.f32 %v8100_v11, %v2425_v38  ;;  %v6344_v48 = vpop.f32.mrb[46].mxu1  ;;  %2761 = vmatmul.mubr.bf16.gmra.mrb[68].mxu1 %v8300_v14 }
 0x3dc   : > { %v2437_v52 = vadd.f32 %v6344_v48, %v8100_v11  ;;  %v2428_v53 = vpop.f32.mrb[47].mxu1  ;;  %2770 = vmatprep.mubr.bf16.mxu1 %v7229_v57  ;;  %v2454_v60 = vmax.f32 %v2434_v36, 0.0  ;;  %v8516_v36 = vld [vmem:[%s9518_s9] sm:$0xf]  ;;  %v8533_v48 = vrot.slane %v8529_v43, %v7867_v47 }
 0x3dd   : > { %v2429_v50 = vadd.f32 %v8100_v11, %v2428_v53  ;;  %v2452_v63 = vmax.f32 %v2426_v44, 0.0  ;;  %v8520_v38 = vrot.slane %v8516_v36, %v7867_v47  ;;  %v8524_v42 = vrot.slane %v8516_v36, %v7873_v49 }
 0x3de   : > { %v2455_v61 = vmax.f32 %v2437_v52, 0.0  ;;  %v8537_v52 = vrot.slane %v8529_v43, %v7873_v49 }
 0x3df   : > { %v2453_v0 = vmax.f32 %v2429_v50, 0.0  ;;  %4369 = vmatmul.mubr.bf16.vlgmr.msra.gmra.mrb[64].mxu0 %v8130_v31  ;;  %v6939_v31 = vld [vmem:[%s9519_s10 + $0x24] ss:$8 sps:$4 sm:$0xff]  }
 0x3e0   : > { %v8356_v1 = vpack.c.bf16 %v2455_v61, %v2454_v60  ;;  %4378 = vmatprep.mubr.bf16.mxu0 %v8138_v58  ;;  %v6945_v58 = vld [vmem:[%s9519_s10 + $0x34] ss:$8 sps:$4 sm:$0xff]  }
 0x3e1   : > { %v8359_v11 = vpack.c.bf16 %v2453_v0, %v2452_v63 }
 0x3e3   : > { %2771 = vmatmul.mubr.bf16.gmra.mrb[72].mxu1 %v8359_v11 }
 0x3e4   : > { %2780 = vmatprep.mubr.bf16.mxu1 %v7229_v57 }
 0x3e7   : > { %4379 = vmatmul.mubr.bf16.gmra.mrb[68].mxu0 %v8167_v54  ;;  %v6951_v54 = vld [vmem:[%s9519_s10 + $0x44] ss:$8 sps:$4 sm:$0xff]  }
 0x3e8   : > { %4388 = vmatprep.mubr.bf16.mxu0 %v8178_v56  ;;  %v6955_v56 = vld [vmem:[%s9519_s10 + $0x50] ss:$8 sps:$4 sm:$0xff]  }
 0x3eb   : > { %2781 = vmatmul.mubr.bf16.gmra.mrb[76].mxu1 %v8356_v1 }
 0x3ec   : > { %2823 = vmatprep.mubr.bf16.mxu1 %v7229_v57 }
 0x3ef   : > { %4389 = vmatmul.mubr.bf16.gmra.mrb[72].mxu0 %v8206_v12  ;;  %v6963_v12 = vld [vmem:[%s9519_s10 + $0x64] ss:$8 sps:$4 sm:$0xff]  }
 0x3f0   : > { %4398 = vmatprep.mubr.bf16.mxu0 %v8218_v19  ;;  %v6969_v19 = vld [vmem:[%s9519_s10 + $0x74] ss:$8 sps:$4 sm:$0xff]  }
 0x3f3   : > { %2824 = vmatmul.mubr.bf16.vlgmr.msra.gmra.mrb[80].mxu1 %v8149_v40  ;;  %v6943_v40 = vld [vmem:[%s9519_s10 + $0x30] ss:$8 sps:$4 sm:$0xff]  }
 0x3f4   : > { %2833 = vmatprep.mubr.bf16.mxu1 %v7229_v57  ;;  %3397 = vmatpush1.bf16.msra.mxu1 %v6925_v16 }
 0x3f5   : > { %3398 = vmatprep.subr.bf16.mxu1 %v6933_v17 }
 0x3f7   : > { %4399 = vmatmul.mubr.bf16.gmra.mrb[76].mxu0 %v8247_v35  ;;  %v6975_v35 = vld [vmem:[%s9519_s10 + $0x84] ss:$8 sps:$4 sm:$0xff]   ;;  %v4257_v39 = vpop.f32.mrb[32].mxu0 }
 0x3f8   : > { %3399 = vmatpush1.bf16.msra.mxu1 %v6931_v25  ;;  %4408 = vmatprep.mubr.bf16.mxu0 %v8258_v41  ;;  %v6976_v41 = vld [vmem:[%s9519_s10 + $0x90] ss:$8 sps:$4 sm:$0xff]   ;;  %v4259_v44 = vpop.f32.mrb[33].mxu0  ;;  %v4258_v60 = vadd.f32 %v4257_v39, %v8533_v48  ;;  %v7005_v39 = vld [vmem:[%s9519_s10 + $0x124] ss:$8 sps:$4 sm:$0xff]  }
 0x3f9   : > { %3400 = vmatprep.subr.bf16.mxu1 %v6939_v31  ;;  %v4261_v53 = vpop.f32.mrb[34].mxu0  ;;  %v4260_v61 = vadd.f32 %v4259_v44, %v8537_v52 }
 0x3fa   : > { %v4263_v50 = vpop.f32.mrb[35].mxu0  ;;  %v4262_v62 = vadd.f32 %v4261_v53, %v8533_v48  ;;  %v4449_v4 = vmax.f32 %v4258_v60, 0.0 }
 0x3fb   : > { %2834 = vmatmul.mubr.bf16.gmra.mrb[84].mxu1 %v8140_v37  ;;  %v6957_v37 = vld [vmem:[%s9519_s10 + $0x54] ss:$8 sps:$4 sm:$0xff]   ;;  %v4450_v5 = vmax.f32 %v4260_v61, 0.0 }
 0x3fc   : > { %2843 = vmatprep.mubr.bf16.mxu1 %v7229_v57  ;;  %3401 = vmatpush1.bf16.msra.mxu1 %v6937_v18 }
 0x3fd   : > { %3402 = vmatprep.subr.bf16.mxu1 %v6945_v58 }
 0x3ff   : > { %4409 = vmatmul.mubr.bf16.gmra.mrb[80].mxu0 %v8286_v2  ;;  %v6981_v2 = vld [vmem:[%s9519_s10 + $0xa4] ss:$8 sps:$4 sm:$0xff]   ;;  %v4267_v17 = vpop.f32.mrb[36].mxu0 }
 0x400   : > { %3403 = vmatpush1.bf16.msra.mxu1 %v6943_v40  ;;  %4418 = vmatprep.mubr.bf16.mxu0 %v8298_v9  ;;  %v6984_v9 = vld [vmem:[%s9519_s10 + $0xb4] ss:$8 sps:$4 sm:$0xff]   ;;  %v4268_v58 = vadd.f32 %v4267_v17, %v8533_v48  ;;  %v4269_v40 = vpop.f32.mrb[37].mxu0 }
 0x401   : > { %3404 = vmatprep.subr.bf16.mxu1 %v6951_v54 }
 0x403   : > { %2844 = vmatmul.mubr.bf16.gmra.mrb[88].mxu1 %v8229_v26  ;;  %v6967_v26 = vld [vmem:[%s9519_s10 + $0x70] ss:$8 sps:$4 sm:$0xff]  }
 0x404   : > { %2853 = vmatprep.mubr.bf16.mxu1 %v7229_v57  ;;  %3405 = vmatpush1.bf16.msra.mxu1 %v6949_v20  ;;  %v4270_v20 = vadd.f32 %v4269_v40, %v8537_v52 }
 0x405   : > { %3406 = vmatprep.subr.bf16.mxu1 %v6957_v37  ;;  %v4271_v37 = vpop.f32.mrb[38].mxu0 }
 0x407   : > { %4419 = vmatmul.mubr.bf16.gmra.mrb[84].mxu0 %v8318_v24  ;;  %v6987_v24 = vld [vmem:[%s9519_s10 + $0xc4] ss:$8 sps:$4 sm:$0xff]  }
 0x408   : > { %3407 = vmatpush1.bf16.msra.mxu1 %v6955_v56  ;;  %4428 = vmatprep.mubr.bf16.mxu0 %v8323_v28  ;;  %v6988_v28 = vld [vmem:[%s9519_s10 + $0xd0] ss:$8 sps:$4 sm:$0xff]  }
 0x409   : > { %3408 = vmatprep.subr.bf16.mxu1 %v6963_v12 }
 0x40b   : > { %2854 = vmatmul.mubr.bf16.gmra.mrb[92].mxu1 %v8220_v22  ;;  %v6978_v22 = vld [vmem:[%s9519_s10 + $0x94] ss:$8 sps:$4 sm:$0xff]  }
 0x40c   : > { %2863 = vmatprep.mubr.bf16.mxu1 %v7229_v57  ;;  %3409 = vmatpush1.bf16.msra.mxu1 %v6961_v21  ;;  %v6997_v21 = vld [vmem:[%s9519_s10 + $0x100] ss:$8 sps:$4 sm:$0xff]  }
 0x40d   : > { %3410 = vmatprep.subr.bf16.mxu1 %v6969_v19  ;;  %v4457_v19 = vmax.f32 %v4268_v58, 0.0 }
 0x40f   : > { %4429 = vmatmul.mubr.bf16.gmra.mrb[88].mxu0 %v8345_v55 }
 0x410   : > { %3411 = vmatpush1.bf16.msra.mxu1 %v6967_v26  ;;  %4438 = vmatprep.mubr.bf16.mxu0 %v8351_v59  ;;  %v4272_v26 = vadd.f32 %v4271_v37, %v8533_v48 }
 0x411   : > { %3412 = vmatprep.subr.bf16.mxu1 %v6975_v35  ;;  %v4273_v35 = vpop.f32.mrb[39].mxu0 }
 0x413   : > { %2864 = vmatmul.mubr.bf16.gmra.mrb[96].mxu1 %v8303_v15  ;;  %v6982_v15 = vld [vmem:[%s9519_s10 + $0xb0] ss:$8 sps:$4 sm:$0xff]  }
 0x414   : > { %2873 = vmatprep.mubr.bf16.mxu1 %v7229_v57  ;;  %3413 = vmatpush1.bf16.msra.mxu1 %v6973_v23 }
 0x415   : > { %3414 = vmatprep.subr.bf16.mxu1 %v6978_v22 }
 0x417   : > { %4439 = vmatmul.mubr.bf16.gmra.mrb[92].mxu0 %v8372_v7  ;;  %v4453_v7 = vmax.f32 %v4262_v62, 0.0 }
 0x418   : > { %3415 = vmatpush1.bf16.msra.mxu1 %v6976_v41  ;;  %v7002_v41 = vld [vmem:[%s9519_s10 + $0x114] ss:$8 sps:$4 sm:$0xff]  }
 0x419   : > { %3416 = vmatprep.subr.bf16.mxu1 %v6981_v2  ;;  %v8547_v31 = vpack.c.bf16 %v4453_v7, %v4449_v4  ;;  %v4458_v2 = vmax.f32 %v4270_v20, 0.0  ;;  %v7008_v7 = vld [vmem:[%s9519_s10 + $0x134] ss:$8 sps:$4 sm:$0xff]   ;;  %v7006_v20 = vld [vmem:[%s9519_s10 + $0x130] ss:$8 sps:$4 sm:$0xff]  }
 0x41b   : > { %2874 = vmatmul.mubr.bf16.gmra.mrb[100].mxu1 %v8300_v14  ;;  %v6990_v14 = vld [vmem:[%s9519_s10 + $0xd4] ss:$8 sps:$4 sm:$0xff]  }
 0x41c   : > { %2883 = vmatprep.mubr.bf16.mxu1 %v7229_v57  ;;  %3417 = vmatpush1.bf16.msra.mxu1 %v6979_v27  ;;  %v4274_v27 = vadd.f32 %v4273_v35, %v8537_v52 }
 0x41d   : > { %3418 = vmatprep.subr.bf16.mxu1 %v6984_v9 }
 0x420   : > { %3419 = vmatpush1.bf16.msra.mxu1 %v6982_v15 }
 0x421   : > { %3420 = vmatprep.subr.bf16.mxu1 %v6987_v24  ;;  %v4461_v24 = vmax.f32 %v4272_v26, 0.0 }
 0x423   : > { %2884 = vmatmul.mubr.bf16.gmra.mrb[104].mxu1 %v8359_v11 }
 0x424   : > { %2893 = vmatprep.mubr.bf16.mxu1 %v7229_v57  ;;  %3421 = vmatpush1.bf16.msra.mxu1 %v6985_v29  ;;  %v6996_v57 = vld [vmem:[%s9519_s10 + $0xf4] ss:$8 sps:$4 sm:$0xff]  }
 0x425   : > { %3422 = vmatprep.subr.bf16.mxu1 %v6990_v14 }
 0x428   : > { %3423 = vmatpush1.bf16.msra.mxu1 %v6988_v28  ;;  %v4462_v28 = vmax.f32 %v4274_v27, 0.0 }
 0x429   : > { %3424 = vmatprep.subr.bf16.mxu1 %v6993_v30 }
 0x42a   : > { %v8573_v44 = vpack.c.bf16 %v4462_v28, %v4458_v2 }
 0x42b   : > { %2894 = vmatmul.mubr.bf16.gmra.mrb[108].mxu1 %v8356_v1  ;;  %v4264_v1 = vadd.f32 %v4263_v50, %v8537_v52 }
 0x42c   : > { %3425 = vmatpush1.bf16.msra.mxu1 %v6991_v32  ;;  %v7000_v32 = vld [vmem:[%s9519_s10 + $0x110] ss:$8 sps:$4 sm:$0xff]  }
 0x42d   : > { %3426 = vmatprep.subr.bf16.mxu1 %v6996_v57  ;;  %v4454_v8 = vmax.f32 %v4264_v1, 0.0  ;;  %v8568_v57 = vpack.c.bf16 %v4461_v24, %v4457_v19  ;;  %v7003_v1 = vld [vmem:[%s9519_s10 + $0x120] ss:$8 sps:$4 sm:$0xff]  }
 0x42f   : > { %v8549_v18 = vpack.c.bf16 %v4454_v8, %v4450_v5 }
 0x430   : > { %3427 = vmatpush1.bf16.msra.mxu1 %v6994_v33 }
 0x431   : > { %3509 = vmatprep.subr.bf16.mxu1 %v6999_v34 }
 0x47f   : > { %v4277_v53 = vpop.f32.mrb[40].mxu0 }
 0x486   : > { %v2712_v55 = vpop.f32.mrb[48].mxu1 }
 0x487   : > { %v2713_v51 = vadd.f32 %v2712_v55, %v8520_v38  ;;  %v2714_v59 = vpop.f32.mrb[49].mxu1 }
 0x488   : > { %v2715_v63 = vadd.f32 %v2714_v59, %v8524_v42  ;;  %v2716_v0 = vpop.f32.mrb[50].mxu1  ;;  %v4279_v59 = vpop.f32.mrb[41].mxu0 }
 0x489   : > { %v2717_v11 = vadd.f32 %v2716_v0, %v8520_v38  ;;  %v2718_v3 = vpop.f32.mrb[51].mxu1  ;;  %v2904_v10 = vmax.f32 %v2713_v51, 0.0  ;;  %v4278_v51 = vadd.f32 %v4277_v53, %v8533_v48  ;;  %v4280_v61 = vadd.f32 %v4279_v59, %v8537_v52  ;;  %v4281_v62 = vpop.f32.mrb[42].mxu0 }
 0x48a   : > { %v2719_v6 = vadd.f32 %v2718_v3, %v8524_v42  ;;  %v2905_v13 = vmax.f32 %v2715_v63, 0.0  ;;  %v4282_v3 = vadd.f32 %v4281_v62, %v8533_v48  ;;  %v4283_v4 = vpop.f32.mrb[43].mxu0 }
 0x48b   : > { %v2908_v16 = vmax.f32 %v2717_v11, 0.0  ;;  %v4465_v11 = vmax.f32 %v4278_v51, 0.0  ;;  %v4466_v8 = vmax.f32 %v4280_v61, 0.0  ;;  %v4287_v26 = vpop.f32.mrb[44].mxu0 }
 0x48c   : > { %v2909_v25 = vmax.f32 %v2719_v6, 0.0  ;;  %v4469_v17 = vmax.f32 %v4282_v3, 0.0  ;;  %v7017_v3 = vld [vmem:[%s9519_s10 + $0x164] ss:$8 sps:$4 sm:$0xff]  }
 0x48d   : > { %v2968_v54 = vpack.c.bf16 %v2908_v16, %v2904_v10  ;;  %v4284_v10 = vadd.f32 %v4283_v4, %v8537_v52 }
 0x48e   : > { %v2969_v56 = vpack.c.bf16 %v2909_v25, %v2905_v13  ;;  %v2722_v12 = vpop.f32.mrb[52].mxu1  ;;  %v8592_v37 = vpack.c.bf16 %v4469_v17, %v4465_v11 }
 0x48f   : > { %v2723_v23 = vadd.f32 %v2722_v12, %v8520_v38  ;;  %v2724_v22 = vpop.f32.mrb[53].mxu1  ;;  %v4470_v40 = vmax.f32 %v4284_v10, 0.0 }
 0x490   : > { %v2725_v9 = vadd.f32 %v2724_v22, %v8524_v42  ;;  %v2726_v15 = vpop.f32.mrb[54].mxu1  ;;  %3428 = vmatprep.mubr.bf16.mxu1 %v2969_v56  ;;  %v4288_v22 = vadd.f32 %v4287_v26, %v8533_v48  ;;  %v7020_v26 = vld [vmem:[%s9519_s10 + $0x174] ss:$8 sps:$4 sm:$0xff]  }
 0x491   : > { %v2727_v29 = vadd.f32 %v2726_v15, %v8520_v38  ;;  %v2728_v14 = vpop.f32.mrb[55].mxu1  ;;  %3429 = vmatmul.mubr.bf16.vlgmr.msra.gmra.mrb[112].mxu1 %v2968_v54  ;;  %v2912_v33 = vmax.f32 %v2723_v23, 0.0  ;;  %v8597_v19 = vpack.c.bf16 %v4470_v40, %v4466_v8  ;;  %v7015_v40 = vld [vmem:[%s9519_s10 + $0x160] ss:$8 sps:$4 sm:$0xff]  }
 0x492   : > { %v2729_v30 = vadd.f32 %v2728_v14, %v8524_v42  ;;  %3510 = vmatpush1.bf16.msra.mxu1 %v6997_v21  ;;  %v2913_v55 = vmax.f32 %v2725_v9, 0.0  ;;  %v7011_v21 = vld [vmem:[%s9519_s10 + $0x144] ss:$8 sps:$4 sm:$0xff]   ;;  %v4473_v14 = vmax.f32 %v4288_v22, 0.0 }
 0x493   : > { %v2916_v34 = vmax.f32 %v2727_v29, 0.0  ;;  %3511 = vmatprep.subr.bf16.mxu1 %v7002_v41  ;;  %v4289_v41 = vpop.f32.mrb[45].mxu0  ;;  %v7009_v29 = vld [vmem:[%s9519_s10 + $0x140] ss:$8 sps:$4 sm:$0xff]  }
 0x494   : > { %v2917_v50 = vmax.f32 %v2729_v30, 0.0  ;;  %v4290_v27 = vadd.f32 %v4289_v41, %v8537_v52  ;;  %v4291_v9 = vpop.f32.mrb[46].mxu0 }
 0x495   : > { %v2972_v60 = vpack.c.bf16 %v2916_v34, %v2912_v33  ;;  %v4292_v28 = vadd.f32 %v4291_v9, %v8533_v48  ;;  %v4293_v30 = vpop.f32.mrb[47].mxu0  ;;  %v7014_v34 = vld [vmem:[%s9519_s10 + $0x154] ss:$8 sps:$4 sm:$0xff]  }
 0x496   : > { %v2973_v63 = vpack.c.bf16 %v2917_v50, %v2913_v55  ;;  %v2732_v0 = vpop.f32.mrb[56].mxu1  ;;  %3512 = vmatpush1.bf16.msra.mxu1 %v7000_v32  ;;  %v4294_v53 = vadd.f32 %v4293_v30, %v8537_v52 }
 0x497   : > { %v2733_v5 = vadd.f32 %v2732_v0, %v8520_v38  ;;  %v2734_v6 = vpop.f32.mrb[57].mxu1  ;;  %3513 = vmatprep.subr.bf16.mxu1 %v7005_v39  ;;  %v4474_v39 = vmax.f32 %v4290_v27, 0.0  ;;  %v4477_v51 = vmax.f32 %v4292_v28, 0.0 }
 0x498   : > { %v2735_v13 = vadd.f32 %v2734_v6, %v8524_v42  ;;  %v2736_v16 = vpop.f32.mrb[58].mxu1  ;;  %3438 = vmatprep.mubr.bf16.mxu1 %v2973_v63  ;;  %v4478_v61 = vmax.f32 %v4294_v53, 0.0  ;;  %v7012_v63 = vld [vmem:[%s9519_s10 + $0x150] ss:$8 sps:$4 sm:$0xff]  }
 0x499   : > { %v2737_v25 = vadd.f32 %v2736_v16, %v8520_v38  ;;  %v2738_v58 = vpop.f32.mrb[59].mxu1  ;;  %3439 = vmatmul.mubr.bf16.gmra.mrb[116].mxu1 %v2972_v60  ;;  %v2920_v56 = vmax.f32 %v2733_v5, 0.0  ;;  %v8616_v0 = vpack.c.bf16 %v4477_v51, %v4473_v14  ;;  %v4297_v5 = vpop.f32.mrb[48].mxu0 }
 0x49a   : > { %v2739_v54 = vadd.f32 %v2738_v58, %v8524_v42  ;;  %3514 = vmatpush1.bf16.msra.mxu1 %v7003_v1  ;;  %v2921_v35 = vmax.f32 %v2735_v13, 0.0  ;;  %v8621_v4 = vpack.c.bf16 %v4478_v61, %v4474_v39  ;;  %v4298_v8 = vadd.f32 %v4297_v5, %v8533_v48  ;;  %v4299_v10 = vpop.f32.mrb[49].mxu0 }
 0x49b   : > { %v2924_v12 = vmax.f32 %v2737_v25, 0.0  ;;  %3515 = vmatprep.subr.bf16.mxu1 %v7008_v7  ;;  %v4300_v16 = vadd.f32 %v4299_v10, %v8537_v52  ;;  %v4301_v17 = vpop.f32.mrb[50].mxu0 }
 0x49c   : > { %v2925_v23 = vmax.f32 %v2739_v54, 0.0  ;;  %v4481_v54 = vmax.f32 %v4298_v8, 0.0 }
 0x49d   : > { %v2976_v2 = vpack.c.bf16 %v2924_v12, %v2920_v56  ;;  %v4303_v56 = vpop.f32.mrb[51].mxu0 }
 0x49e   : > { %v2977_v15 = vpack.c.bf16 %v2925_v23, %v2921_v35  ;;  %v2742_v24 = vpop.f32.mrb[60].mxu1  ;;  %3516 = vmatpush1.bf16.msra.mxu1 %v7006_v20  ;;  %v4302_v20 = vadd.f32 %v4301_v17, %v8533_v48  ;;  %v4482_v35 = vmax.f32 %v4300_v16, 0.0  ;;  %v4304_v23 = vadd.f32 %v4303_v56, %v8537_v52 }
 0x49f   : > { %v2743_v32 = vadd.f32 %v2742_v24, %v8520_v38  ;;  %v2744_v33 = vpop.f32.mrb[61].mxu1  ;;  %3517 = vmatprep.subr.bf16.mxu1 %v7011_v21 }
 0x4a0   : > { %v2745_v55 = vadd.f32 %v2744_v33, %v8524_v42  ;;  %v2746_v50 = vpop.f32.mrb[62].mxu1  ;;  %3448 = vmatprep.mubr.bf16.mxu1 %v2977_v15  ;;  %v4486_v15 = vmax.f32 %v4304_v23, 0.0 }
 0x4a1   : > { %v2747_v59 = vadd.f32 %v2746_v50, %v8520_v38  ;;  %v2748_v60 = vpop.f32.mrb[63].mxu1  ;;  %3449 = vmatmul.mubr.bf16.gmra.mrb[120].mxu1 %v2976_v2  ;;  %v2928_v1 = vmax.f32 %v2743_v32, 0.0  ;;  %v4485_v2 = vmax.f32 %v4302_v20, 0.0  ;;  %v7023_v32 = vld [vmem:[%s9519_s10 + $0x184] ss:$8 sps:$4 sm:$0xff]  }
 0x4a2   : > { %v2749_v62 = vadd.f32 %v2748_v60, %v8524_v42  ;;  %3518 = vmatpush1.bf16.msra.mxu1 %v7009_v29  ;;  %v2929_v6 = vmax.f32 %v2745_v55, 0.0  ;;  %v7018_v29 = vld [vmem:[%s9519_s10 + $0x170] ss:$8 sps:$4 sm:$0xff]   ;;  %v8645_v33 = vpack.c.bf16 %v4486_v15, %v4482_v35 }
 0x4a3   : > { %v2932_v11 = vmax.f32 %v2747_v59, 0.0  ;;  %3519 = vmatprep.subr.bf16.mxu1 %v7014_v34  ;;  %v8640_v14 = vpack.c.bf16 %v4485_v2, %v4481_v54  ;;  %v4307_v34 = vpop.f32.mrb[52].mxu0  ;;  %v7024_v20 = vld [vmem:[%s9519_s10 + $0x190] ss:$8 sps:$4 sm:$0xff]  }
 0x4a4   : > { %v2933_v7 = vmax.f32 %v2749_v62, 0.0  ;;  %v4308_v55 = vadd.f32 %v4307_v34, %v8533_v48  ;;  %v4309_v50 = vpop.f32.mrb[53].mxu0 }
 0x4a5   : > { %v2980_v13 = vpack.c.bf16 %v2932_v11, %v2928_v1  ;;  %v4310_v59 = vadd.f32 %v4309_v50, %v8537_v52  ;;  %v4311_v60 = vpop.f32.mrb[54].mxu0  ;;  %v7032_v50 = vld [vmem:[%s9519_s10 + $0x1b4] ss:$8 sps:$4 sm:$0xff]  }
 0x4a6   : > { %v2981_v25 = vpack.c.bf16 %v2933_v7, %v2929_v6  ;;  %v2752_v58 = vpop.f32.mrb[64].mxu1  ;;  %3520 = vmatpush1.bf16.msra.mxu1 %v7012_v63  ;;  %v7021_v63 = vld [vmem:[%s9519_s10 + $0x180] ss:$8 sps:$4 sm:$0xff]   ;;  %v4489_v1 = vmax.f32 %v4308_v55, 0.0  ;;  %v4312_v11 = vadd.f32 %v4311_v60, %v8533_v48  ;;  %v7026_v7 = vld [vmem:[%s9519_s10 + $0x194] ss:$8 sps:$4 sm:$0xff]  }
 0x4a7   : > { %v2753_v12 = vadd.f32 %v2752_v58, %v8520_v38  ;;  %v2754_v21 = vpop.f32.mrb[65].mxu1  ;;  %3521 = vmatprep.subr.bf16.mxu1 %v7017_v3  ;;  %v4313_v3 = vpop.f32.mrb[55].mxu0  ;;  %v4490_v8 = vmax.f32 %v4310_v59, 0.0 }
 0x4a8   : > { %v2755_v22 = vadd.f32 %v2754_v21, %v8524_v42  ;;  %v2756_v41 = vpop.f32.mrb[66].mxu1  ;;  %3458 = vmatprep.mubr.bf16.mxu1 %v2981_v25  ;;  %v4314_v10 = vadd.f32 %v4313_v3, %v8537_v52  ;;  %v4493_v17 = vmax.f32 %v4312_v11, 0.0  ;;  %v4317_v23 = vpop.f32.mrb[56].mxu0 }
 0x4a9   : > { %v2757_v27 = vadd.f32 %v2756_v41, %v8520_v38  ;;  %v2758_v9 = vpop.f32.mrb[67].mxu1  ;;  %3459 = vmatmul.mubr.bf16.gmra.mrb[124].mxu1 %v2980_v13  ;;  %v2936_v28 = vmax.f32 %v2753_v12, 0.0  ;;  %v4318_v2 = vadd.f32 %v4317_v23, %v8533_v48  ;;  %v7033_v23 = vld [vmem:[%s9519_s10 + $0x1c0] ss:$8 sps:$4 sm:$0xff]  }
 0x4aa   : > { %v2759_v24 = vadd.f32 %v2758_v9, %v8524_v42  ;;  %3522 = vmatpush1.bf16.msra.mxu1 %v7015_v40  ;;  %v2937_v39 = vmax.f32 %v2755_v22, 0.0  ;;  %v4494_v40 = vmax.f32 %v4314_v10, 0.0  ;;  %v8664_v56 = vpack.c.bf16 %v4493_v17, %v4489_v1  ;;  %v7035_v10 = vld [vmem:[%s9519_s10 + $0x1c4] ss:$8 sps:$4 sm:$0xff]  }
 0x4ab   : > { %v2940_v30 = vmax.f32 %v2757_v27, 0.0  ;;  %3523 = vmatprep.subr.bf16.mxu1 %v7020_v26  ;;  %v7029_v26 = vld [vmem:[%s9519_s10 + $0x1a4] ss:$8 sps:$4 sm:$0xff]   ;;  %v4319_v27 = vpop.f32.mrb[57].mxu0 }
 0x4ac   : > { %v2941_v53 = vmax.f32 %v2759_v24, 0.0  ;;  %v8669_v35 = vpack.c.bf16 %v4494_v40, %v4490_v8  ;;  %v4320_v15 = vadd.f32 %v4319_v27, %v8537_v52  ;;  %v4321_v24 = vpop.f32.mrb[58].mxu0 }
 0x4ad   : > { %v2984_v51 = vpack.c.bf16 %v2940_v30, %v2936_v28  ;;  %v7027_v30 = vld [vmem:[%s9519_s10 + $0x1a0] ss:$8 sps:$4 sm:$0xff]   ;;  %v4322_v34 = vadd.f32 %v4321_v24, %v8533_v48  ;;  %v7038_v24 = vld [vmem:[%s9519_s10 + $0x1d4] ss:$8 sps:$4 sm:$0xff]  }
 0x4ae   : > { %v2985_v61 = vpack.c.bf16 %v2941_v53, %v2937_v39  ;;  %v2762_v62 = vpop.f32.mrb[68].mxu1  ;;  %3524 = vmatpush1.bf16.msra.mxu1 %v7018_v29  ;;  %v4323_v39 = vpop.f32.mrb[59].mxu0 }
 0x4af   : > { %v2763_v5 = vadd.f32 %v2762_v62, %v8520_v38  ;;  %v2764_v6 = vpop.f32.mrb[69].mxu1  ;;  %3525 = vmatprep.subr.bf16.mxu1 %v7023_v32  ;;  %v4497_v32 = vmax.f32 %v4318_v2, 0.0  ;;  %v4324_v59 = vadd.f32 %v4323_v39, %v8537_v52  ;;  %v4501_v62 = vmax.f32 %v4322_v34, 0.0 }
 0x4b0   : > { %v2765_v13 = vadd.f32 %v2764_v6, %v8524_v42  ;;  %v2766_v16 = vpop.f32.mrb[70].mxu1  ;;  %3468 = vmatprep.mubr.bf16.mxu1 %v2985_v61  ;;  %v2512_v34 = vsub.s32 3, %v7864_v46 }
 0x4b1   : > { %v2767_v25 = vadd.f32 %v2766_v16, %v8520_v38  ;;  %v2768_v58 = vpop.f32.mrb[71].mxu1  ;;  %3469 = vmatmul.mubr.bf16.gmra.mrb[128].mxu1 %v2984_v51  ;;  %v2944_v12 = vmax.f32 %v2763_v5, 0.0  ;;  %v4498_v51 = vmax.f32 %v4320_v15, 0.0  ;;  %v4502_v11 = vmax.f32 %v4324_v59, 0.0  ;;  %v7030_v5 = vld [vmem:[%s9519_s10 + $0x1b0] ss:$8 sps:$4 sm:$0xff]  }
 0x4b2   : > { %v2769_v54 = vadd.f32 %v2768_v58, %v8524_v42  ;;  %3526 = vmatpush1.bf16.msra.mxu1 %v7021_v63  ;;  %v2945_v22 = vmax.f32 %v2765_v13, 0.0  ;;  %v8688_v6 = vpack.c.bf16 %v4501_v62, %v4497_v32  ;;  %v4327_v16 = vpop.f32.mrb[60].mxu0 }
 0x4b3   : > { %v2948_v21 = vmax.f32 %v2767_v25, 0.0  ;;  %3527 = vmatprep.subr.bf16.mxu1 %v7026_v7  ;;  %v8693_v13 = vpack.c.bf16 %v4502_v11, %v4498_v51  ;;  %v4328_v58 = vadd.f32 %v4327_v16, %v8533_v48  ;;  %v4329_v40 = vpop.f32.mrb[61].mxu0  ;;  %v7036_v51 = vld [vmem:[%s9519_s10 + $0x1d0] ss:$8 sps:$4 sm:$0xff]  }
 0x4b4   : > { %v2949_v41 = vmax.f32 %v2769_v54, 0.0 }
 0x4b5   : > { %v2988_v9 = vpack.c.bf16 %v2948_v21, %v2944_v12  ;;  %v4331_v12 = vpop.f32.mrb[62].mxu0 }
 0x4b6   : > { %v2989_v29 = vpack.c.bf16 %v2949_v41, %v2945_v22  ;;  %v2772_v28 = vpop.f32.mrb[72].mxu1  ;;  %3528 = vmatpush1.bf16.msra.mxu1 %v7024_v20  ;;  %v4330_v20 = vadd.f32 %v4329_v40, %v8537_v52  ;;  %v2508_v22 = vsub.s32 2, %v7864_v46  ;;  %v4505_v41 = vmax.f32 %v4328_v58, 0.0  ;;  %v4333_v27 = vpop.f32.mrb[63].mxu0 }
 0x4b7   : > { %v2773_v53 = vadd.f32 %v2772_v28, %v8520_v38  ;;  %v2774_v55 = vpop.f32.mrb[73].mxu1  ;;  %3529 = vmatprep.subr.bf16.mxu1 %v7029_v26  ;;  %v4332_v2 = vadd.f32 %v4331_v12, %v8533_v48  ;;  %v4334_v28 = vadd.f32 %v4333_v27, %v8537_v52  ;;  %v4370_v62 = vpop.f32.mrb[64].mxu0  ;;  %v7044_v12 = vld [vmem:[%s9519_s10 + $0x1f4] ss:$8 sps:$4 sm:$0xff]  }
 0x4b8   : > { %v2775_v60 = vadd.f32 %v2774_v55, %v8524_v42  ;;  %v2776_v61 = vpop.f32.mrb[74].mxu1  ;;  %3478 = vmatprep.mubr.bf16.mxu1 %v2989_v29  ;;  %v4506_v29 = vmax.f32 %v4330_v20, 0.0  ;;  %v8715_v52 = vrot.slane %v8516_v36, %v2508_v22  ;;  %v8720_v46 = vrot.slane %v8529_v43, %v2508_v22 }
 0x4b9   : > { %v2777_v63 = vadd.f32 %v2776_v61, %v8520_v38  ;;  %v2778_v1 = vpop.f32.mrb[75].mxu1  ;;  %3479 = vmatmul.mubr.bf16.gmra.mrb[132].mxu1 %v2988_v9  ;;  %v2952_v7 = vmax.f32 %v2773_v53, 0.0  ;;  %v4509_v39 = vmax.f32 %v4332_v2, 0.0  ;;  %v4510_v55 = vmax.f32 %v4334_v28, 0.0 }
 0x4ba   : > { %v2779_v3 = vadd.f32 %v2778_v1, %v8524_v42  ;;  %3530 = vmatpush1.bf16.msra.mxu1 %v7027_v30  ;;  %v2953_v17 = vmax.f32 %v2775_v60, 0.0 }
 0x4bb   : > { %v2956_v8 = vmax.f32 %v2777_v63, 0.0  ;;  %3531 = vmatprep.subr.bf16.mxu1 %v7032_v50  ;;  %v8717_v59 = vpack.c.bf16 %v4509_v39, %v4505_v41  ;;  %v8725_v61 = vpack.c.bf16 %v4510_v55, %v4506_v29  ;;  %v8728_v63 = vrot.slane %v8529_v43, %v2512_v34  ;;  %v7039_v43 = vld [vmem:[%s9519_s10 + $0x1e0] ss:$8 sps:$4 sm:$0xff]  }
 0x4bc   : > { %v2957_v25 = vmax.f32 %v2779_v3, 0.0  ;;  %v8731_v3 = vrot.slane %v8516_v36, %v2512_v34 }
 0x4bd   : > { %v2992_v54 = vpack.c.bf16 %v2956_v8, %v2952_v7  ;;  %v4372_v7 = vpop.f32.mrb[65].mxu0 }
 0x4be   : > { %v2993_v21 = vpack.c.bf16 %v2957_v25, %v2953_v17  ;;  %v2782_v26 = vpop.f32.mrb[76].mxu1  ;;  %3532 = vmatpush1.bf16.msra.mxu1 %v7030_v5  ;;  %v4371_v5 = vadd.f32 %v4370_v62, %v8720_v46  ;;  %v4374_v16 = vpop.f32.mrb[66].mxu0 }
 0x4bf   : > { %v2783_v9 = vadd.f32 %v2782_v26, %v8520_v38  ;;  %v2784_v15 = vpop.f32.mrb[77].mxu1  ;;  %3533 = vmatprep.subr.bf16.mxu1 %v7035_v10  ;;  %v4373_v10 = vadd.f32 %v4372_v7, %v8728_v63  ;;  %v4375_v40 = vadd.f32 %v4374_v16, %v8720_v46  ;;  %v7050_v16 = vld [vmem:[%s9525_s16 + $0x14] ss:$8 sps:$4 sm:$0xff]  }
 0x4c0   : > { %v2785_v30 = vadd.f32 %v2784_v15, %v8524_v42  ;;  %v2786_v32 = vpop.f32.mrb[78].mxu1  ;;  %3488 = vmatprep.mubr.bf16.mxu1 %v2993_v21  ;;  %v4451_v58 = vmax.f32 %v4371_v5, 0.0 }
 0x4c1   : > { %v2787_v48 = vadd.f32 %v2786_v32, %v8520_v38  ;;  %v2788_v53 = vpop.f32.mrb[79].mxu1  ;;  %3489 = vmatmul.mubr.bf16.gmra.mrb[136].mxu1 %v2992_v54  ;;  %v2960_v60 = vmax.f32 %v2783_v9, 0.0  ;;  %v4376_v54 = vpop.f32.mrb[67].mxu0  ;;  %v4452_v21 = vmax.f32 %v4373_v10, 0.0  ;;  %v4455_v41 = vmax.f32 %v4375_v40, 0.0 }
 0x4c2   : > { %v2789_v50 = vadd.f32 %v2788_v53, %v8524_v42  ;;  %3534 = vmatpush1.bf16.msra.mxu1 %v7033_v23  ;;  %v7041_v42 = vld [vmem:[%s9519_s10 + $0x1e4] ss:$8 sps:$4 sm:$0xff]   ;;  %v2961_v1 = vmax.f32 %v2785_v30, 0.0  ;;  %v4377_v26 = vadd.f32 %v4376_v54, %v8728_v63  ;;  %v4380_v39 = vpop.f32.mrb[68].mxu0 }
 0x4c3   : > { %v2964_v38 = vmax.f32 %v2787_v48, 0.0  ;;  %3535 = vmatprep.subr.bf16.mxu1 %v7038_v24  ;;  %v7042_v24 = vld [vmem:[%s9519_s10 + $0x1f0] ss:$8 sps:$4 sm:$0xff]   ;;  %v8750_v29 = vpack.c.bf16 %v4455_v41, %v4451_v58  ;;  %v7047_v32 = vld [vmem:[%s9525_s16 + $0x4] ss:$8 sps:$4 sm:$0xff]   ;;  %v4381_v55 = vadd.f32 %v4380_v39, %v8720_v46 }
 0x4c4   : > { %v2965_v11 = vmax.f32 %v2789_v50, 0.0  ;;  %v4456_v9 = vmax.f32 %v4377_v26, 0.0  ;;  %v4382_v50 = vpop.f32.mrb[69].mxu0  ;;  %v7053_v41 = vld [vmem:[%s9525_s16 + $0x24] ss:$8 sps:$4 sm:$0xff]  }
 0x4c5   : > { %v2996_v8 = vpack.c.bf16 %v2964_v38, %v2960_v60  ;;  %v4383_v60 = vadd.f32 %v4382_v50, %v8728_v63  ;;  %v4384_v38 = vpop.f32.mrb[70].mxu0 }
 0x4c6   : > { %v2997_v17 = vpack.c.bf16 %v2965_v11, %v2961_v1  ;;  %v2825_v25 = vpop.f32.mrb[80].mxu1  ;;  %3536 = vmatpush1.bf16.msra.mxu1 %v7036_v51  ;;  %v8755_v34 = vpack.c.bf16 %v4456_v9, %v4452_v21  ;;  %v7045_v1 = vld [vmem:[%s9525_s16] ss:$8 sps:$4 sm:$0xff]   ;;  %v4459_v11 = vmax.f32 %v4381_v55, 0.0  ;;  %v4385_v5 = vadd.f32 %v4384_v38, %v8720_v46  ;;  %v4386_v7 = vpop.f32.mrb[71].mxu0 }
 0x4c7   : > { %v2826_v36 = vadd.f32 %v2825_v25, %v8715_v52  ;;  %v2827_v20 = vpop.f32.mrb[81].mxu1  ;;  %3537 = vmatprep.subr.bf16.mxu1 %v7041_v42  ;;  %v4387_v25 = vadd.f32 %v4386_v7, %v8728_v63  ;;  %v7048_v21 = vld [vmem:[%s9525_s16 + $0x10] ss:$8 sps:$4 sm:$0xff]   ;;  %v7051_v55 = vld [vmem:[%s9525_s16 + $0x20] ss:$8 sps:$4 sm:$0xff]  }
 0x4c8   : > { %v2828_v23 = vadd.f32 %v2827_v20, %v8731_v3  ;;  %v2829_v22 = vpop.f32.mrb[82].mxu1  ;;  %3498 = vmatprep.mubr.bf16.mxu1 %v2997_v17  ;;  %v4460_v17 = vmax.f32 %v4383_v60, 0.0  ;;  %v4463_v40 = vmax.f32 %v4385_v5, 0.0 }
 0x4c9   : > { %v2830_v2 = vadd.f32 %v2829_v22, %v8715_v52  ;;  %v2831_v27 = vpop.f32.mrb[83].mxu1  ;;  %3499 = vmatmul.mubr.bf16.gmra.mrb[140].mxu1 %v2996_v8  ;;  %v2906_v28 = vmax.f32 %v2826_v36, 0.0  ;;  %v4464_v20 = vmax.f32 %v4387_v25, 0.0 }
 0x4ca   : > { %v2832_v15 = vadd.f32 %v2831_v27, %v8731_v3  ;;  %3538 = vmatpush1.bf16.msra.mxu1 %v7039_v43  ;;  %v2907_v48 = vmax.f32 %v2828_v23, 0.0  ;;  %v8774_v26 = vpack.c.bf16 %v4463_v40, %v4459_v11  ;;  %v4390_v27 = vpop.f32.mrb[72].mxu0 }
 0x4cb   : > { %v2910_v30 = vmax.f32 %v2830_v2, 0.0  ;;  %3539 = vmatprep.subr.bf16.mxu1 %v7044_v12  ;;  %v8779_v2 = vpack.c.bf16 %v4464_v20, %v4460_v17 }
 0x4cc   : > { %v2911_v53 = vmax.f32 %v2832_v15, 0.0 }
 0x4cd   : > { %v2970_v51 = vpack.c.bf16 %v2910_v30, %v2906_v28  ;;  %v4392_v28 = vpop.f32.mrb[73].mxu0 }
 0x4ce   : > { %v2971_v42 = vpack.c.bf16 %v2911_v53, %v2907_v48  ;;  %v2835_v62 = vpop.f32.mrb[84].mxu1  ;;  %3540 = vmatpush1.bf16.msra.mxu1 %v7042_v24  ;;  %v4391_v24 = vadd.f32 %v4390_v27, %v8720_v46  ;;  %v4394_v39 = vpop.f32.mrb[74].mxu0 }
 0x4cf   : > { %v2836_v8 = vadd.f32 %v2835_v62, %v8715_v52  ;;  %v2837_v10 = vpop.f32.mrb[85].mxu1  ;;  %4941 = vmatprep.subr.bf16.mxu1 %v7047_v32  ;;  %v4393_v32 = vadd.f32 %v4392_v28, %v8728_v63  ;;  %v4396_v60 = vpop.f32.mrb[75].mxu0  ;;  %v7056_v62 = vld [vmem:[%s9525_s16 + $0x34] ss:$8 sps:$4 sm:$0xff]  }
 0x4d0   : > { %v2838_v43 = vadd.f32 %v2837_v10, %v8731_v3  ;;  %v2839_v58 = vpop.f32.mrb[86].mxu1  ;;  %3541 = vmatprep.mubr.bf16.mxu1 %v2971_v42  ;;  %v4467_v50 = vmax.f32 %v4391_v24, 0.0  ;;  %v4397_v11 = vadd.f32 %v4396_v60, %v8728_v63 }
 0x4d1   : > { %v2840_v54 = vadd.f32 %v2839_v58, %v8715_v52  ;;  %v2841_v36 = vpop.f32.mrb[87].mxu1  ;;  %3542 = vmatmul.mubr.bf16.vlgmr.msra.gmra.mrb[112].mxu1 %v2970_v51  ;;  %v2914_v23 = vmax.f32 %v2836_v8, 0.0  ;;  %v4395_v51 = vadd.f32 %v4394_v39, %v8720_v46 }
 0x4d2   : > { %v2842_v12 = vadd.f32 %v2841_v36, %v8731_v3  ;;  %4942 = vmatpush1.bf16.msra.mxu1 %v7045_v1  ;;  %v2915_v9 = vmax.f32 %v2838_v43, 0.0  ;;  %v4468_v1 = vmax.f32 %v4393_v32, 0.0  ;;  %v4472_v17 = vmax.f32 %v4397_v11, 0.0  ;;  %v7054_v43 = vld [vmem:[%s9525_s16 + $0x30] ss:$8 sps:$4 sm:$0xff]  }
 0x4d3   : > { %v2918_v22 = vmax.f32 %v2840_v54, 0.0  ;;  %4943 = vmatprep.subr.bf16.mxu1 %v7050_v16  ;;  %v4471_v8 = vmax.f32 %v4395_v51, 0.0  ;;  %v7059_v36 = vld [vmem:[%s9525_s16 + $0x44] ss:$8 sps:$4 sm:$0xff]  }
 0x4d4   : > { %v2919_v15 = vmax.f32 %v2842_v12, 0.0  ;;  %v8803_v20 = vpack.c.bf16 %v4472_v17, %v4468_v1  ;;  %v4400_v12 = vpop.f32.mrb[76].mxu0 }
 0x4d5   : > { %v2974_v30 = vpack.c.bf16 %v2918_v22, %v2914_v23  ;;  %v8798_v58 = vpack.c.bf16 %v4471_v8, %v4467_v50  ;;  %v4401_v22 = vadd.f32 %v4400_v12, %v8720_v46  ;;  %v7062_v50 = vld [vmem:[%s9525_s16 + $0x54] ss:$8 sps:$4 sm:$0xff]   ;;  %v7060_v8 = vld [vmem:[%s9525_s16 + $0x50] ss:$8 sps:$4 sm:$0xff]  }
 0x4d6   : > { %v2975_v48 = vpack.c.bf16 %v2919_v15, %v2915_v9  ;;  %v2845_v53 = vpop.f32.mrb[88].mxu1  ;;  %4944 = vmatpush1.bf16.msra.mxu1 %v7048_v21 }
 0x4d7   : > { %v2846_v38 = vadd.f32 %v2845_v53, %v8715_v52  ;;  %v2847_v42 = vpop.f32.mrb[89].mxu1  ;;  %4945 = vmatprep.subr.bf16.mxu1 %v7053_v41  ;;  %v4402_v41 = vpop.f32.mrb[77].mxu0  ;;  %v4475_v32 = vmax.f32 %v4401_v22, 0.0 }
 0x4d8   : > { %v2848_v5 = vadd.f32 %v2847_v42, %v8731_v3  ;;  %v2849_v7 = vpop.f32.mrb[90].mxu1  ;;  %3551 = vmatprep.mubr.bf16.mxu1 %v2975_v48  ;;  %v4403_v9 = vadd.f32 %v4402_v41, %v8728_v63  ;;  %v4404_v15 = vpop.f32.mrb[78].mxu0 }
 0x4d9   : > { %v2850_v10 = vadd.f32 %v2849_v7, %v8715_v52  ;;  %v2851_v16 = vpop.f32.mrb[91].mxu1  ;;  %3552 = vmatmul.mubr.bf16.gmra.mrb[116].mxu1 %v2974_v30  ;;  %v2922_v40 = vmax.f32 %v2846_v38, 0.0  ;;  %v7057_v30 = vld [vmem:[%s9525_s16 + $0x40] ss:$8 sps:$4 sm:$0xff]   ;;  %v4405_v39 = vadd.f32 %v4404_v15, %v8720_v46  ;;  %v4406_v48 = vpop.f32.mrb[79].mxu0 }
 0x4da   : > { %v2852_v25 = vadd.f32 %v2851_v16, %v8731_v3  ;;  %4946 = vmatpush1.bf16.msra.mxu1 %v7051_v55  ;;  %v2923_v21 = vmax.f32 %v2848_v5, 0.0  ;;  %v4476_v51 = vmax.f32 %v4403_v9, 0.0  ;;  %v4407_v60 = vadd.f32 %v4406_v48, %v8728_v63  ;;  %v7063_v15 = vld [vmem:[%s9525_s16 + $0x60] ss:$8 sps:$4 sm:$0xff]   ;;  %v7068_v48 = vld [vmem:[%s9525_s16 + $0x74] ss:$8 sps:$4 sm:$0xff]  }
 0x4db   : > { %v2926_v54 = vmax.f32 %v2850_v10, 0.0  ;;  %4947 = vmatprep.subr.bf16.mxu1 %v7056_v62  ;;  %v4479_v62 = vmax.f32 %v4405_v39, 0.0 }
 0x4dc   : > { %v2927_v23 = vmax.f32 %v2852_v25, 0.0  ;;  %v4480_v5 = vmax.f32 %v4407_v60, 0.0  ;;  %v7065_v25 = vld [vmem:[%s9525_s16 + $0x64] ss:$8 sps:$4 sm:$0xff]  }
 0x4dd   : > { %v2978_v27 = vpack.c.bf16 %v2926_v54, %v2922_v40  ;;  %v8822_v10 = vpack.c.bf16 %v4479_v62, %v4475_v32  ;;  %v4410_v40 = vpop.f32.mrb[80].mxu0 }
 0x4de   : > { %v2979_v24 = vpack.c.bf16 %v2927_v23, %v2923_v21  ;;  %v2855_v28 = vpop.f32.mrb[92].mxu1  ;;  %4948 = vmatpush1.bf16.msra.mxu1 %v7054_v43  ;;  %v8827_v43 = vpack.c.bf16 %v4480_v5, %v4476_v51  ;;  %v4411_v12 = vadd.f32 %v4410_v40, %v8720_v46  ;;  %v4412_v21 = vpop.f32.mrb[81].mxu0 }
 0x4df   : > { %v2856_v53 = vadd.f32 %v2855_v28, %v8715_v52  ;;  %v2857_v55 = vpop.f32.mrb[93].mxu1  ;;  %4949 = vmatprep.subr.bf16.mxu1 %v7059_v36  ;;  %v4413_v22 = vadd.f32 %v4412_v21, %v8728_v63  ;;  %v4414_v41 = vpop.f32.mrb[82].mxu0 }
 0x4e0   : > { %v2858_v38 = vadd.f32 %v2857_v55, %v8731_v3  ;;  %v2859_v42 = vpop.f32.mrb[94].mxu1  ;;  %3561 = vmatprep.mubr.bf16.mxu1 %v2979_v24  ;;  %v4483_v24 = vmax.f32 %v4411_v12, 0.0  ;;  %v4415_v28 = vadd.f32 %v4414_v41, %v8720_v46 }
 0x4e1   : > { %v2860_v1 = vadd.f32 %v2859_v42, %v8715_v52  ;;  %v2861_v11 = vpop.f32.mrb[95].mxu1  ;;  %3562 = vmatmul.mubr.bf16.gmra.mrb[120].mxu1 %v2978_v27  ;;  %v2930_v16 = vmax.f32 %v2856_v53, 0.0  ;;  %v4484_v53 = vmax.f32 %v4413_v22, 0.0 }
 0x4e2   : > { %v2862_v7 = vadd.f32 %v2861_v11, %v8731_v3  ;;  %4950 = vmatpush1.bf16.msra.mxu1 %v7057_v30  ;;  %v2931_v54 = vmax.f32 %v2858_v38, 0.0  ;;  %v4416_v30 = vpop.f32.mrb[83].mxu0  ;;  %v4487_v60 = vmax.f32 %v4415_v28, 0.0  ;;  %v7066_v11 = vld [vmem:[%s9525_s16 + $0x70] ss:$8 sps:$4 sm:$0xff]  }
 0x4e3   : > { %v2934_v17 = vmax.f32 %v2860_v1, 0.0  ;;  %4951 = vmatprep.subr.bf16.mxu1 %v7062_v50  ;;  %v4417_v55 = vadd.f32 %v4416_v30, %v8728_v63 }
 0x4e4   : > { %v2935_v36 = vmax.f32 %v2862_v7, 0.0  ;;  %v8846_v5 = vpack.c.bf16 %v4487_v60, %v4483_v24 }
 0x4e5   : > { %v2982_v23 = vpack.c.bf16 %v2934_v17, %v2930_v16  ;;  %v4488_v62 = vmax.f32 %v4417_v55, 0.0  ;;  %v7071_v16 = vld [vmem:[%s9525_s16 + $0x84] ss:$8 sps:$4 sm:$0xff]  }
 0x4e6   : > { %v2983_v27 = vpack.c.bf16 %v2935_v36, %v2931_v54  ;;  %v2865_v9 = vpop.f32.mrb[96].mxu1  ;;  %4952 = vmatpush1.bf16.msra.mxu1 %v7060_v8 }
 0x4e7   : > { %v2866_v32 = vadd.f32 %v2865_v9, %v8715_v52  ;;  %v2867_v39 = vpop.f32.mrb[97].mxu1  ;;  %4953 = vmatprep.subr.bf16.mxu1 %v7065_v25  ;;  %v8851_v17 = vpack.c.bf16 %v4488_v62, %v4484_v53  ;;  %v4420_v25 = vpop.f32.mrb[84].mxu0  ;;  %v7069_v9 = vld [vmem:[%s9525_s16 + $0x80] ss:$8 sps:$4 sm:$0xff]  }
 0x4e8   : > { %v2868_v50 = vadd.f32 %v2867_v39, %v8731_v3  ;;  %v2869_v51 = vpop.f32.mrb[98].mxu1  ;;  %3571 = vmatprep.mubr.bf16.mxu1 %v2983_v27  ;;  %v4421_v36 = vadd.f32 %v4420_v25, %v8720_v46  ;;  %v4422_v12 = vpop.f32.mrb[85].mxu0  ;;  %v7074_v39 = vld [vmem:[%s9525_s16 + $0x94] ss:$8 sps:$4 sm:$0xff]  }
 0x4e9   : > { %v2870_v38 = vadd.f32 %v2869_v51, %v8715_v52  ;;  %v2871_v42 = vpop.f32.mrb[99].mxu1  ;;  %3572 = vmatmul.mubr.bf16.gmra.mrb[124].mxu1 %v2982_v23  ;;  %v2938_v7 = vmax.f32 %v2866_v32, 0.0  ;;  %v4423_v23 = vadd.f32 %v4422_v12, %v8728_v63  ;;  %v4424_v22 = vpop.f32.mrb[86].mxu0 }
 0x4ea   : > { %v2872_v1 = vadd.f32 %v2871_v42, %v8731_v3  ;;  %4954 = vmatpush1.bf16.msra.mxu1 %v7063_v15  ;;  %v2939_v40 = vmax.f32 %v2868_v50, 0.0  ;;  %v4491_v15 = vmax.f32 %v4421_v36, 0.0  ;;  %v4425_v24 = vadd.f32 %v4424_v22, %v8720_v46  ;;  %v4426_v28 = vpop.f32.mrb[87].mxu0 }
 0x4eb   : > { %v2942_v8 = vmax.f32 %v2870_v38, 0.0  ;;  %4955 = vmatprep.subr.bf16.mxu1 %v7068_v48  ;;  %v4492_v48 = vmax.f32 %v4423_v23, 0.0  ;;  %v4427_v53 = vadd.f32 %v4426_v28, %v8728_v63 }
 0x4ec   : > { %v2943_v54 = vmax.f32 %v2872_v1, 0.0  ;;  %v4495_v51 = vmax.f32 %v4425_v24, 0.0  ;;  %v7072_v1 = vld [vmem:[%s9525_s16 + $0x90] ss:$8 sps:$4 sm:$0xff]  }
 0x4ed   : > { %v2986_v21 = vpack.c.bf16 %v2942_v8, %v2938_v7  ;;  %v4496_v42 = vmax.f32 %v4427_v53, 0.0 }
 0x4ee   : > { %v2987_v41 = vpack.c.bf16 %v2943_v54, %v2939_v40  ;;  %v2875_v27 = vpop.f32.mrb[100].mxu1  ;;  %4956 = vmatpush1.bf16.msra.mxu1 %v7066_v11  ;;  %v8870_v11 = vpack.c.bf16 %v4495_v51, %v4491_v15  ;;  %v4430_v40 = vpop.f32.mrb[88].mxu0  ;;  %v7075_v15 = vld [vmem:[%s9525_s16 + $0xa0] ss:$8 sps:$4 sm:$0xff]  }
 0x4ef   : > { %v2876_v30 = vadd.f32 %v2875_v27, %v8715_v52  ;;  %v2877_v32 = vpop.f32.mrb[101].mxu1  ;;  %4957 = vmatprep.subr.bf16.mxu1 %v7071_v16  ;;  %v7077_v16 = vld [vmem:[%s9525_s16 + $0xa4] ss:$8 sps:$4 sm:$0xff]   ;;  %v8875_v25 = vpack.c.bf16 %v4496_v42, %v4492_v48  ;;  %v4431_v12 = vadd.f32 %v4430_v40, %v8720_v46  ;;  %v7080_v48 = vld [vmem:[%s9525_s16 + $0xb4] ss:$8 sps:$4 sm:$0xff]  }
 0x4f0   : > { %v2878_v55 = vadd.f32 %v2877_v32, %v8731_v3  ;;  %v2879_v50 = vpop.f32.mrb[102].mxu1  ;;  %3581 = vmatprep.mubr.bf16.mxu1 %v2987_v41 }
 0x4f1   : > { %v2880_v60 = vadd.f32 %v2879_v50, %v8715_v52  ;;  %v2881_v38 = vpop.f32.mrb[103].mxu1  ;;  %3582 = vmatmul.mubr.bf16.gmra.mrb[128].mxu1 %v2986_v21  ;;  %v2946_v7 = vmax.f32 %v2876_v30, 0.0  ;;  %v4432_v21 = vpop.f32.mrb[89].mxu0  ;;  %v4499_v24 = vmax.f32 %v4431_v12, 0.0 }
 0x4f2   : > { %v2882_v62 = vadd.f32 %v2881_v38, %v8731_v3  ;;  %4958 = vmatpush1.bf16.msra.mxu1 %v7069_v9  ;;  %v2947_v54 = vmax.f32 %v2878_v55, 0.0  ;;  %v4433_v22 = vadd.f32 %v4432_v21, %v8728_v63  ;;  %v4434_v41 = vpop.f32.mrb[90].mxu0 }
 0x4f3   : > { %v2950_v8 = vmax.f32 %v2880_v60, 0.0  ;;  %4959 = vmatprep.subr.bf16.mxu1 %v7074_v39  ;;  %v4435_v28 = vadd.f32 %v4434_v41, %v8720_v46  ;;  %v4436_v30 = vpop.f32.mrb[91].mxu0 }
 0x4f4   : > { %v2951_v36 = vmax.f32 %v2882_v62, 0.0  ;;  %v4500_v53 = vmax.f32 %v4433_v22, 0.0  ;;  %v4437_v55 = vadd.f32 %v4436_v30, %v8728_v63  ;;  %v4440_v12 = vpop.f32.mrb[92].mxu0  ;;  %v7081_v30 = vld [vmem:[%s9525_s16 + $0xc0] ss:$8 sps:$4 sm:$0xff]  }
 0x4f5   : > { %v2990_v23 = vpack.c.bf16 %v2950_v8, %v2946_v7  ;;  %v4503_v60 = vmax.f32 %v4435_v28, 0.0  ;;  %v7078_v7 = vld [vmem:[%s9525_s16 + $0xb0] ss:$8 sps:$4 sm:$0xff]   ;;  %v4441_v22 = vadd.f32 %v4440_v12, %v8720_v46  ;;  %v4442_v41 = vpop.f32.mrb[93].mxu0 }
 0x4f6   : > { %v2991_v27 = vpack.c.bf16 %v2951_v36, %v2947_v54  ;;  %v2885_v9 = vpop.f32.mrb[104].mxu1  ;;  %4960 = vmatpush1.bf16.msra.mxu1 %v7072_v1  ;;  %v4504_v62 = vmax.f32 %v4437_v55, 0.0  ;;  %v7083_v54 = vld [vmem:[%s9525_s16 + $0xc4] ss:$8 sps:$4 sm:$0xff]  }
 0x4f7   : > { %v2886_v32 = vadd.f32 %v2885_v9, %v8715_v52  ;;  %v2887_v39 = vpop.f32.mrb[105].mxu1  ;;  %4961 = vmatprep.subr.bf16.mxu1 %v7077_v16  ;;  %v8894_v8 = vpack.c.bf16 %v4503_v60, %v4499_v24  ;;  %v4443_v9 = vadd.f32 %v4442_v41, %v8728_v63 }
 0x4f8   : > { %v2888_v50 = vadd.f32 %v2887_v39, %v8731_v3  ;;  %v2889_v51 = vpop.f32.mrb[106].mxu1  ;;  %3591 = vmatprep.mubr.bf16.mxu1 %v2991_v27  ;;  %v8899_v36 = vpack.c.bf16 %v4504_v62, %v4500_v53 }
 0x4f9   : > { %v2890_v38 = vadd.f32 %v2889_v51, %v8715_v52  ;;  %v2891_v42 = vpop.f32.mrb[107].mxu1  ;;  %3592 = vmatmul.mubr.bf16.gmra.mrb[132].mxu1 %v2990_v23  ;;  %v2954_v16 = vmax.f32 %v2886_v32, 0.0  ;;  %v4507_v32 = vmax.f32 %v4441_v22, 0.0  ;;  %v4508_v51 = vmax.f32 %v4443_v9, 0.0  ;;  %v7092_v9 = vld [vmem:[%s9525_s16 + $0xf4] ss:$8 sps:$4 sm:$0xff]  }
 0x4fa   : > { %v2892_v1 = vadd.f32 %v2891_v42, %v8731_v3  ;;  %4962 = vmatpush1.bf16.msra.mxu1 %v7075_v15  ;;  %v2955_v21 = vmax.f32 %v2888_v50, 0.0  ;;  %v4444_v15 = vpop.f32.mrb[94].mxu0  ;;  %v7086_v50 = vld [vmem:[%s9525_s16 + $0xd4] ss:$8 sps:$4 sm:$0xff]  }
 0x4fb   : > { %v2958_v40 = vmax.f32 %v2890_v38, 0.0  ;;  %4963 = vmatprep.subr.bf16.mxu1 %v7080_v48  ;;  %v4445_v39 = vadd.f32 %v4444_v15, %v8720_v46  ;;  %v4446_v48 = vpop.f32.mrb[95].mxu0  ;;  %v7090_v15 = vld [vmem:[%s9525_s16 + $0xf0] ss:$8 sps:$4 sm:$0xff]  }
 0x4fc   : > { %v2959_v23 = vmax.f32 %v2892_v1, 0.0  ;;  %v4447_v60 = vadd.f32 %v4446_v48, %v8728_v63  ;;  %v7107_v48 = vld [vmem:[%s9525_s16 + $0x144] ss:$8 sps:$4 sm:$0xff]  }
 0x4fd   : > { %v2994_v27 = vpack.c.bf16 %v2958_v40, %v2954_v16  ;;  %v4511_v62 = vmax.f32 %v4445_v39, 0.0  ;;  %v7084_v40 = vld [vmem:[%s9525_s16 + $0xd0] ss:$8 sps:$4 sm:$0xff]   ;;  %v7099_v39 = vld [vmem:[%s9525_s16 + $0x120] ss:$8 sps:$4 sm:$0xff]  }
 0x4fe   : > { %v2995_v24 = vpack.c.bf16 %v2959_v23, %v2955_v21  ;;  %v2895_v28 = vpop.f32.mrb[108].mxu1  ;;  %4964 = vmatpush1.bf16.msra.mxu1 %v7078_v7  ;;  %v4512_v7 = vmax.f32 %v4447_v60, 0.0  ;;  %v7089_v21 = vld [vmem:[%s9525_s16 + $0xe4] ss:$8 sps:$4 sm:$0xff]   ;;  %v7117_v60 = vld [vmem:[%s9525_s16 + $0x180] ss:$8 sps:$4 sm:$0xff]  }
 0x4ff   : > { %v2896_v53 = vadd.f32 %v2895_v28, %v8715_v52  ;;  %v2897_v55 = vpop.f32.mrb[109].mxu1  ;;  %4965 = vmatprep.subr.bf16.mxu1 %v7083_v54  ;;  %v8918_v54 = vpack.c.bf16 %v4511_v62, %v4507_v32  ;;  %v7093_v28 = vld [vmem:[%s9525_s16 + $0x100] ss:$8 sps:$4 sm:$0xff]   ;;  %v7101_v32 = vld [vmem:[%s9525_s16 + $0x124] ss:$8 sps:$4 sm:$0xff]  }
 0x500   : > { %v2898_v38 = vadd.f32 %v2897_v55, %v8731_v3  ;;  %v2899_v42 = vpop.f32.mrb[110].mxu1  ;;  %3601 = vmatprep.mubr.bf16.mxu1 %v2995_v24  ;;  %v7095_v24 = vld [vmem:[%s9525_s16 + $0x104] ss:$8 sps:$4 sm:$0xff]  }
 0x501   : > { %v2900_v1 = vadd.f32 %v2899_v42, %v8715_v52  ;;  %v2901_v46 = vpop.f32.mrb[111].mxu1  ;;  %3602 = vmatmul.mubr.bf16.gmra.mrb[136].mxu1 %v2994_v27  ;;  %v2962_v63 = vmax.f32 %v2896_v53, 0.0  ;;  %v8923_v52 = vpack.c.bf16 %v4512_v7, %v4508_v51  ;;  %v7087_v27 = vld [vmem:[%s9525_s16 + $0xe0] ss:$8 sps:$4 sm:$0xff]   ;;  %v7113_v55 = vld [vmem:[%s9525_s16 + $0x164] ss:$8 sps:$4 sm:$0xff]  }
 0x502   : > { %v2902_v16 = vadd.f32 %v2901_v46, %v8731_v3  ;;  %4966 = vmatpush1.bf16.msra.mxu1 %v7081_v30  ;;  %v2963_v23 = vmax.f32 %v2898_v38, 0.0  ;;  %v7098_v30 = vld [vmem:[%s9525_s16 + $0x114] ss:$8 sps:$4 sm:$0xff]   ;;  %v7105_v53 = vld [vmem:[%s9525_s16 + $0x140] ss:$8 sps:$4 sm:$0xff]  }
 0x503   : > { %v2966_v12 = vmax.f32 %v2900_v1, 0.0  ;;  %4967 = vmatprep.subr.bf16.mxu1 %v7086_v50  ;;  %v7111_v50 = vld [vmem:[%s9525_s16 + $0x160] ss:$8 sps:$4 sm:$0xff]   ;;  %v7119_v51 = vld [vmem:[%s9525_s16 + $0x184] ss:$8 sps:$4 sm:$0xff]  }
 0x504   : > { %v2967_v22 = vmax.f32 %v2902_v16, 0.0  ;;  %v7125_v38 = vld [vmem:[%s9525_s16 + $0x1a4] ss:$8 sps:$4 sm:$0xff]   ;;  %v7123_v42 = vld [vmem:[%s9525_s16 + $0x1a0] ss:$8 sps:$4 sm:$0xff]   ;;  %v7153_v16 = vld [vmem:[%s9527_s18 + $0x70] sm:$0xff]  }
 0x505   : > { %v2998_v41 = vpack.c.bf16 %v2966_v12, %v2962_v63  ;;  %v7131_v62 = vld [vmem:[%s9525_s16 + $0x1c4] ss:$8 sps:$4 sm:$0xff]   ;;  %v7129_v1 = vld [vmem:[%s9525_s16 + $0x1c0] ss:$8 sps:$4 sm:$0xff]  }
 0x506   : > { %v2999_v3 = vpack.c.bf16 %v2967_v22, %v2963_v23  ;;  %4968 = vmatpush1.bf16.msra.mxu1 %v7084_v40  ;;  %v7137_v46 = vld [vmem:[%s9525_s16 + $0x1e4] ss:$8 sps:$4 sm:$0xff]   ;;  %v7135_v7 = vld [vmem:[%s9525_s16 + $0x1e0] ss:$8 sps:$4 sm:$0xff]   ;;  %v7154_v40 = vld [vmem:[%s9527_s18 + $0x30] sm:$0xff]  }
 0x507   : > { %4969 = vmatprep.subr.bf16.mxu1 %v7089_v21  ;;  %v3654_v12 = vld [vmem:[%s9521_s12] sm:$0x3] }
 0x508   : > { %3611 = vmatprep.mubr.bf16.mxu1 %v2999_v3 }
 0x509   : > { %3612 = vmatmul.mubr.bf16.gmra.mrb[140].mxu1 %v2998_v41  ;;  %v9122_v41 = vrot.slane %v3654_v12, %v7873_v49 }
 0x50a   : > { %4970 = vmatpush1.bf16.msra.mxu1 %v7087_v27  ;;  %4973 = vmatprep.mubr.bf16.mxu1 %v8549_v18  ;;  %v7096_v18 = vld [vmem:[%s9525_s16 + $0x110] ss:$8 sps:$4 sm:$0xff]  }
 0x50b   : > { %4971 = vmatprep.subr.bf16.mxu1 %v7092_v9 }
 0x50e   : > { %4972 = vmatpush1.bf16.msra.mxu1 %v7090_v15 }
 0x50f   : > { %5054 = vmatprep.subr.bf16.mxu1 %v7095_v24 }
 0x511   : > { %4974 = vmatmul.mubr.bf16.vlgmr.msra.gmra.mrb[144].mxu1 %v8547_v31  ;;  %v7104_v31 = vld [vmem:[%s9525_s16 + $0x134] ss:$8 sps:$4 sm:$0xff]  }
 0x512   : > { %5055 = vmatpush1.bf16.msra.mxu1 %v7093_v28  ;;  %4983 = vmatprep.mubr.bf16.mxu1 %v8573_v44  ;;  %v7102_v44 = vld [vmem:[%s9525_s16 + $0x130] ss:$8 sps:$4 sm:$0xff]  }
 0x513   : > { %5056 = vmatprep.subr.bf16.mxu1 %v7098_v30 }
 0x516   : > { %5057 = vmatpush1.bf16.msra.mxu1 %v7096_v18  ;;  %v7155_v18 = vld [vmem:[%s9527_s18 + $0x78] sm:$0xff]  }
 0x517   : > { %5058 = vmatprep.subr.bf16.mxu1 %v7101_v32 }
 0x519   : > { %4984 = vmatmul.mubr.bf16.gmra.mrb[148].mxu1 %v8568_v57  ;;  %v7110_v57 = vld [vmem:[%s9525_s16 + $0x154] ss:$8 sps:$4 sm:$0xff]  }
 0x51a   : > { %5059 = vmatpush1.bf16.msra.mxu1 %v7099_v39  ;;  %4993 = vmatprep.mubr.bf16.mxu1 %v8597_v19  ;;  %v7108_v19 = vld [vmem:[%s9525_s16 + $0x150] ss:$8 sps:$4 sm:$0xff]  }
 0x51b   : > { %5060 = vmatprep.subr.bf16.mxu1 %v7104_v31  ;;  %v7156_v31 = vld [vmem:[%s9527_s18 + $0x38] sm:$0xff]  }
 0x51e   : > { %5061 = vmatpush1.bf16.msra.mxu1 %v7102_v44 }
 0x51f   : > { %5062 = vmatprep.subr.bf16.mxu1 %v7107_v48 }
 0x521   : > { %4994 = vmatmul.mubr.bf16.gmra.mrb[152].mxu1 %v8592_v37  ;;  %v7116_v37 = vld [vmem:[%s9525_s16 + $0x174] ss:$8 sps:$4 sm:$0xff]  }
 0x522   : > { %5063 = vmatpush1.bf16.msra.mxu1 %v7105_v53  ;;  %5003 = vmatprep.mubr.bf16.mxu1 %v8621_v4  ;;  %v7114_v4 = vld [vmem:[%s9525_s16 + $0x170] ss:$8 sps:$4 sm:$0xff]  }
 0x523   : > { %5064 = vmatprep.subr.bf16.mxu1 %v7110_v57 }
 0x526   : > { %5065 = vmatpush1.bf16.msra.mxu1 %v7108_v19 }
 0x527   : > { %5066 = vmatprep.subr.bf16.mxu1 %v7113_v55 }
 0x529   : > { %5004 = vmatmul.mubr.bf16.gmra.mrb[156].mxu1 %v8616_v0  ;;  %v7122_v0 = vld [vmem:[%s9525_s16 + $0x194] ss:$8 sps:$4 sm:$0xff]  }
 0x52a   : > { %5067 = vmatpush1.bf16.msra.mxu1 %v7111_v50  ;;  %5013 = vmatprep.mubr.bf16.mxu1 %v8645_v33  ;;  %v7120_v33 = vld [vmem:[%s9525_s16 + $0x190] ss:$8 sps:$4 sm:$0xff]  }
 0x52b   : > { %5068 = vmatprep.subr.bf16.mxu1 %v7116_v37 }
 0x52e   : > { %5069 = vmatpush1.bf16.msra.mxu1 %v7114_v4 }
 0x52f   : > { %5070 = vmatprep.subr.bf16.mxu1 %v7119_v51 }
 0x531   : > { %5014 = vmatmul.mubr.bf16.gmra.mrb[160].mxu1 %v8640_v14  ;;  %v7128_v14 = vld [vmem:[%s9525_s16 + $0x1b4] ss:$8 sps:$4 sm:$0xff]  }
 0x532   : > { %5071 = vmatpush1.bf16.msra.mxu1 %v7117_v60  ;;  %5023 = vmatprep.mubr.bf16.mxu1 %v8669_v35  ;;  %v7126_v35 = vld [vmem:[%s9525_s16 + $0x1b0] ss:$8 sps:$4 sm:$0xff]  }
 0x533   : > { %5072 = vmatprep.subr.bf16.mxu1 %v7122_v0 }
 0x536   : > { %5073 = vmatpush1.bf16.msra.mxu1 %v7120_v33 }
 0x537   : > { %5074 = vmatprep.subr.bf16.mxu1 %v7125_v38 }
 0x539   : > { %5024 = vmatmul.mubr.bf16.gmra.mrb[164].mxu1 %v8664_v56  ;;  %v7134_v56 = vld [vmem:[%s9525_s16 + $0x1d4] ss:$8 sps:$4 sm:$0xff]  }
 0x53a   : > { %5075 = vmatpush1.bf16.msra.mxu1 %v7123_v42  ;;  %5033 = vmatprep.mubr.bf16.mxu1 %v8693_v13  ;;  %v7132_v13 = vld [vmem:[%s9525_s16 + $0x1d0] ss:$8 sps:$4 sm:$0xff]  }
 0x53b   : > { %5076 = vmatprep.subr.bf16.mxu1 %v7128_v14 }
 0x53e   : > { %5077 = vmatpush1.bf16.msra.mxu1 %v7126_v35 }
 0x53f   : > { %5078 = vmatprep.subr.bf16.mxu1 %v7131_v62 }
 0x541   : > { %5034 = vmatmul.mubr.bf16.gmra.mrb[168].mxu1 %v8688_v6  ;;  %v7140_v6 = vld [vmem:[%s9525_s16 + $0x1f4] ss:$8 sps:$4 sm:$0xff]  }
 0x542   : > { %5079 = vmatpush1.bf16.msra.mxu1 %v7129_v1  ;;  %5043 = vmatprep.mubr.bf16.mxu1 %v8725_v61  ;;  %v7138_v61 = vld [vmem:[%s9525_s16 + $0x1f0] ss:$8 sps:$4 sm:$0xff]  }
 0x543   : > { %5080 = vmatprep.subr.bf16.mxu1 %v7134_v56 }
 0x546   : > { %5081 = vmatpush1.bf16.msra.mxu1 %v7132_v13 }
 0x547   : > { %5082 = vmatprep.subr.bf16.mxu1 %v7137_v46 }
 0x549   : > { %5044 = vmatmul.mubr.bf16.gmra.mrb[172].mxu1 %v8717_v59  ;;  %v7141_v59 = vld [vmem:[%s9527_s18 + $0x40] sm:$0xff]  }
 0x54a   : > { %5083 = vmatpush1.bf16.msra.mxu1 %v7135_v7  ;;  %5086 = vmatprep.mubr.bf16.mxu1 %v8755_v34  ;;  %v7142_v34 = vld [vmem:[%s9527_s18] sm:$0xff]  }
 0x54b   : > { %5084 = vmatprep.subr.bf16.mxu1 %v7140_v6  ;;  %6249 = vmatprep.subr.bf16.mxu0 %v7141_v59 }
 0x54c   : > { %6250 = vmatpush3.bf16.msra.mxu0 %v7142_v34 }
 0x54e   : > { %5085 = vmatpush1.bf16.msra.mxu1 %v7138_v61 }
 0x551   : > { %5087 = vmatmul.mubr.bf16.vlgmr.msra.gmra.mrb[144].mxu1 %v8750_v29  ;;  %v7143_v29 = vld [vmem:[%s9527_s18 + $0x48] sm:$0xff]  }
 0x552   : > { %5096 = vmatprep.mubr.bf16.mxu1 %v8779_v2  ;;  %6251 = vmatprep.subr.bf16.mxu0 %v7143_v29  ;;  %v7145_v2 = vld [vmem:[%s9527_s18 + $0x50] sm:$0xff]  }
 0x559   : > { %5097 = vmatmul.mubr.bf16.gmra.mrb[148].mxu1 %v8774_v26  ;;  %v7144_v26 = vld [vmem:[%s9527_s18 + $0x8] sm:$0xff]  }
 0x55a   : > { %5106 = vmatprep.mubr.bf16.mxu1 %v8803_v20  ;;  %6252 = vmatpush3.bf16.msra.mxu0 %v7144_v26  ;;  %v7147_v20 = vld [vmem:[%s9527_s18 + $0x58] sm:$0xff]  }
 0x55b   : > { %6253 = vmatprep.subr.bf16.mxu0 %v7145_v2 }
 0x561   : > { %5107 = vmatmul.mubr.bf16.gmra.mrb[152].mxu1 %v8798_v58  ;;  %v7146_v58 = vld [vmem:[%s9527_s18 + $0x10] sm:$0xff]  }
 0x562   : > { %5116 = vmatprep.mubr.bf16.mxu1 %v8827_v43  ;;  %6254 = vmatpush3.bf16.msra.mxu0 %v7146_v58  ;;  %v7149_v43 = vld [vmem:[%s9527_s18 + $0x60] sm:$0xff]  }
 0x563   : > { %6255 = vmatprep.subr.bf16.mxu0 %v7147_v20 }
 0x569   : > { %5117 = vmatmul.mubr.bf16.gmra.mrb[156].mxu1 %v8822_v10  ;;  %v7148_v10 = vld [vmem:[%s9527_s18 + $0x18] sm:$0xff]  }
 0x56a   : > { %5126 = vmatprep.mubr.bf16.mxu1 %v8851_v17  ;;  %6256 = vmatpush3.bf16.msra.mxu0 %v7148_v10  ;;  %v7150_v17 = vld [vmem:[%s9527_s18 + $0x20] sm:$0xff]  }
 0x56b   : > { %6257 = vmatprep.subr.bf16.mxu0 %v7149_v43 }
 0x56e   : > { %6258 = vmatpush3.bf16.msra.mxu0 %v7150_v17 }
 0x571   : > { %5127 = vmatmul.mubr.bf16.gmra.mrb[160].mxu1 %v8846_v5  ;;  %v7151_v5 = vld [vmem:[%s9527_s18 + $0x68] sm:$0xff]  }
 0x572   : > { %5136 = vmatprep.mubr.bf16.mxu1 %v8875_v25  ;;  %v7152_v25 = vld [vmem:[%s9527_s18 + $0x28] sm:$0xff]   ;;  %6259 = vmatprep.subr.bf16.mxu0 %v7151_v5 }
 0x573   : > { %6260 = vmatpush3.bf16.msra.mxu0 %v7152_v25 }
 0x574   : > { %6261 = vmatprep.subr.bf16.mxu0 %v7153_v16 }
 0x577   : > { %6262 = vmatpush3.bf16.msra.mxu0 %v7154_v40 }
 0x578   : > { %6263 = vmatprep.subr.bf16.mxu0 %v7155_v18 }
 0x579   : > { %5137 = vmatmul.mubr.bf16.gmra.mrb[164].mxu1 %v8870_v11  ;;  %v3064_v11 = vld [vmem:[%s9520_s11] sm:$0x3] }
 0x57a   : > { %5146 = vmatprep.mubr.bf16.mxu1 %v8899_v36  ;;  %v9108_v36 = vrot.slane %v3064_v11, %v7867_v47  ;;  %v9111_v63 = vrot.slane %v3064_v11, %v7873_v49 }
 0x57b   : > { %6264 = vmatpush3.bf16.msra.mxu0 %v7156_v31 }
 0x581   : > { %5147 = vmatmul.mubr.bf16.gmra.mrb[168].mxu1 %v8894_v8 }
 0x582   : > { %5156 = vmatprep.mubr.bf16.mxu1 %v8923_v52 }
 0x589   : > { %5157 = vmatmul.mubr.bf16.gmra.mrb[172].mxu1 %v8918_v54  ;;  %v9118_v54 = vrot.slane %v3654_v12, %v7867_v47 }
 0x5a4   : > { %v3543_v8 = vpop.f32.mrb[112].mxu1 }
 0x5a5   : > { %v6377_v21 = vadd.f32 %v3543_v8, %v9108_v36  ;;  %v3545_v52 = vpop.f32.mrb[113].mxu1 }
 0x5a6   : > { %v6378_v23 = vadd.f32 %v3545_v52, %v9111_v63  ;;  %v3547_v22 = vpop.f32.mrb[114].mxu1 }
 0x5a7   : > { %v3622_v3 = vmax.f32 %v6377_v21, 0.0  ;;  %v6379_v27 = vadd.f32 %v3547_v22, %v9108_v36  ;;  %v3549_v9 = vpop.f32.mrb[115].mxu1 }
 0x5a8   : > { %v3623_v15 = vmax.f32 %v6378_v23, 0.0  ;;  %v6380_v24 = vadd.f32 %v3549_v9, %v9111_v63 }
 0x5a9   : > { %v3624_v28 = vmax.f32 %v6379_v27, 0.0  ;;  %v3666_v30 = vmul.f32 %v9118_v54, %v3622_v3 }
 0x5aa   : > { %v3625_v32 = vmax.f32 %v6380_v24, 0.0  ;;  %v3667_v39 = vmul.f32 %v9122_v41, %v3623_v15 }
 0x5ab   : > { %v3668_v44 = vmul.f32 %v9118_v54, %v3624_v28 }
 0x5ac   : > { %v3669_v48 = vmul.f32 %v9122_v41, %v3625_v32  ;;  %v3553_v53 = vpop.f32.mrb[116].mxu1  ;;  %v3698_v57 = vadd.f32 %v3667_v39, %v3666_v30 }
 0x5ad   : > { %v6381_v19 = vadd.f32 %v3553_v53, %v9108_v36  ;;  %v3555_v55 = vpop.f32.mrb[117].mxu1 }
 0x5ae   : > { %v6382_v50 = vadd.f32 %v3555_v55, %v9111_v63  ;;  %v3557_v37 = vpop.f32.mrb[118].mxu1  ;;  %3699 = vadd.xlane.f32.xlu0 %v3698_v57  ;;  %v3701_v4 = vadd.f32 %v3669_v48, %v3668_v44 }
 0x5af   : > { %v3626_v51 = vmax.f32 %v6381_v19, 0.0  ;;  %v6383_v60 = vadd.f32 %v3557_v37, %v9108_v36  ;;  %v3559_v0 = vpop.f32.mrb[119].mxu1 }
 0x5b0   : > { %v3627_v33 = vmax.f32 %v6382_v50, 0.0  ;;  %v6384_v38 = vadd.f32 %v3559_v0, %v9111_v63 }
 0x5b1   : > { %v3628_v42 = vmax.f32 %v6383_v60, 0.0  ;;  %v3670_v14 = vmul.f32 %v9118_v54, %v3626_v51 }
 0x5b2   : > { %v3629_v35 = vmax.f32 %v6384_v38, 0.0  ;;  %3702 = vadd.xlane.f32.xlu0 %v3701_v4  ;;  %v3671_v62 = vmul.f32 %v9122_v41, %v3627_v33 }
 0x5b3   : > { %v3672_v1 = vmul.f32 %v9118_v54, %v3628_v42 }
 0x5b4   : > { %v3673_v56 = vmul.f32 %v9122_v41, %v3629_v35  ;;  %v3563_v13 = vpop.f32.mrb[120].mxu1  ;;  %v3704_v46 = vadd.f32 %v3671_v62, %v3670_v14 }
 0x5b5   : > { %v6385_v7 = vadd.f32 %v3563_v13, %v9108_v36  ;;  %v3565_v6 = vpop.f32.mrb[121].mxu1 }
 0x5b6   : > { %v6386_v61 = vadd.f32 %v3565_v6, %v9111_v63  ;;  %v3567_v59 = vpop.f32.mrb[122].mxu1  ;;  %3705 = vadd.xlane.f32.xlu1 %v3704_v46  ;;  %v3707_v34 = vadd.f32 %v3673_v56, %v3672_v1 }
 0x5b7   : > { %v3630_v29 = vmax.f32 %v6385_v7, 0.0  ;;  %v6387_v26 = vadd.f32 %v3567_v59, %v9108_v36  ;;  %v3569_v2 = vpop.f32.mrb[123].mxu1 }
 0x5b8   : > { %v3631_v58 = vmax.f32 %v6386_v61, 0.0  ;;  %v6388_v20 = vadd.f32 %v3569_v2, %v9111_v63 }
 0x5b9   : > { %v3674_v10 = vmul.f32 %v9118_v54, %v3630_v29  ;;  %v3632_v43 = vmax.f32 %v6387_v26, 0.0 }
 0x5ba   : > { %v3675_v17 = vmul.f32 %v9122_v41, %v3631_v58  ;;  %v3633_v5 = vmax.f32 %v6388_v20, 0.0  ;;  %3708 = vadd.xlane.f32.xlu1 %v3707_v34 }
 0x5bb   : > { %v3676_v25 = vmul.f32 %v9118_v54, %v3632_v43 }
 0x5bc   : > { %v3677_v16 = vmul.f32 %v9122_v41, %v3633_v5  ;;  %v3573_v40 = vpop.f32.mrb[124].mxu1  ;;  %v3710_v11 = vadd.f32 %v3675_v17, %v3674_v10 }
 0x5bd   : > { %v6389_v12 = vadd.f32 %v3573_v40, %v9108_v36  ;;  %v3575_v8 = vpop.f32.mrb[125].mxu1 }
 0x5be   : > { %v6390_v21 = vadd.f32 %v3575_v8, %v9111_v63  ;;  %v3577_v52 = vpop.f32.mrb[126].mxu1  ;;  %3711 = vadd.xlane.f32.xlu0 %v3710_v11  ;;  %v3713_v23 = vadd.f32 %v3677_v16, %v3676_v25 }
 0x5bf   : > { %v3634_v22 = vmax.f32 %v6389_v12, 0.0  ;;  %v6391_v3 = vadd.f32 %v3577_v52, %v9108_v36  ;;  %v3579_v27 = vpop.f32.mrb[127].mxu1 }
 0x5c0   : > { %v3635_v9 = vmax.f32 %v6390_v21, 0.0  ;;  %v6392_v15 = vadd.f32 %v3579_v27, %v9111_v63  ;;  %3714 = vadd.xlane.f32.xlu1 %v3713_v23 }
 0x5c1   : > { %v3678_v24 = vmul.f32 %v9118_v54, %v3634_v22  ;;  %v3636_v28 = vmax.f32 %v6391_v3, 0.0 }
 0x5c2   : > { %v3679_v30 = vmul.f32 %v9122_v41, %v3635_v9  ;;  %v3637_v18 = vmax.f32 %v6392_v15, 0.0 }
 0x5c3   : > { %v3680_v32 = vmul.f32 %v9118_v54, %v3636_v28 }
 0x5c4   : > { %v3681_v39 = vmul.f32 %v9122_v41, %v3637_v18  ;;  %v3583_v31 = vpop.f32.mrb[128].mxu1  ;;  %v3716_v44 = vadd.f32 %v3679_v30, %v3678_v24 }
 0x5c5   : > { %v6393_v48 = vadd.f32 %v3583_v31, %v9108_v36  ;;  %v3585_v53 = vpop.f32.mrb[129].mxu1 }
 0x5c6   : > { %v6394_v57 = vadd.f32 %v3585_v53, %v9111_v63  ;;  %v3587_v19 = vpop.f32.mrb[130].mxu1  ;;  %3717 = vadd.xlane.f32.xlu0 %v3716_v44  ;;  %v3719_v55 = vadd.f32 %v3681_v39, %v3680_v32 }
 0x5c7   : > { %v3638_v50 = vmax.f32 %v6393_v48, 0.0  ;;  %v6395_v37 = vadd.f32 %v3587_v19, %v9108_v36  ;;  %v3589_v4 = vpop.f32.mrb[131].mxu1 }
 0x5c8   : > { %v3639_v51 = vmax.f32 %v6394_v57, 0.0  ;;  %v6396_v60 = vadd.f32 %v3589_v4, %v9111_v63  ;;  %3720 = vadd.xlane.f32.xlu1 %v3719_v55 }
 0x5c9   : > { %v3682_v0 = vmul.f32 %v9118_v54, %v3638_v50  ;;  %v3640_v33 = vmax.f32 %v6395_v37, 0.0 }
 0x5ca   : > { %v3683_v38 = vmul.f32 %v9122_v41, %v3639_v51  ;;  %v3641_v42 = vmax.f32 %v6396_v60, 0.0 }
 0x5cb   : > { %v3684_v14 = vmul.f32 %v9118_v54, %v3640_v33 }
 0x5cc   : > { %v3685_v35 = vmul.f32 %v9122_v41, %v3641_v42  ;;  %v3593_v62 = vpop.f32.mrb[132].mxu1  ;;  %v3722_v1 = vadd.f32 %v3683_v38, %v3682_v0 }
 0x5cd   : > { %v6397_v56 = vadd.f32 %v3593_v62, %v9108_v36  ;;  %v3595_v13 = vpop.f32.mrb[133].mxu1 }
 0x5ce   : > { %v6398_v46 = vadd.f32 %v3595_v13, %v9111_v63  ;;  %v3597_v7 = vpop.f32.mrb[134].mxu1  ;;  %3723 = vadd.xlane.f32.xlu0 %v3722_v1  ;;  %v3725_v6 = vadd.f32 %v3685_v35, %v3684_v14 }
 0x5cf   : > { %v3642_v61 = vmax.f32 %v6397_v56, 0.0  ;;  %v6399_v59 = vadd.f32 %v3597_v7, %v9108_v36  ;;  %v3599_v34 = vpop.f32.mrb[135].mxu1 }
 0x5d0   : > { %v3643_v29 = vmax.f32 %v6398_v46, 0.0  ;;  %v6400_v26 = vadd.f32 %v3599_v34, %v9111_v63  ;;  %3726 = vadd.xlane.f32.xlu1 %v3725_v6 }
 0x5d1   : > { %v3686_v2 = vmul.f32 %v9118_v54, %v3642_v61  ;;  %v3644_v58 = vmax.f32 %v6399_v59, 0.0 }
 0x5d2   : > { %v3687_v20 = vmul.f32 %v9122_v41, %v3643_v29  ;;  %v3645_v10 = vmax.f32 %v6400_v26, 0.0 }
 0x5d3   : > { %v3688_v43 = vmul.f32 %v9118_v54, %v3644_v58 }
 0x5d4   : > { %v3689_v17 = vmul.f32 %v9122_v41, %v3645_v10  ;;  %v3603_v5 = vpop.f32.mrb[136].mxu1  ;;  %v3728_v25 = vadd.f32 %v3687_v20, %v3686_v2 }
 0x5d5   : > { %v6401_v16 = vadd.f32 %v3603_v5, %v9108_v36  ;;  %v3605_v40 = vpop.f32.mrb[137].mxu1 }
 0x5d6   : > { %v6402_v11 = vadd.f32 %v3605_v40, %v9111_v63  ;;  %v3607_v12 = vpop.f32.mrb[138].mxu1  ;;  %3729 = vadd.xlane.f32.xlu0 %v3728_v25  ;;  %v3731_v8 = vadd.f32 %v3689_v17, %v3688_v43 }
 0x5d7   : > { %v3646_v21 = vmax.f32 %v6401_v16, 0.0  ;;  %v6403_v52 = vadd.f32 %v3607_v12, %v9108_v36  ;;  %v3609_v23 = vpop.f32.mrb[139].mxu1 }
 0x5d8   : > { %v3647_v22 = vmax.f32 %v6402_v11, 0.0  ;;  %v6404_v3 = vadd.f32 %v3609_v23, %v9111_v63  ;;  %3732 = vadd.xlane.f32.xlu1 %v3731_v8 }
 0x5d9   : > { %v3690_v27 = vmul.f32 %v9118_v54, %v3646_v21  ;;  %v3648_v9 = vmax.f32 %v6403_v52, 0.0 }
 0x5da   : > { %v3691_v15 = vmul.f32 %v9122_v41, %v3647_v22  ;;  %v3649_v24 = vmax.f32 %v6404_v3, 0.0 }
 0x5db   : > { %v3692_v28 = vmul.f32 %v9118_v54, %v3648_v9 }
 0x5dc   : > { %v3693_v30 = vmul.f32 %v9122_v41, %v3649_v24  ;;  %v3613_v18 = vpop.f32.mrb[140].mxu1  ;;  %v3734_v32 = vadd.f32 %v3691_v15, %v3690_v27 }
 0x5dd   : > { %v6405_v39 = vadd.f32 %v3613_v18, %v9108_v36  ;;  %v3615_v31 = vpop.f32.mrb[141].mxu1 }
 0x5de   : > { %v6406_v44 = vadd.f32 %v3615_v31, %v9111_v63  ;;  %v3617_v48 = vpop.f32.mrb[142].mxu1  ;;  %3735 = vadd.xlane.f32.xlu0 %v3734_v32  ;;  %v3737_v53 = vadd.f32 %v3693_v30, %v3692_v28  ;;  %v9213_v28 = vld [vmem:[#allocation2] ss:$0 sm:$0xff] }
 0x5df   : > { %v3650_v57 = vmax.f32 %v6405_v39, 0.0  ;;  %v6407_v19 = vadd.f32 %v3617_v48, %v9108_v36  ;;  %v3619_v55 = vpop.f32.mrb[143].mxu1  ;;  %v4609_v36 = vld [vmem:[%s9526_s17] sm:$0x3] }
 0x5e0   : > { %v3651_v50 = vmax.f32 %v6406_v44, 0.0  ;;  %v6408_v37 = vadd.f32 %v3619_v55, %v9111_v63  ;;  %3738 = vadd.xlane.f32.xlu1 %v3737_v53  ;;  %v9196_v63 = vrot.slane %v4609_v36, %v7867_v47  ;;  %v9199_v35 = vrot.slane %v4609_v36, %v7873_v49 }
 0x5e1   : > { %v3694_v4 = vmul.f32 %v9118_v54, %v3650_v57  ;;  %v3652_v51 = vmax.f32 %v6407_v19, 0.0 }
 0x5e2   : > { %v3695_v60 = vmul.f32 %v9122_v41, %v3651_v50  ;;  %v3653_v0 = vmax.f32 %v6408_v37, 0.0 }
 0x5e3   : > { %v3696_v33 = vmul.f32 %v9118_v54, %v3652_v51 }
 0x5e4   : > { %v3697_v38 = vmul.f32 %v9122_v41, %v3653_v0  ;;  %v3740_v42 = vadd.f32 %v3695_v60, %v3694_v4 }
 0x5e6   : > { %3741 = vadd.xlane.f32.xlu0 %v3740_v42  ;;  %v3743_v14 = vadd.f32 %v3697_v38, %v3696_v33 }
 0x5e8   : > { %3744 = vadd.xlane.f32.xlu1 %v3743_v14 }
 0x624   : > { %v5088_v62 = vpop.f32.mrb[144].mxu1 }
 0x625   : > { %v6409_v1 = vadd.f32 %v5088_v62, %v9196_v63  ;;  %v5090_v54 = vpop.f32.mrb[145].mxu1 }
 0x626   : > { %v6410_v41 = vadd.f32 %v5090_v54, %v9199_v35  ;;  %v5092_v56 = vpop.f32.mrb[146].mxu1 }
 0x627   : > { %v6411_v13 = vadd.f32 %v5092_v56, %v9196_v63  ;;  %v5094_v46 = vpop.f32.mrb[147].mxu1  ;;  %v5167_v6 = vmax.f32 %v6409_v1, 0.0 }
 0x628   : > { %v6412_v7 = vadd.f32 %v5094_v46, %v9199_v35  ;;  %v5168_v59 = vmax.f32 %v6410_v41, 0.0 }
 0x629   : > { %v5169_v61 = vmax.f32 %v6411_v13, 0.0 }
 0x62a   : > { %v5170_v47 = vmax.f32 %v6412_v7, 0.0 }
 0x62b   : > { %v5199_v34 = vpack.c.bf16 %v5169_v61, %v5167_v6 }
 0x62c   : > { %v5200_v29 = vpack.c.bf16 %v5170_v47, %v5168_v59  ;;  %v5098_v49 = vpop.f32.mrb[148].mxu1 }
 0x62d   : > { %v6413_v26 = vadd.f32 %v5098_v49, %v9196_v63  ;;  %v5100_v2 = vpop.f32.mrb[149].mxu1 }
 0x62e   : > { %v6414_v58 = vadd.f32 %v5100_v2, %v9199_v35  ;;  %v5102_v20 = vpop.f32.mrb[150].mxu1  ;;  %5382 = vmatprep.mubr.bf16.mxu0 %v5200_v29 }
 0x62f   : > { %v6415_v10 = vadd.f32 %v5102_v20, %v9196_v63  ;;  %v5104_v43 = vpop.f32.mrb[151].mxu1  ;;  %5383 = vmatmul.mubr.bf16.vlgmr.msra.gmra.mrb[96].mxu0 %v5199_v34  ;;  %v5171_v5 = vmax.f32 %v6413_v26, 0.0 }
 0x630   : > { %v6416_v17 = vadd.f32 %v5104_v43, %v9199_v35  ;;  %v5172_v16 = vmax.f32 %v6414_v58, 0.0 }
 0x631   : > { %v5173_v25 = vmax.f32 %v6415_v10, 0.0 }
 0x632   : > { %v5174_v40 = vmax.f32 %v6416_v17, 0.0 }
 0x633   : > { %v5201_v11 = vpack.c.bf16 %v5173_v25, %v5171_v5 }
 0x634   : > { %v5202_v12 = vpack.c.bf16 %v5174_v40, %v5172_v16  ;;  %v5108_v8 = vpop.f32.mrb[152].mxu1 }
 0x635   : > { %v6417_v21 = vadd.f32 %v5108_v8, %v9196_v63  ;;  %v5110_v52 = vpop.f32.mrb[153].mxu1 }
 0x636   : > { %v6418_v23 = vadd.f32 %v5110_v52, %v9199_v35  ;;  %v5112_v22 = vpop.f32.mrb[154].mxu1  ;;  %5390 = vmatprep.mubr.bf16.mxu0 %v5202_v12 }
 0x637   : > { %v6419_v3 = vadd.f32 %v5112_v22, %v9196_v63  ;;  %v5114_v27 = vpop.f32.mrb[155].mxu1  ;;  %5391 = vmatmul.mubr.bf16.gmra.mrb[100].mxu0 %v5201_v11  ;;  %v5175_v15 = vmax.f32 %v6417_v21, 0.0 }
 0x638   : > { %v6420_v9 = vadd.f32 %v5114_v27, %v9199_v35  ;;  %v5176_v30 = vmax.f32 %v6418_v23, 0.0 }
 0x639   : > { %v5177_v24 = vmax.f32 %v6419_v3, 0.0 }
 0x63a   : > { %v5178_v18 = vmax.f32 %v6420_v9, 0.0 }
 0x63b   : > { %v5203_v32 = vpack.c.bf16 %v5177_v24, %v5175_v15  ;;  %v3700_v39 = vpop.xlane.xlu0 %3699 }
 0x63c   : > { %v5204_v31 = vpack.c.bf16 %v5178_v18, %v5176_v30  ;;  %v3753_v44 = vadd.f32 %v9213_v28, %v3700_v39  ;;  %v5118_v48 = vpop.f32.mrb[156].mxu1 }
 0x63d   : > { %v6421_v53 = vadd.f32 %v5118_v48, %v9196_v63  ;;  %v5120_v57 = vpop.f32.mrb[157].mxu1 }
 0x63e   : > { %v6422_v19 = vadd.f32 %v5120_v57, %v9199_v35  ;;  %v5122_v55 = vpop.f32.mrb[158].mxu1  ;;  %5398 = vmatprep.mubr.bf16.mxu0 %v5204_v31  ;;  %5595 = vperm.xlu0 %6611, %v3753_v44  }
 0x63f   : > { %v6423_v50 = vadd.f32 %v5122_v55, %v9196_v63  ;;  %v5124_v37 = vpop.f32.mrb[159].mxu1  ;;  %5399 = vmatmul.mubr.bf16.gmra.mrb[104].mxu0 %v5203_v32  ;;  %v3703_v4 = vpop.xlane.xlu0 %3702  ;;  %v5179_v0 = vmax.f32 %v6421_v53, 0.0 }
 0x640   : > { %v6424_v51 = vadd.f32 %v5124_v37, %v9199_v35  ;;  %v3754_v60 = vadd.f32 %v9213_v28, %v3703_v4  ;;  %v5180_v38 = vmax.f32 %v6422_v19, 0.0 }
 0x641   : > { %v5181_v33 = vmax.f32 %v6423_v50, 0.0 }
 0x642   : > { %v5182_v42 = vmax.f32 %v6424_v51, 0.0  ;;  %5600 = vperm.xlu1 %6612, %v3754_v60  }
 0x643   : > { %v5205_v14 = vpack.c.bf16 %v5181_v33, %v5179_v0  ;;  %v3706_v36 = vpop.xlane.xlu1 %3705 }
 0x644   : > { %v5206_v62 = vpack.c.bf16 %v5182_v42, %v5180_v38  ;;  %v3755_v1 = vadd.f32 %v9213_v28, %v3706_v36  ;;  %v5128_v54 = vpop.f32.mrb[160].mxu1 }
 0x645   : > { %v6425_v41 = vadd.f32 %v5128_v54, %v9196_v63  ;;  %v5130_v56 = vpop.f32.mrb[161].mxu1 }
 0x646   : > { %v6426_v13 = vadd.f32 %v5130_v56, %v9199_v35  ;;  %v5132_v46 = vpop.f32.mrb[162].mxu1  ;;  %5406 = vmatprep.mubr.bf16.mxu0 %v5206_v62  ;;  %5605 = vperm.xlu1 %6612, %v3755_v1  }
 0x647   : > { %v6427_v7 = vadd.f32 %v5132_v46, %v9196_v63  ;;  %v5134_v6 = vpop.f32.mrb[163].mxu1  ;;  %5407 = vmatmul.mubr.bf16.gmra.mrb[108].mxu0 %v5205_v14  ;;  %v3709_v61 = vpop.xlane.xlu1 %3708  ;;  %v5183_v34 = vmax.f32 %v6425_v41, 0.0 }
 0x648   : > { %v6428_v59 = vadd.f32 %v5134_v6, %v9199_v35  ;;  %v3756_v47 = vadd.f32 %v9213_v28, %v3709_v61  ;;  %v5184_v49 = vmax.f32 %v6426_v13, 0.0 }
 0x649   : > { %v5185_v29 = vmax.f32 %v6427_v7, 0.0 }
 0x64a   : > { %v5186_v26 = vmax.f32 %v6428_v59, 0.0  ;;  %5610 = vperm.xlu1 %6612, %v3756_v47  }
 0x64b   : > { %v5207_v2 = vpack.c.bf16 %v5185_v29, %v5183_v34  ;;  %v3712_v58 = vpop.xlane.xlu0 %3711 }
 0x64c   : > { %v5208_v20 = vpack.c.bf16 %v5186_v26, %v5184_v49  ;;  %v3757_v10 = vadd.f32 %v9213_v28, %v3712_v58  ;;  %v5138_v43 = vpop.f32.mrb[164].mxu1 }
 0x64d   : > { %v6429_v17 = vadd.f32 %v5138_v43, %v9196_v63  ;;  %v5140_v5 = vpop.f32.mrb[165].mxu1  ;;  %v3715_v25 = vpop.xlane.xlu1 %3714 }
 0x64e   : > { %v6430_v16 = vadd.f32 %v5140_v5, %v9199_v35  ;;  %v5142_v40 = vpop.f32.mrb[166].mxu1  ;;  %5414 = vmatprep.mubr.bf16.mxu0 %v5208_v20  ;;  %5615 = vperm.xlu1 %6612, %v3757_v10   ;;  %v3758_v8 = vadd.f32 %v9213_v28, %v3715_v25 }
 0x64f   : > { %v6431_v11 = vadd.f32 %v5142_v40, %v9196_v63  ;;  %v5144_v12 = vpop.f32.mrb[167].mxu1  ;;  %5415 = vmatmul.mubr.bf16.gmra.mrb[112].mxu0 %v5207_v2  ;;  %v5187_v52 = vmax.f32 %v6429_v17, 0.0 }
 0x650   : > { %v6432_v21 = vadd.f32 %v5144_v12, %v9199_v35  ;;  %v5188_v22 = vmax.f32 %v6430_v16, 0.0 }
 0x651   : > { %v5189_v23 = vmax.f32 %v6431_v11, 0.0 }
 0x652   : > { %v5190_v3 = vmax.f32 %v6432_v21, 0.0  ;;  %5620 = vperm.xlu1 %6612, %v3758_v8  }
 0x653   : > { %v5209_v27 = vpack.c.bf16 %v5189_v23, %v5187_v52  ;;  %v3718_v9 = vpop.xlane.xlu0 %3717 }
 0x654   : > { %v5210_v15 = vpack.c.bf16 %v5190_v3, %v5188_v22  ;;  %v3759_v24 = vadd.f32 %v9213_v28, %v3718_v9  ;;  %v5148_v30 = vpop.f32.mrb[168].mxu1 }
 0x655   : > { %v6433_v18 = vadd.f32 %v5148_v30, %v9196_v63  ;;  %v5150_v32 = vpop.f32.mrb[169].mxu1  ;;  %v3721_v39 = vpop.xlane.xlu1 %3720 }
 0x656   : > { %v6434_v31 = vadd.f32 %v5150_v32, %v9199_v35  ;;  %v5152_v44 = vpop.f32.mrb[170].mxu1  ;;  %5422 = vmatprep.mubr.bf16.mxu0 %v5210_v15  ;;  %5625 = vperm.xlu1 %6612, %v3759_v24   ;;  %v3760_v57 = vadd.f32 %v9213_v28, %v3721_v39 }
 0x657   : > { %v6435_v48 = vadd.f32 %v5152_v44, %v9196_v63  ;;  %v5154_v53 = vpop.f32.mrb[171].mxu1  ;;  %5423 = vmatmul.mubr.bf16.gmra.mrb[116].mxu0 %v5209_v27  ;;  %v5191_v55 = vmax.f32 %v6433_v18, 0.0 }
 0x658   : > { %v6436_v19 = vadd.f32 %v5154_v53, %v9199_v35  ;;  %v5192_v37 = vmax.f32 %v6434_v31, 0.0 }
 0x659   : > { %v5193_v50 = vmax.f32 %v6435_v48, 0.0 }
 0x65a   : > { %v5194_v4 = vmax.f32 %v6436_v19, 0.0  ;;  %5630 = vperm.xlu1 %6612, %v3760_v57  }
 0x65b   : > { %v5211_v51 = vpack.c.bf16 %v5193_v50, %v5191_v55  ;;  %v3724_v60 = vpop.xlane.xlu0 %3723 }
 0x65c   : > { %v5212_v0 = vpack.c.bf16 %v5194_v4, %v5192_v37  ;;  %v3761_v33 = vadd.f32 %v9213_v28, %v3724_v60  ;;  %v5158_v38 = vpop.f32.mrb[172].mxu1 }
 0x65d   : > { %v6437_v42 = vadd.f32 %v5158_v38, %v9196_v63  ;;  %v5160_v14 = vpop.f32.mrb[173].mxu1  ;;  %v3727_v36 = vpop.xlane.xlu1 %3726 }
 0x65e   : > { %v6438_v62 = vadd.f32 %v5160_v14, %v9199_v35  ;;  %v3762_v1 = vadd.f32 %v9213_v28, %v3727_v36  ;;  %v5162_v54 = vpop.f32.mrb[174].mxu1  ;;  %5430 = vmatprep.mubr.bf16.mxu0 %v5212_v0  ;;  %5635 = vperm.xlu1 %6612, %v3761_v33  }
 0x65f   : > { %v6439_v41 = vadd.f32 %v5162_v54, %v9196_v63  ;;  %v5164_v56 = vpop.f32.mrb[175].mxu1  ;;  %5431 = vmatmul.mubr.bf16.gmra.mrb[120].mxu0 %v5211_v51  ;;  %v5195_v46 = vmax.f32 %v6437_v42, 0.0 }
 0x660   : > { %v6440_v13 = vadd.f32 %v5164_v56, %v9199_v35  ;;  %5640 = vperm.xlu0 %6611, %v3762_v1   ;;  %v5196_v6 = vmax.f32 %v6438_v62, 0.0  ;;  %v9250_v35 = vld [vmem:[%s9528_s19] ss:$0 sm:$0xff] }
 0x661   : > { %v5197_v7 = vmax.f32 %v6439_v41, 0.0 }
 0x662   : > { %v5198_v61 = vmax.f32 %v6440_v13, 0.0 }
 0x663   : > { %v5213_v59 = vpack.c.bf16 %v5197_v7, %v5195_v46  ;;  %v3730_v47 = vpop.xlane.xlu0 %3729 }
 0x664   : > { %v5214_v34 = vpack.c.bf16 %v5198_v61, %v5196_v6  ;;  %v3763_v29 = vadd.f32 %v9213_v28, %v3730_v47 }
 0x665   : > { %v3733_v49 = vpop.xlane.xlu1 %3732 }
 0x666   : > { %v3764_v26 = vadd.f32 %v9213_v28, %v3733_v49  ;;  %5438 = vmatprep.mubr.bf16.mxu0 %v5214_v34  ;;  %5645 = vperm.xlu1 %6612, %v3763_v29  }
 0x667   : > { %5439 = vmatmul.mubr.bf16.gmra.mrb[124].mxu0 %v5213_v59 }
 0x668   : > { %5650 = vperm.xlu0 %6611, %v3764_v26  }
 0x702   : > { %v6265_v63 = vpop.f32.mrb[96].mxu0 }
 0x703   : > { %v6266_v2 = vpop.f32.mrb[97].mxu0 }
 0x704   : > { %v6267_v58 = vadd.f32 %v6266_v2, %v6265_v63  ;;  %v6268_v20 = vpop.f32.mrb[98].mxu0 }
 0x705   : > { %v6269_v10 = vpop.f32.mrb[99].mxu0 }
 0x706   : > { %v6270_v43 = vadd.f32 %v6269_v10, %v6268_v20  ;;  %v9253_v17 = vadd.f32 %v6267_v58, %v9250_v35  ;;  %v3736_v20 = vpop.xlane.xlu0 %3735 }
 0x707   : > { %v3765_v10 = vadd.f32 %v9213_v28, %v3736_v20 }
 0x708   : > { %5447 = vmax.xlane.f32.xlu1 %v9253_v17  ;;  %v9257_v5 = vadd.f32 %v6270_v43, %v9250_v35  ;;  %v3739_v43 = vpop.xlane.xlu1 %3738 }
 0x70a   : > { %v6271_v25 = vpop.f32.mrb[100].mxu0  ;;  %5449 = vmax.xlane.f32.xlu0 %v9257_v5 }
 0x70b   : > { %v6272_v16 = vpop.f32.mrb[101].mxu0 }
 0x70c   : > { %v6273_v40 = vadd.f32 %v6272_v16, %v6271_v25  ;;  %v6274_v11 = vpop.f32.mrb[102].mxu0  ;;  %v3766_v25 = vadd.f32 %v9213_v28, %v3739_v43  ;;  %v9318_v16 = vpop.xlane.xlu1 %3744 }
 0x70d   : > { %v6275_v12 = vpop.f32.mrb[103].mxu0 }
 0x70e   : > { %v6276_v8 = vadd.f32 %v6275_v12, %v6274_v11  ;;  %v9261_v21 = vadd.f32 %v6273_v40, %v9250_v35 }
 0x710   : > { %5451 = vmax.xlane.f32.xlu1 %v9261_v21  ;;  %v9265_v52 = vadd.f32 %v6276_v8, %v9250_v35  ;;  %v9320_v40 = vpop.permute.xlu1 %5600 }
 0x712   : > { %v6277_v23 = vpop.f32.mrb[104].mxu0  ;;  %5453 = vmax.xlane.f32.xlu0 %v9265_v52 }
 0x713   : > { %v6278_v22 = vpop.f32.mrb[105].mxu0 }
 0x714   : > { %v6279_v3 = vadd.f32 %v6278_v22, %v6277_v23  ;;  %v6280_v27 = vpop.f32.mrb[106].mxu0  ;;  %v9322_v11 = vpop.permute.xlu1 %5605 }
 0x715   : > { %v6281_v9 = vpop.f32.mrb[107].mxu0  ;;  %v9332_v22 = vpop.xlane.xlu0 %3741 }
 0x716   : > { %v6282_v15 = vadd.f32 %v6281_v9, %v6280_v27  ;;  %v9269_v24 = vadd.f32 %v6279_v3, %v9250_v35 }
 0x718   : > { %5455 = vmax.xlane.f32.xlu1 %v9269_v24  ;;  %v9273_v30 = vadd.f32 %v6282_v15, %v9250_v35  ;;  %v9324_v12 = vpop.permute.xlu1 %5610 }
 0x719   : > { %v9336_v27 = vpop.permute.xlu0 %5595 }
 0x71a   : > { %v6283_v18 = vpop.f32.mrb[108].mxu0  ;;  %5457 = vmax.xlane.f32.xlu0 %v9273_v30 }
 0x71b   : > { %v6284_v32 = vpop.f32.mrb[109].mxu0 }
 0x71c   : > { %v6285_v39 = vadd.f32 %v6284_v32, %v6283_v18  ;;  %v6286_v31 = vpop.f32.mrb[110].mxu0 }
 0x71d   : > { %v6287_v44 = vpop.f32.mrb[111].mxu0  ;;  %v9340_v15 = vpop.permute.xlu0 %5640 }
 0x71e   : > { %v6288_v48 = vadd.f32 %v6287_v44, %v6286_v31  ;;  %v9277_v53 = vadd.f32 %v6285_v39, %v9250_v35 }
 0x720   : > { %5459 = vmax.xlane.f32.xlu1 %v9277_v53  ;;  %v9281_v57 = vadd.f32 %v6288_v48, %v9250_v35 }
 0x721   : > { %v9344_v32 = vpop.permute.xlu0 %5650 }
 0x722   : > { %v6289_v19 = vpop.f32.mrb[112].mxu0  ;;  %5461 = vmax.xlane.f32.xlu0 %v9281_v57 }
 0x723   : > { %v6290_v55 = vpop.f32.mrb[113].mxu0 }
 0x724   : > { %v6291_v50 = vadd.f32 %v6290_v55, %v6289_v19  ;;  %v6292_v37 = vpop.f32.mrb[114].mxu0 }
 0x725   : > { %v6293_v4 = vpop.f32.mrb[115].mxu0 }
 0x726   : > { %v6294_v51 = vadd.f32 %v6293_v4, %v6292_v37  ;;  %v9285_v60 = vadd.f32 %v6291_v50, %v9250_v35 }
 0x728   : > { %5463 = vmax.xlane.f32.xlu1 %v9285_v60  ;;  %v9289_v0 = vadd.f32 %v6294_v51, %v9250_v35 }
 0x72a   : > { %v6295_v33 = vpop.f32.mrb[116].mxu0  ;;  %5465 = vmax.xlane.f32.xlu0 %v9289_v0 }
 0x72b   : > { %v6296_v38 = vpop.f32.mrb[117].mxu0 }
 0x72c   : > { %v6297_v42 = vadd.f32 %v6296_v38, %v6295_v33  ;;  %v6298_v14 = vpop.f32.mrb[118].mxu0 }
 0x72d   : > { %v6299_v36 = vpop.f32.mrb[119].mxu0 }
 0x72e   : > { %v6300_v62 = vadd.f32 %v6299_v36, %v6298_v14  ;;  %v9293_v1 = vadd.f32 %v6297_v42, %v9250_v35 }
 0x730   : > { %5467 = vmax.xlane.f32.xlu1 %v9293_v1  ;;  %v9297_v54 = vadd.f32 %v6300_v62, %v9250_v35 }
 0x732   : > { %v6301_v41 = vpop.f32.mrb[120].mxu0  ;;  %5469 = vmax.xlane.f32.xlu0 %v9297_v54 }
 0x733   : > { %v6302_v56 = vpop.f32.mrb[121].mxu0 }
 0x734   : > { %v6303_v13 = vadd.f32 %v6302_v56, %v6301_v41  ;;  %v6304_v46 = vpop.f32.mrb[122].mxu0 }
 0x735   : > { %v6305_v7 = vpop.f32.mrb[123].mxu0 }
 0x736   : > { %v6306_v6 = vadd.f32 %v6305_v7, %v6304_v46  ;;  %v9301_v61 = vadd.f32 %v6303_v13, %v9250_v35 }
 0x738   : > { %5471 = vmax.xlane.f32.xlu1 %v9301_v61  ;;  %v9305_v59 = vadd.f32 %v6306_v6, %v9250_v35 }
 0x73a   : > { %v6307_v47 = vpop.f32.mrb[124].mxu0  ;;  %5473 = vmax.xlane.f32.xlu0 %v9305_v59 }
 0x73b   : > { %v6308_v34 = vpop.f32.mrb[125].mxu0 }
 0x73c   : > { %v6309_v29 = vadd.f32 %v6308_v34, %v6307_v47  ;;  %v6310_v49 = vpop.f32.mrb[126].mxu0 }
 0x73d   : > { %v6311_v26 = vpop.f32.mrb[127].mxu0 }
 0x73e   : > { %v6312_v63 = vadd.f32 %v6311_v26, %v6310_v49  ;;  %v9309_v2 = vadd.f32 %v6309_v29, %v9250_v35 }
 0x740   : > { %5475 = vmax.xlane.f32.xlu1 %v9309_v2  ;;  %v9313_v58 = vadd.f32 %v6312_v63, %v9250_v35  ;;  %v9326_v35 = vpop.permute.xlu1 %5615 }
 0x742   : > { %5477 = vmax.xlane.f32.xlu0 %v9313_v58 }
 0x744   : > { %v9328_v8 = vpop.permute.xlu1 %5620 }
 0x748   : > { %v9330_v23 = vpop.permute.xlu1 %5625 }
 0x74c   : > { %v9334_v3 = vpop.permute.xlu1 %5630 }
 0x750   : > { %v9338_v9 = vpop.permute.xlu1 %5635 }
 0x751   : > { %5655 = vperm.xlu1 %6612, %v3765_v10  }
 0x754   : > { %v9342_v18 = vpop.permute.xlu1 %5645 }
 0x758   : > { %5660 = vperm.xlu0 %6611, %v3766_v25  }
 0x795   : > { %v5448_v39 = vpop.xlane.xlu1 %5447 }
 0x796   : > { %v5479_v31 = vsub.f32 %v9253_v17, %v5448_v39 }
 0x797   : > { %v5450_v44 = vpop.xlane.xlu0 %5449 }
 0x798   : > { %v5495_v48 = vmul.f32 1.442695, %v5479_v31  ;;  %v5480_v19 = vsub.f32 %v9257_v5, %v5450_v44 }
 0x79a   : > { %7157 = vpow2.f32 %v5495_v48  ;;  %v5497_v55 = vmul.f32 1.442695, %v5480_v19 }
 0x79c   : > { %7159 = vpow2.f32 %v5497_v55 }
 0x79d   : > { %v5452_v50 = vpop.xlane.xlu1 %5451 }
 0x79e   : > { %v5481_v37 = vsub.f32 %v9261_v21, %v5452_v50 }
 0x79f   : > { %v5454_v4 = vpop.xlane.xlu0 %5453 }
 0x7a0   : > { %v5499_v51 = vmul.f32 1.442695, %v5481_v37  ;;  %v5482_v33 = vsub.f32 %v9265_v52, %v5454_v4 }
 0x7a2   : > { %7161 = vpow2.f32 %v5499_v51  ;;  %v5501_v38 = vmul.f32 1.442695, %v5482_v33 }
 0x7a4   : > { %v9350_v42 = vpop.eup %7157  ;;  %7163 = vpow2.f32 %v5501_v38 }
 0x7a5   : > { %5527 = vadd.xlane.f32.xlu0 %v9350_v42  ;;  %v5456_v17 = vpop.xlane.xlu1 %5455 }
 0x7a6   : > { %v9353_v14 = vpop.eup %7159  ;;  %v5483_v5 = vsub.f32 %v9269_v24, %v5456_v17 }
 0x7a7   : > { %5529 = vadd.xlane.f32.xlu1 %v9353_v14  ;;  %v5458_v36 = vpop.xlane.xlu0 %5457 }
 0x7a8   : > { %v5503_v21 = vmul.f32 1.442695, %v5483_v5  ;;  %v5484_v62 = vsub.f32 %v9273_v30, %v5458_v36 }
 0x7aa   : > { %7165 = vpow2.f32 %v5503_v21  ;;  %v5505_v52 = vmul.f32 1.442695, %v5484_v62 }
 0x7ac   : > { %v9358_v41 = vpop.eup %7161  ;;  %7167 = vpow2.f32 %v5505_v52  ;;  %v3768_v52 = vadd.f32 %v9213_v28, %v9318_v16 }
 0x7ad   : > { %5531 = vadd.xlane.f32.xlu0 %v9358_v41  ;;  %v5460_v56 = vpop.xlane.xlu1 %5459 }
 0x7ae   : > { %v9361_v13 = vpop.eup %7163  ;;  %v5485_v46 = vsub.f32 %v9277_v53, %v5460_v56 }
 0x7af   : > { %5533 = vadd.xlane.f32.xlu1 %v9361_v13  ;;  %v5462_v24 = vpop.xlane.xlu0 %5461 }
 0x7b0   : > { %v5507_v7 = vmul.f32 1.442695, %v5485_v46  ;;  %v5486_v6 = vsub.f32 %v9281_v57, %v5462_v24 }
 0x7b2   : > { %7169 = vpow2.f32 %v5507_v7  ;;  %v5509_v30 = vmul.f32 1.442695, %v5486_v6  ;;  %v9419_v6 = vand.u32 127, %v946_v45 }
 0x7b4   : > { %v9366_v47 = vpop.eup %7165  ;;  %7171 = vpow2.f32 %v5509_v30  ;;  %vm5673_vm0 = vcmp.eq.s32.totalorder %v9419_v6, 0 }
 0x7b5   : > { %5535 = vadd.xlane.f32.xlu0 %v9366_v47  ;;  %v5464_v34 = vpop.xlane.xlu1 %5463 }
 0x7b6   : > { %v9369_v29 = vpop.eup %7167  ;;  %v5487_v49 = vsub.f32 %v9285_v60, %v5464_v34 }
 0x7b7   : > { %5537 = vadd.xlane.f32.xlu1 %v9369_v29  ;;  %v5466_v53 = vpop.xlane.xlu0 %5465 }
 0x7b8   : > { %v5511_v26 = vmul.f32 1.442695, %v5487_v49  ;;  %v5488_v63 = vsub.f32 %v9289_v0, %v5466_v53 }
 0x7ba   : > { %7173 = vpow2.f32 %v5511_v26  ;;  %v5513_v57 = vmul.f32 1.442695, %v5488_v63 }
 0x7bc   : > { %v9374_v20 = vpop.eup %7169  ;;  %7175 = vpow2.f32 %v5513_v57 }
 0x7bd   : > { %5539 = vadd.xlane.f32.xlu0 %v9374_v20  ;;  %v5468_v10 = vpop.xlane.xlu1 %5467 }
 0x7be   : > { %v9377_v43 = vpop.eup %7171  ;;  %v5489_v25 = vsub.f32 %v9293_v1, %v5468_v10 }
 0x7bf   : > { %5541 = vadd.xlane.f32.xlu1 %v9377_v43  ;;  %v5470_v60 = vpop.xlane.xlu0 %5469 }
 0x7c0   : > { %v5515_v39 = vmul.f32 1.442695, %v5489_v25  ;;  %v5490_v31 = vsub.f32 %v9297_v54, %v5470_v60 }
 0x7c2   : > { %7177 = vpow2.f32 %v5515_v39  ;;  %v5517_v0 = vmul.f32 1.442695, %v5490_v31 }
 0x7c4   : > { %v9382_v44 = vpop.eup %7173  ;;  %7179 = vpow2.f32 %v5517_v0 }
 0x7c5   : > { %5543 = vadd.xlane.f32.xlu0 %v9382_v44  ;;  %v5472_v48 = vpop.xlane.xlu1 %5471 }
 0x7c6   : > { %v9385_v19 = vpop.eup %7175  ;;  %v5491_v55 = vsub.f32 %v9301_v61, %v5472_v48 }
 0x7c7   : > { %5545 = vadd.xlane.f32.xlu1 %v9385_v19  ;;  %v5474_v1 = vpop.xlane.xlu0 %5473 }
 0x7c8   : > { %v5519_v50 = vmul.f32 1.442695, %v5491_v55  ;;  %v5492_v37 = vsub.f32 %v9305_v59, %v5474_v1 }
 0x7ca   : > { %7181 = vpow2.f32 %v5519_v50  ;;  %v5521_v54 = vmul.f32 1.442695, %v5492_v37 }
 0x7cc   : > { %v9390_v4 = vpop.eup %7177  ;;  %7183 = vpow2.f32 %v5521_v54 }
 0x7cd   : > { %5547 = vadd.xlane.f32.xlu0 %v9390_v4  ;;  %v5476_v51 = vpop.xlane.xlu1 %5475 }
 0x7ce   : > { %v9393_v33 = vpop.eup %7179  ;;  %v5493_v38 = vsub.f32 %v9309_v2, %v5476_v51 }
 0x7cf   : > { %5549 = vadd.xlane.f32.xlu1 %v9393_v33  ;;  %v5478_v61 = vpop.xlane.xlu0 %5477 }
 0x7d0   : > { %v5523_v17 = vmul.f32 1.442695, %v5493_v38  ;;  %v5494_v5 = vsub.f32 %v9313_v58, %v5478_v61  ;;  %v3767_v58 = vadd.f32 %v9213_v28, %v9332_v22 }
 0x7d1   : > { %v9416_v46 = vpop.permute.xlu1 %5655 }
 0x7d2   : > { %7185 = vpow2.f32 %v5523_v17  ;;  %v5525_v59 = vmul.f32 1.442695, %v5494_v5 }
 0x7d4   : > { %v9398_v36 = vpop.eup %7181  ;;  %7187 = vpow2.f32 %v5525_v59 }
 0x7d5   : > { %5551 = vadd.xlane.f32.xlu0 %v9398_v36 }
 0x7d6   : > { %v9401_v21 = vpop.eup %7183 }
 0x7d7   : > { %5553 = vadd.xlane.f32.xlu1 %v9401_v21  ;;  %v9414_v56 = vpop.permute.xlu0 %5660 }
 0x7dc   : > { %v9404_v62 = vpop.eup %7185 }
 0x7dd   : > { %5555 = vadd.xlane.f32.xlu0 %v9404_v62 }
 0x7de   : > { %v9407_v2 = vpop.eup %7187 }
 0x7df   : > { %5557 = vadd.xlane.f32.xlu1 %v9407_v2 }
 0x7f0   : > { %5665 = vperm.xlu1 %6612, %v3767_v58  }
 0x7f3   : > { %5670 = vperm.xlu0 %6611, %v3768_v52  }
 0x832   : > { %v5528_v24 = vpop.xlane.xlu0 %5527 }
 0x833   : > { %7189 = vrcp.f32 %v5528_v24 }
 0x834   : > { %v5530_v7 = vpop.xlane.xlu1 %5529 }
 0x835   : > { %7191 = vrcp.f32 %v5530_v7 }
 0x83a   : > { %v5532_v30 = vpop.xlane.xlu0 %5531 }
 0x83b   : > { %7193 = vrcp.f32 %v5532_v30 }
 0x83c   : > { %v5534_v22 = vpop.xlane.xlu1 %5533 }
 0x83d   : > { %v7190_v34 = vpop.eup %7189  ;;  %7195 = vrcp.f32 %v5534_v22 }
 0x83e   : > { %v5560_v28 = vmul.f32 %v7190_v34, %v9350_v42 }
 0x83f   : > { %v7192_v45 = vpop.eup %7191 }
 0x840   : > { %v5674_v16 = vsel %vm5673_vm0, %v9336_v27, %v5560_v28  ;;  %v5562_v49 = vmul.f32 %v7192_v45, %v9353_v14 }
 0x841   : > { %5690 = vst [vmem:[%s9426_s13] sm:$0xff] %v5674_v16 }
 0x842   : > { %v5675_v53 = vsel %vm5673_vm0, %v9320_v40, %v5562_v49  ;;  %v5536_v26 = vpop.xlane.xlu0 %5535 }
 0x843   : > { %5691 = vst [vmem:[%s9426_s13 + $0x8] sm:$0xff] %v5675_v53  ;;  %7197 = vrcp.f32 %v5536_v26 }
 0x844   : > { %v5538_v63 = vpop.xlane.xlu1 %5537 }
 0x845   : > { %v7194_v57 = vpop.eup %7193  ;;  %7199 = vrcp.f32 %v5538_v63 }
 0x846   : > { %v5564_v42 = vmul.f32 %v7194_v57, %v9358_v41 }
 0x847   : > { %v7196_v10 = vpop.eup %7195 }
 0x848   : > { %v5676_v27 = vsel %vm5673_vm0, %v9322_v11, %v5564_v42  ;;  %v5566_v14 = vmul.f32 %v7196_v10, %v9361_v13 }
 0x849   : > { %5692 = vst [vmem:[%s9426_s13 + $0x10] sm:$0xff] %v5676_v27 }
 0x84a   : > { %v5677_v40 = vsel %vm5673_vm0, %v9324_v12, %v5566_v14  ;;  %v5540_v25 = vpop.xlane.xlu0 %5539 }
 0x84b   : > { %5693 = vst [vmem:[%s9426_s13 + $0x18] sm:$0xff] %v5677_v40  ;;  %7201 = vrcp.f32 %v5540_v25 }
 0x84c   : > { %v5542_v60 = vpop.xlane.xlu1 %5541 }
 0x84d   : > { %v7198_v39 = vpop.eup %7197  ;;  %7203 = vrcp.f32 %v5542_v60 }
 0x84e   : > { %v5568_v41 = vmul.f32 %v7198_v39, %v9366_v47 }
 0x84f   : > { %v7200_v31 = vpop.eup %7199 }
 0x850   : > { %v5678_v11 = vsel %vm5673_vm0, %v9326_v35, %v5568_v41  ;;  %v5570_v13 = vmul.f32 %v7200_v31, %v9369_v29 }
 0x851   : > { %5694 = vst [vmem:[%s9426_s13 + $0x20] sm:$0xff] %v5678_v11 }
 0x852   : > { %v5679_v12 = vsel %vm5673_vm0, %v9328_v8, %v5570_v13  ;;  %v5544_v0 = vpop.xlane.xlu0 %5543 }
 0x853   : > { %5695 = vst [vmem:[%s9426_s13 + $0x28] sm:$0xff] %v5679_v12  ;;  %7205 = vrcp.f32 %v5544_v0 }
 0x854   : > { %v5546_v48 = vpop.xlane.xlu1 %5545 }
 0x855   : > { %v7202_v55 = vpop.eup %7201  ;;  %7207 = vrcp.f32 %v5546_v48 }
 0x856   : > { %v5572_v47 = vmul.f32 %v7202_v55, %v9374_v20 }
 0x857   : > { %v7204_v1 = vpop.eup %7203 }
 0x858   : > { %v5680_v35 = vsel %vm5673_vm0, %v9330_v23, %v5572_v47  ;;  %v5574_v29 = vmul.f32 %v7204_v1, %v9377_v43 }
 0x859   : > { %5696 = vst [vmem:[%s9426_s13 + $0x30] sm:$0xff] %v5680_v35 }
 0x85a   : > { %v5681_v8 = vsel %vm5673_vm0, %v9334_v3, %v5574_v29  ;;  %v5548_v50 = vpop.xlane.xlu0 %5547 }
 0x85b   : > { %5697 = vst [vmem:[%s9426_s13 + $0x38] sm:$0xff] %v5681_v8  ;;  %7209 = vrcp.f32 %v5548_v50 }
 0x85c   : > { %v5550_v37 = vpop.xlane.xlu1 %5549 }
 0x85d   : > { %v7206_v54 = vpop.eup %7205  ;;  %7211 = vrcp.f32 %v5550_v37 }
 0x85e   : > { %v5576_v20 = vmul.f32 %v7206_v54, %v9382_v44 }
 0x85f   : > { %v7208_v51 = vpop.eup %7207 }
 0x860   : > { %v5682_v23 = vsel %vm5673_vm0, %v9338_v9, %v5576_v20  ;;  %v5578_v43 = vmul.f32 %v7208_v51, %v9385_v19 }
 0x861   : > { %5698 = vst [vmem:[%s9426_s13 + $0x40] sm:$0xff] %v5682_v23 }
 0x862   : > { %v5683_v3 = vsel %vm5673_vm0, %v9340_v15, %v5578_v43  ;;  %v5552_v38 = vpop.xlane.xlu0 %5551 }
 0x863   : > { %5699 = vst [vmem:[%s9426_s13 + $0x48] sm:$0xff] %v5683_v3  ;;  %7213 = vrcp.f32 %v5552_v38 }
 0x864   : > { %v5554_v61 = vpop.xlane.xlu1 %5553 }
 0x865   : > { %v7210_v17 = vpop.eup %7209  ;;  %7215 = vrcp.f32 %v5554_v61 }
 0x866   : > { %v5580_v44 = vmul.f32 %v7210_v17, %v9390_v4 }
 0x867   : > { %v7212_v5 = vpop.eup %7211 }
 0x868   : > { %v5684_v9 = vsel %vm5673_vm0, %v9342_v18, %v5580_v44  ;;  %v5582_v19 = vmul.f32 %v7212_v5, %v9393_v33 }
 0x869   : > { %5700 = vst [vmem:[%s9426_s13 + $0x50] sm:$0xff] %v5684_v9 }
 0x86a   : > { %v5685_v15 = vsel %vm5673_vm0, %v9344_v32, %v5582_v19  ;;  %v5556_v59 = vpop.xlane.xlu0 %5555 }
 0x86b   : > { %5701 = vst [vmem:[%s9426_s13 + $0x58] sm:$0xff] %v5685_v15  ;;  %7217 = vrcp.f32 %v5556_v59 }
 0x86c   : > { %v5558_v58 = vpop.xlane.xlu1 %5557 }
 0x86d   : > { %v7214_v4 = vpop.eup %7213  ;;  %7219 = vrcp.f32 %v5558_v58 }
 0x86e   : > { %v5584_v52 = vmul.f32 %v7214_v4, %v9398_v36 }
 0x86f   : > { %v7216_v24 = vpop.eup %7215 }
 0x870   : > { %v5686_v18 = vsel %vm5673_vm0, %v9416_v46, %v5584_v52  ;;  %v5586_v33 = vmul.f32 %v7216_v24, %v9401_v21  ;;  %v5666_v34 = vpop.permute.xlu1 %5665 }
 0x871   : > { %5702 = vst [vmem:[%s9426_s13 + $0x60] sm:$0xff] %v5686_v18 }
 0x872   : > { %v5687_v32 = vsel %vm5673_vm0, %v9414_v56, %v5586_v33  ;;  %v5671_v46 = vpop.permute.xlu0 %5670 }
 0x873   : > { %5703 = vst [vmem:[%s9426_s13 + $0x68] sm:$0xff] %v5687_v32 }
 0x875   : > { %v7218_v7 = vpop.eup %7217 }
 0x876   : > { %v5588_v30 = vmul.f32 %v7218_v7, %v9404_v62 }
 0x877   : > { %v7220_v22 = vpop.eup %7219 }
 0x878   : > { %v5688_v36 = vsel %vm5673_vm0, %v5666_v34, %v5588_v30  ;;  %v5590_v28 = vmul.f32 %v7220_v22, %v9407_v2 }
 0x879   : > { %5704 = vst [vmem:[%s9426_s13 + $0x70] sm:$0xff] %v5688_v36 }
 0x87a   : > { %v5689_v21 = vsel %vm5673_vm0, %v5671_v46, %v5590_v28 }
 0x87b   : > { %5705 = vst [vmem:[%s9426_s13 + $0x78] sm:$0xff] %v5689_v21 }
 0x87c PF: > { %s32_s23 = sadd.s32 1, %s7227_s23  }
 0x87d   : > { %p29_p4 = scmp.ge.s32.totalorder %s32_s23, 4  }
 0x87f   :  { %31 = sbr.rel (!%p29_p4) target bundleno = 6 (0x6), region = 133 }

</bundles_post_ra>
